<compile_context>
chip_gen: v7x
topology: tpu7x:2x2x1
jax: 0.10.0
libtpu: 0.0.40
codegen_flags: <defaults>
</compile_context>

<pallas_src>
import functools

import jax
import jax.numpy as jnp
from jax.experimental import pallas as pl
from jax.experimental.pallas import tpu as pltpu

BN_EPS = 1e-5


# ----------------------------------------------------------------------------- kernels

def _conv_kernel(*refs, h, w, fuse_bn_relu):
    """3x3 'same' conv on an (NB, H, W, Cp) bf16 tile via im2col + one matmul.

    If fuse_bn_relu: the input tile is first mapped through relu(x*scale+shift)
    (bn1 + ReLU of the previous stage) before the conv.  Emits the conv output
    as bf16 (NB, H, W, Cp) and per-block partial BN stats (1, 2, Cp) in f32.
    """
    if fuse_bn_relu:
        x_ref, scale_ref, shift_ref, w_ref, y_ref, stats_ref, xp_scr, patch_scr = refs
    else:
        x_ref, w_ref, y_ref, stats_ref, xp_scr, patch_scr = refs
        scale_ref = shift_ref = None

    nb = x_ref.shape[0]
    cp = x_ref.shape[3]
    rows = nb * h * w

    # Zero the padded scratch every step: the border must be zero and the
    # scratch is uninitialized / core-local under megacore sharding.
    xp_scr[...] = jnp.zeros_like(xp_scr)

    xin = x_ref[...]
    if fuse_bn_relu:
        scl = scale_ref[...].reshape(1, 1, 1, cp)
        sft = shift_ref[...].reshape(1, 1, 1, cp)
        xin = jnp.maximum(xin.astype(jnp.float32) * scl + sft, 0.0)
        xin = xin.astype(jnp.bfloat16)
    xp_scr[:, 1:1 + h, 1:1 + w, :] = xin                    # zero-padded tile

    # im2col: (rows, 9*Cp) patch, tap-major along the lane axis.
    for kh in range(3):
        for kw in range(3):
            t = kh * 3 + kw
            tap = xp_scr[:, kh:kh + h, kw:kw + w, :].reshape(rows, cp)
            patch_scr[:, t * cp:(t + 1) * cp] = tap

    # Single MXU matmul, K = 9*Cp (>= 256 lanes of contraction), f32 accumulate.
    acc = jnp.dot(patch_scr[...], w_ref[...], preferred_element_type=jnp.float32)

    y_ref[...] = acc.reshape(nb, h, w, cp).astype(y_ref.dtype)
    s = jnp.sum(acc, axis=0, keepdims=True)                  # (1, Cp) partial sum
    ss = jnp.sum(acc * acc, axis=0, keepdims=True)           # (1, Cp) partial sumsq
    stats_ref[...] = jnp.concatenate([s, ss], axis=0).reshape(1, 2, cp)


def _bn_res_relu_kernel(y_ref, scale_ref, shift_ref, res_ref, out_ref):
    """out = relu(y * scale + shift + residual), f32 epilogue."""
    cp = y_ref.shape[-1]
    scl = scale_ref[...].reshape(1, 1, 1, cp)
    sft = shift_ref[...].reshape(1, 1, 1, cp)
    v = y_ref[...].astype(jnp.float32) * scl + sft + res_ref[...]
    out_ref[...] = jnp.maximum(v, 0.0).astype(out_ref.dtype)


# ----------------------------------------------------------------------------- helpers

def _largest_divisor_leq(n, cap):
    cap = max(1, min(n, cap))
    for d in range(cap, 0, -1):
        if n % d == 0:
            return d
    return 1


def _vmem_limit_bytes():
    """Generation-aware VMEM limit: ~96 MiB on v5e/v6e, ~48 MiB on v7x."""
    try:
        cap = int(pltpu.get_tpu_info().vmem_capacity_bytes)
    except Exception:
        cap = 64 * 1024 * 1024                    # conservative (v7x-sized) fallback
    return min(cap * 3 // 4, 96 * 1024 * 1024)


def _pick_block_images(n, h, w, cp, *, target_rows, vmem_budget):
    """Images per grid step: ~target_rows matmul rows, VMEM-bounded, grid >= 2."""
    hw = h * w
    per_img = (2 * hw * cp * 2                    # bf16 input block (double-buffered)
               + 2 * hw * cp * 2                  # bf16 output block (double-buffered)
               + (h + 2) * (w + 2) * cp * 2       # padded-input VMEM scratch
               + hw * 9 * cp * 2                  # im2col patch VMEM scratch
               + 2 * hw * cp * 4)                 # f32 matmul result / epilogue temps
    budget = max(per_img, vmem_budget - 2 * 9 * cp * cp * 2)   # minus resident weights
    cap = min(budget // per_img, max(1, target_rows // hw))
    if n >= 2:
        cap = min(cap, n // 2)                    # >=2 grid steps for v7x's two cores
    return _largest_divisor_leq(n, max(1, int(cap)))


# ----------------------------------------------------------------------------- wrappers

def _conv_pass(xin, wgt, scale, shift, *, n, h, w, cp, nb, fuse, vmem_limit):
    hw = h * w
    g = n // nb
    rows = nb * hw
    kern = functools.partial(_conv_kernel, h=h, w=w, fuse_bn_relu=fuse)

    img_spec = pl.BlockSpec((nb, h, w, cp), lambda i: (i, 0, 0, 0))
    vec_spec = pl.BlockSpec((1, cp), lambda i: (0, 0))
    w_spec = pl.BlockSpec((9 * cp, cp), lambda i: (0, 0))

    in_specs = [img_spec] + ([vec_spec, vec_spec] if fuse else []) + [w_spec]
    args = (xin,) + ((scale, shift) if fuse else ()) + (wgt,)

    flops = 2 * n * hw * 9 * cp * cp
    bytes_accessed = int(xin.size * 2 + wgt.size * 2
                         + n * hw * cp * 2 + g * 2 * cp * 4
                         + (2 * cp * 4 * 2 if fuse else 0))

    return pl.pallas_call(
        kern,
        grid=(g,),
        in_specs=in_specs,
        out_specs=[img_spec, pl.BlockSpec((1, 2, cp), lambda i: (i, 0, 0))],
        out_shape=(
            jax.ShapeDtypeStruct((n, h, w, cp), jnp.bfloat16),
            jax.ShapeDtypeStruct((g, 2, cp), jnp.float32),
        ),
        scratch_shapes=[
            pltpu.VMEM((nb, h + 2, w + 2, cp), jnp.bfloat16),   # zero-padded tile
            pltpu.VMEM((rows, 9 * cp), jnp.bfloat16),            # im2col patch
        ],
        compiler_params=pltpu.CompilerParams(
            dimension_semantics=("parallel",),
            vmem_limit_bytes=vmem_limit,
        ),
        cost_estimate=pl.CostEstimate(flops=flops, transcendentals=0,
                                      bytes_accessed=bytes_accessed),
    )(*args)


def _bn_scale_shift(stats, count, gamma, beta):
    """Fold global batch statistics into per-channel scale/shift (tiny XLA glue)."""
    s = jnp.sum(stats, axis=0)                               # (2, Cp)
    mean = s[0] / count
    var = jnp.maximum(s[1] / count - mean * mean, 0.0)       # biased var (BN training)
    inv = jax.lax.rsqrt(var + BN_EPS)
    scale = gamma * inv                                      # (1, Cp)
    shift = beta - mean * scale                              # (1, Cp)
    return scale, shift


def _bn_res_relu(y, scale, shift, res, *, nb, vmem_limit):
    n, h, w, cp = y.shape
    g = n // nb
    img_spec = pl.BlockSpec((nb, h, w, cp), lambda i: (i, 0, 0, 0))
    vec_spec = pl.BlockSpec((1, cp), lambda i: (0, 0))
    return pl.pallas_call(
        _bn_res_relu_kernel,
        grid=(g,),
        in_specs=[img_spec, vec_spec, vec_spec, img_spec],
        out_specs=img_spec,
        out_shape=jax.ShapeDtypeStruct((n, h, w, cp), jnp.float32),
        compiler_params=pltpu.CompilerParams(
            dimension_semantics=("parallel",),
            vmem_limit_bytes=vmem_limit,
        ),
    )(y, scale, shift, res)


def init_resblock_params(key, num_hidden):
    """Deterministic synthetic parameters matching ResBlock(num_hidden).

    Conv weights are stored lane-padded as (9*Cp, Cp) bf16, row index =
    (kh*3+kw)*Cp + cin.  Bias / gamma / beta are (1, Cp) f32 and are zero in the
    padded channels, so padded channels stay identically zero end-to-end.
    """
    c = num_hidden
    cp = max(128, ((c + 127) // 128) * 128)
    k1, k2, k3, k4 = jax.random.split(key, 4)
    s = 1.0 / jnp.sqrt(9.0 * c)

    def conv_w(k):
        wt = jax.random.normal(k, (3, 3, c, c), jnp.float32) * s
        wt = jnp.pad(wt, ((0, 0), (0, 0), (0, cp - c), (0, cp - c)))
        return wt.reshape(9 * cp, cp).astype(jnp.bfloat16)

    def conv_b(k):
        b = jax.random.normal(k, (c,), jnp.float32) * s
        return jnp.pad(b, (0, cp - c)).reshape(1, cp)

    gamma = jnp.pad(jnp.ones((c,), jnp.float32), (0, cp - c)).reshape(1, cp)
    zeros = jnp.zeros((1, cp), jnp.float32)
    return dict(w1=conv_w(k1), b1=conv_b(k2), g1=gamma, be1=zeros,
                w2=conv_w(k3), b2=conv_b(k4), g2=gamma, be2=zeros)


def resblock_forward(x_nchw, params):
    """ResBlock.forward for NCHW float32 input; returns NCHW float32.

    Note: the conv bias is intentionally NOT applied in the kernels — a
    per-channel bias immediately before BatchNorm (training mode) cancels
    exactly through the batch mean, so this is exact-math identical to the
    PyTorch module.
    """
    n, c, h, w = x_nchw.shape
    cp = params["w1"].shape[-1]
    hw = h * w

    # Layout glue (XLA): NCHW -> NHWC, channel-pad to Cp.  No spatial pad here —
    # padding happens inside the conv kernels in VMEM.
    x = jnp.transpose(x_nchw, (0, 2, 3, 1))
    x = jnp.pad(x, ((0, 0), (0, 0), (0, 0), (0, cp - c)))    # f32 residual
    x_bf = x.astype(jnp.bfloat16)

    vmem_limit = _vmem_limit_bytes()
    nb = _pick_block_images(n, h, w, cp, target_rows=4096,
                            vmem_budget=vmem_limit // 2)

    # Stage 1: conv1 -> y1 (bf16) + partial BN1 stats.
    y1, st1 = _conv_pass(x_bf, params["w1"], None, None,
                         n=n, h=h, w=w, cp=cp, nb=nb, fuse=False,
                         vmem_limit=vmem_limit)
    scale1, shift1 = _bn_scale_shift(st1, n * hw, params["g1"], params["be1"])

    # Stage 2: conv2 with fused bn1+ReLU+pad prologue -> y2 (bf16) + BN2 stats.
    y2, st2 = _conv_pass(y1, params["w2"], scale1, shift1,
                         n=n, h=h, w=w, cp=cp, nb=nb, fuse=True,
                         vmem_limit=vmem_limit)
    scale2, shift2 = _bn_scale_shift(st2, n * hw, params["g2"], params["be2"])

    # Stage 3: relu(bn2(y2) + residual).
    out = _bn_res_relu(y2, scale2, shift2, x, nb=nb, vmem_limit=vmem_limit)

    out = out[:, :, :, :c]
    return jnp.transpose(out, (0, 3, 1, 2))                  # NHWC -> NCHW


def _reference_forward(x_nchw, params, c):
    """Pure-JAX (XLA) reference of the same forward pass, for a sanity check."""
    cp = params["w1"].shape[-1]

    def conv(x_nhwc, wflat, b):
        wf = wflat.astype(jnp.float32).reshape(3, 3, cp, cp)[:, :, :c, :c]   # HWIO
        y = jax.lax.conv_general_dilated(
            x_nhwc, wf, window_strides=(1, 1), padding=((1, 1), (1, 1)),
            dimension_numbers=("NHWC", "HWIO", "NHWC"),
            precision=jax.lax.Precision.HIGHEST)
        return y + b[0, :c]                                  # bias cancels through BN

    def bn(y, gamma, beta):
        mean = jnp.mean(y, axis=(0, 1, 2))
        var = jnp.mean((y - mean) ** 2, axis=(0, 1, 2))
        return (y - mean) * jax.lax.rsqrt(var + BN_EPS) * gamma[0, :c] + beta[0, :c]

    x = jnp.transpose(x_nchw, (0, 2, 3, 1))
    h1 = jnp.maximum(bn(conv(x, params["w1"], params["b1"]),
                        params["g1"], params["be1"]), 0.0)
    y2 = bn(conv(h1, params["w2"], params["b2"]), params["g2"], params["be2"])
    out = jnp.maximum(y2 + x, 0.0)
    return jnp.transpose(out, (0, 3, 1, 2))


if __name__ == "__main__":
    key = jax.random.PRNGKey(0)
    kx, kp = jax.random.split(key)

    # Small shapes consistent with the module: batch=2, num_hidden=8, 8x8 board.
    N, C, H, W = 2, 8, 8, 8
    x = jax.random.normal(kx, (N, C, H, W), jnp.float32)
    params = init_resblock_params(kp, C)

    y = jax.jit(resblock_forward)(x, params)
    y = jax.block_until_ready(y)

    assert y.shape == (N, C, H, W) and y.dtype == jnp.float32
    assert bool(jnp.all(jnp.isfinite(y))) and bool(jnp.all(y >= 0.0))   # post-ReLU

    y_ref = _reference_forward(x, params, C)
    max_err = float(jnp.max(jnp.abs(y - y_ref)))
    assert max_err < 0.15, f"mismatch vs pure-JAX reference: {max_err}"

    print("KERNEL_OK")
</pallas_src>

<mosaic_0001>
module attributes {stable_mosaic.version = 11 : i64} {
  func.func @_conv_kernel(%arg0: i32, %arg1: memref<1x8x8x128xbf16, #tpu.memory_space<vmem>>, %arg2: memref<1152x128xbf16, #tpu.memory_space<vmem>>, %arg3: memref<1x8x8x128xbf16, #tpu.memory_space<vmem>>, %arg4: memref<1x2x128xf32, #tpu.memory_space<vmem>>, %arg5: memref<1x10x10x128xbf16, #tpu.memory_space<vmem>>, %arg6: memref<64x1152xbf16, #tpu.memory_space<vmem>>) attributes {dimension_semantics = [#tpu.dimension_semantics<parallel>], iteration_bounds = array<i64: 2>, scalar_prefetch = 0 : i64, scratch_operands = 2 : i64, tpu.core_type = #tpu.core_type<tc>, window_params = [{transform_indices = @transform_0, window_bounds = array<i64: 1, 8, 8, 128>}, {pipeline_mode = #tpu.pipeline_mode<synchronous>, transform_indices = @transform_1, window_bounds = array<i64: 1152, 128>}, {transform_indices = @transform_2, window_bounds = array<i64: 1, 8, 8, 128>}, {transform_indices = @transform_3, window_bounds = array<i64: 1, 2, 128>}]} {
    %cst = arith.constant 0.000000e+00 : bf16
    %0 = vector.broadcast %cst : bf16 to vector<1x10x10x128xbf16>
    %c0 = arith.constant 0 : index
    %c0_0 = arith.constant 0 : index
    %c0_1 = arith.constant 0 : index
    %c0_2 = arith.constant 0 : index
    %1 = vector.load %arg5[%c0, %c0_0, %c0_1, %c0_2] : memref<1x10x10x128xbf16, #tpu.memory_space<vmem>>, vector<1x10x10x128xbf16>
    tpu.vector_store %arg5[%c0, %c0_0, %c0_1, %c0_2], %0 {strides = array<i32>} : memref<1x10x10x128xbf16, #tpu.memory_space<vmem>>, vector<1x10x10x128xbf16>,
    %c0_3 = arith.constant 0 : index
    %c0_4 = arith.constant 0 : index
    %c0_5 = arith.constant 0 : index
    %c0_6 = arith.constant 0 : index
    %2 = vector.load %arg1[%c0_3, %c0_4, %c0_5, %c0_6] : memref<1x8x8x128xbf16, #tpu.memory_space<vmem>>, vector<1x8x8x128xbf16>
    %c0_7 = arith.constant 0 : index
    %c1 = arith.constant 1 : index
    %c1_8 = arith.constant 1 : index
    %c0_9 = arith.constant 0 : index
    %3 = vector.load %arg5[%c0_7, %c1, %c1_8, %c0_9] : memref<1x10x10x128xbf16, #tpu.memory_space<vmem>>, vector<1x8x8x128xbf16>
    tpu.vector_store %arg5[%c0_7, %c1, %c1_8, %c0_9], %2 {strides = array<i32>} : memref<1x10x10x128xbf16, #tpu.memory_space<vmem>>, vector<1x8x8x128xbf16>,
    %c0_10 = arith.constant 0 : index
    %c0_11 = arith.constant 0 : index
    %c0_12 = arith.constant 0 : index
    %c0_13 = arith.constant 0 : index
    %4 = vector.load %arg5[%c0_10, %c0_11, %c0_12, %c0_13] : memref<1x10x10x128xbf16, #tpu.memory_space<vmem>>, vector<1x8x8x128xbf16>
    %5 = vector.shape_cast %4 : vector<1x8x8x128xbf16> to vector<64x128xbf16>
    %c0_14 = arith.constant 0 : index
    %c0_15 = arith.constant 0 : index
    %6 = vector.load %arg6[%c0_14, %c0_15] : memref<64x1152xbf16, #tpu.memory_space<vmem>>, vector<64x128xbf16>
    tpu.vector_store %arg6[%c0_14, %c0_15], %5 {strides = array<i32>} : memref<64x1152xbf16, #tpu.memory_space<vmem>>, vector<64x128xbf16>,
    %c0_16 = arith.constant 0 : index
    %c0_17 = arith.constant 0 : index
    %c1_18 = arith.constant 1 : index
    %c0_19 = arith.constant 0 : index
    %7 = vector.load %arg5[%c0_16, %c0_17, %c1_18, %c0_19] : memref<1x10x10x128xbf16, #tpu.memory_space<vmem>>, vector<1x8x8x128xbf16>
    %8 = vector.shape_cast %7 : vector<1x8x8x128xbf16> to vector<64x128xbf16>
    %c0_20 = arith.constant 0 : index
    %c128 = arith.constant 128 : index
    %9 = vector.load %arg6[%c0_20, %c128] : memref<64x1152xbf16, #tpu.memory_space<vmem>>, vector<64x128xbf16>
    tpu.vector_store %arg6[%c0_20, %c128], %8 {strides = array<i32>} : memref<64x1152xbf16, #tpu.memory_space<vmem>>, vector<64x128xbf16>,
    %c0_21 = arith.constant 0 : index
    %c0_22 = arith.constant 0 : index
    %c2 = arith.constant 2 : index
    %c0_23 = arith.constant 0 : index
    %10 = vector.load %arg5[%c0_21, %c0_22, %c2, %c0_23] : memref<1x10x10x128xbf16, #tpu.memory_space<vmem>>, vector<1x8x8x128xbf16>
    %11 = vector.shape_cast %10 : vector<1x8x8x128xbf16> to vector<64x128xbf16>
    %c0_24 = arith.constant 0 : index
    %c256 = arith.constant 256 : index
    %12 = vector.load %arg6[%c0_24, %c256] : memref<64x1152xbf16, #tpu.memory_space<vmem>>, vector<64x128xbf16>
    tpu.vector_store %arg6[%c0_24, %c256], %11 {strides = array<i32>} : memref<64x1152xbf16, #tpu.memory_space<vmem>>, vector<64x128xbf16>,
    %c0_25 = arith.constant 0 : index
    %c1_26 = arith.constant 1 : index
    %c0_27 = arith.constant 0 : index
    %c0_28 = arith.constant 0 : index
    %13 = vector.load %arg5[%c0_25, %c1_26, %c0_27, %c0_28] : memref<1x10x10x128xbf16, #tpu.memory_space<vmem>>, vector<1x8x8x128xbf16>
    %14 = vector.shape_cast %13 : vector<1x8x8x128xbf16> to vector<64x128xbf16>
    %c0_29 = arith.constant 0 : index
    %c384 = arith.constant 384 : index
    %15 = vector.load %arg6[%c0_29, %c384] : memref<64x1152xbf16, #tpu.memory_space<vmem>>, vector<64x128xbf16>
    tpu.vector_store %arg6[%c0_29, %c384], %14 {strides = array<i32>} : memref<64x1152xbf16, #tpu.memory_space<vmem>>, vector<64x128xbf16>,
    %c0_30 = arith.constant 0 : index
    %c1_31 = arith.constant 1 : index
    %c1_32 = arith.constant 1 : index
    %c0_33 = arith.constant 0 : index
    %16 = vector.load %arg5[%c0_30, %c1_31, %c1_32, %c0_33] : memref<1x10x10x128xbf16, #tpu.memory_space<vmem>>, vector<1x8x8x128xbf16>
    %17 = vector.shape_cast %16 : vector<1x8x8x128xbf16> to vector<64x128xbf16>
    %c0_34 = arith.constant 0 : index
    %c512 = arith.constant 512 : index
    %18 = vector.load %arg6[%c0_34, %c512] : memref<64x1152xbf16, #tpu.memory_space<vmem>>, vector<64x128xbf16>
    tpu.vector_store %arg6[%c0_34, %c512], %17 {strides = array<i32>} : memref<64x1152xbf16, #tpu.memory_space<vmem>>, vector<64x128xbf16>,
    %c0_35 = arith.constant 0 : index
    %c1_36 = arith.constant 1 : index
    %c2_37 = arith.constant 2 : index
    %c0_38 = arith.constant 0 : index
    %19 = vector.load %arg5[%c0_35, %c1_36, %c2_37, %c0_38] : memref<1x10x10x128xbf16, #tpu.memory_space<vmem>>, vector<1x8x8x128xbf16>
    %20 = vector.shape_cast %19 : vector<1x8x8x128xbf16> to vector<64x128xbf16>
    %c0_39 = arith.constant 0 : index
    %c640 = arith.constant 640 : index
    %21 = vector.load %arg6[%c0_39, %c640] : memref<64x1152xbf16, #tpu.memory_space<vmem>>, vector<64x128xbf16>
    tpu.vector_store %arg6[%c0_39, %c640], %20 {strides = array<i32>} : memref<64x1152xbf16, #tpu.memory_space<vmem>>, vector<64x128xbf16>,
    %c0_40 = arith.constant 0 : index
    %c2_41 = arith.constant 2 : index
    %c0_42 = arith.constant 0 : index
    %c0_43 = arith.constant 0 : index
    %22 = vector.load %arg5[%c0_40, %c2_41, %c0_42, %c0_43] : memref<1x10x10x128xbf16, #tpu.memory_space<vmem>>, vector<1x8x8x128xbf16>
    %23 = vector.shape_cast %22 : vector<1x8x8x128xbf16> to vector<64x128xbf16>
    %c0_44 = arith.constant 0 : index
    %c768 = arith.constant 768 : index
    %24 = vector.load %arg6[%c0_44, %c768] : memref<64x1152xbf16, #tpu.memory_space<vmem>>, vector<64x128xbf16>
    tpu.vector_store %arg6[%c0_44, %c768], %23 {strides = array<i32>} : memref<64x1152xbf16, #tpu.memory_space<vmem>>, vector<64x128xbf16>,
    %c0_45 = arith.constant 0 : index
    %c2_46 = arith.constant 2 : index
    %c1_47 = arith.constant 1 : index
    %c0_48 = arith.constant 0 : index
    %25 = vector.load %arg5[%c0_45, %c2_46, %c1_47, %c0_48] : memref<1x10x10x128xbf16, #tpu.memory_space<vmem>>, vector<1x8x8x128xbf16>
    %26 = vector.shape_cast %25 : vector<1x8x8x128xbf16> to vector<64x128xbf16>
    %c0_49 = arith.constant 0 : index
    %c896 = arith.constant 896 : index
    %27 = vector.load %arg6[%c0_49, %c896] : memref<64x1152xbf16, #tpu.memory_space<vmem>>, vector<64x128xbf16>
    tpu.vector_store %arg6[%c0_49, %c896], %26 {strides = array<i32>} : memref<64x1152xbf16, #tpu.memory_space<vmem>>, vector<64x128xbf16>,
    %c0_50 = arith.constant 0 : index
    %c2_51 = arith.constant 2 : index
    %c2_52 = arith.constant 2 : index
    %c0_53 = arith.constant 0 : index
    %28 = vector.load %arg5[%c0_50, %c2_51, %c2_52, %c0_53] : memref<1x10x10x128xbf16, #tpu.memory_space<vmem>>, vector<1x8x8x128xbf16>
    %29 = vector.shape_cast %28 : vector<1x8x8x128xbf16> to vector<64x128xbf16>
    %c0_54 = arith.constant 0 : index
    %c1024 = arith.constant 1024 : index
    %30 = vector.load %arg6[%c0_54, %c1024] : memref<64x1152xbf16, #tpu.memory_space<vmem>>, vector<64x128xbf16>
    tpu.vector_store %arg6[%c0_54, %c1024], %29 {strides = array<i32>} : memref<64x1152xbf16, #tpu.memory_space<vmem>>, vector<64x128xbf16>,
    %c0_55 = arith.constant 0 : index
    %c0_56 = arith.constant 0 : index
    %31 = vector.load %arg6[%c0_55, %c0_56] : memref<64x1152xbf16, #tpu.memory_space<vmem>>, vector<64x1152xbf16>
    %c0_57 = arith.constant 0 : index
    %c0_58 = arith.constant 0 : index
    %32 = vector.load %arg2[%c0_57, %c0_58] : memref<1152x128xbf16, #tpu.memory_space<vmem>>, vector<1152x128xbf16>
    %cst_59 = arith.constant dense<0.000000e+00> : vector<64x128xf32>
    %33 = tpu.matmul %31, %32, %cst_59 {dimension_numbers = #tpu.dot_dimension_numbers<[1], [0], [0], [1], [0, 0, 1, 1], [], []>} : vector<64x1152xbf16>, vector<1152x128xbf16>, vector<64x128xf32> -> vector<64x128xf32>
    %34 = vector.shape_cast %33 : vector<64x128xf32> to vector<1x8x8x128xf32>
    %35 = arith.truncf %34 : vector<1x8x8x128xf32> to vector<1x8x8x128xbf16>
    %c0_60 = arith.constant 0 : index
    %c0_61 = arith.constant 0 : index
    %c0_62 = arith.constant 0 : index
    %c0_63 = arith.constant 0 : index
    %36 = vector.load %arg3[%c0_60, %c0_61, %c0_62, %c0_63] : memref<1x8x8x128xbf16, #tpu.memory_space<vmem>>, vector<1x8x8x128xbf16>
    tpu.vector_store %arg3[%c0_60, %c0_61, %c0_62, %c0_63], %35 {strides = array<i32>} : memref<1x8x8x128xbf16, #tpu.memory_space<vmem>>, vector<1x8x8x128xbf16>,
    %cst_64 = arith.constant dense<0.000000e+00> : vector<128xf32>
    %37 = vector.multi_reduction <add>, %33, %cst_64 [0] : vector<64x128xf32> to vector<128xf32>
    %38 = vector.shape_cast %37 : vector<128xf32> to vector<1x128xf32>
    %39 = arith.mulf %33, %33 : vector<64x128xf32>
    %cst_65 = arith.constant dense<0.000000e+00> : vector<128xf32>
    %40 = vector.multi_reduction <add>, %39, %cst_65 [0] : vector<64x128xf32> to vector<128xf32>
    %41 = vector.shape_cast %40 : vector<128xf32> to vector<1x128xf32>
    %42 = tpu.concatenate %38, %41 in 0 : vector<1x128xf32>, vector<1x128xf32> -> vector<2x128xf32>
    %43 = vector.shape_cast %42 : vector<2x128xf32> to vector<1x2x128xf32>
    %c0_66 = arith.constant 0 : index
    %c0_67 = arith.constant 0 : index
    %c0_68 = arith.constant 0 : index
    %44 = vector.load %arg4[%c0_66, %c0_67, %c0_68] : memref<1x2x128xf32, #tpu.memory_space<vmem>>, vector<1x2x128xf32>
    tpu.vector_store %arg4[%c0_66, %c0_67, %c0_68], %43 {strides = array<i32>} : memref<1x2x128xf32, #tpu.memory_space<vmem>>, vector<1x2x128xf32>,
    return
  }
  func.func @transform_0(%arg0: i32) -> (i32, i32, i32, i32) {
    %c0_i32 = arith.constant 0 : i32
    %c0_i32_0 = arith.constant 0 : i32
    %c0_i32_1 = arith.constant 0 : i32
    %c0_i32_2 = arith.constant 0 : i32
    return %arg0, %c0_i32, %c0_i32_0, %c0_i32_1 : i32, i32, i32, i32
  }
  func.func @transform_1(%arg0: i32) -> (i32, i32) {
    %c0_i32 = arith.constant 0 : i32
    %c0_i32_0 = arith.constant 0 : i32
    %c0_i32_1 = arith.constant 0 : i32
    return %c0_i32, %c0_i32_0 : i32, i32
  }
  func.func @transform_2(%arg0: i32) -> (i32, i32, i32, i32) {
    %c0_i32 = arith.constant 0 : i32
    %c0_i32_0 = arith.constant 0 : i32
    %c0_i32_1 = arith.constant 0 : i32
    %c0_i32_2 = arith.constant 0 : i32
    return %arg0, %c0_i32, %c0_i32_0, %c0_i32_1 : i32, i32, i32, i32
  }
  func.func @transform_3(%arg0: i32) -> (i32, i32, i32) {
    %c0_i32 = arith.constant 0 : i32
    %c0_i32_0 = arith.constant 0 : i32
    %c0_i32_1 = arith.constant 0 : i32
    return %arg0, %c0_i32, %c0_i32_0 : i32, i32, i32
  }
}

module attributes {stable_mosaic.version = 11 : i64} {
  func.func @_bn_res_relu_kernel(%arg0: i32, %arg1: memref<1x8x8x128xbf16, #tpu.memory_space<vmem>>, %arg2: memref<1x128xf32, #tpu.memory_space<vmem>>, %arg3: memref<1x128xf32, #tpu.memory_space<vmem>>, %arg4: memref<1x8x8x128xf32, #tpu.memory_space<vmem>>, %arg5: memref<1x8x8x128xf32, #tpu.memory_space<vmem>>) attributes {dimension_semantics = [#tpu.dimension_semantics<parallel>], iteration_bounds = array<i64: 2>, scalar_prefetch = 0 : i64, scratch_operands = 0 : i64, tpu.core_type = #tpu.core_type<tc>, window_params = [{transform_indices = @transform_0, window_bounds = array<i64: 1, 8, 8, 128>}, {pipeline_mode = #tpu.pipeline_mode<synchronous>, transform_indices = @transform_1, window_bounds = array<i64: 1, 128>}, {pipeline_mode = #tpu.pipeline_mode<synchronous>, transform_indices = @transform_2, window_bounds = array<i64: 1, 128>}, {transform_indices = @transform_3, window_bounds = array<i64: 1, 8, 8, 128>}, {transform_indices = @transform_4, window_bounds = array<i64: 1, 8, 8, 128>}]} {
    %c0 = arith.constant 0 : index
    %c0_0 = arith.constant 0 : index
    %0 = vector.load %arg2[%c0, %c0_0] : memref<1x128xf32, #tpu.memory_space<vmem>>, vector<1x128xf32>
    %1 = vector.shape_cast %0 : vector<1x128xf32> to vector<1x1x1x128xf32>
    %c0_1 = arith.constant 0 : index
    %c0_2 = arith.constant 0 : index
    %2 = vector.load %arg3[%c0_1, %c0_2] : memref<1x128xf32, #tpu.memory_space<vmem>>, vector<1x128xf32>
    %3 = vector.shape_cast %2 : vector<1x128xf32> to vector<1x1x1x128xf32>
    %c0_3 = arith.constant 0 : index
    %c0_4 = arith.constant 0 : index
    %c0_5 = arith.constant 0 : index
    %c0_6 = arith.constant 0 : index
    %4 = vector.load %arg1[%c0_3, %c0_4, %c0_5, %c0_6] : memref<1x8x8x128xbf16, #tpu.memory_space<vmem>>, vector<1x8x8x128xbf16>
    %5 = arith.extf %4 : vector<1x8x8x128xbf16> to vector<1x8x8x128xf32>
    %6 = vector.broadcast %1 : vector<1x1x1x128xf32> to vector<1x8x8x128xf32>
    %7 = arith.mulf %5, %6 : vector<1x8x8x128xf32>
    %8 = vector.broadcast %3 : vector<1x1x1x128xf32> to vector<1x8x8x128xf32>
    %9 = arith.addf %7, %8 : vector<1x8x8x128xf32>
    %c0_7 = arith.constant 0 : index
    %c0_8 = arith.constant 0 : index
    %c0_9 = arith.constant 0 : index
    %c0_10 = arith.constant 0 : index
    %10 = vector.load %arg4[%c0_7, %c0_8, %c0_9, %c0_10] : memref<1x8x8x128xf32, #tpu.memory_space<vmem>>, vector<1x8x8x128xf32>
    %11 = arith.addf %9, %10 : vector<1x8x8x128xf32>
    %cst = arith.constant 0.000000e+00 : f32
    %12 = vector.broadcast %cst : f32 to vector<1x8x8x128xf32>
    %13 = arith.maximumf %11, %12 : vector<1x8x8x128xf32>
    %c0_11 = arith.constant 0 : index
    %c0_12 = arith.constant 0 : index
    %c0_13 = arith.constant 0 : index
    %c0_14 = arith.constant 0 : index
    %14 = vector.load %arg5[%c0_11, %c0_12, %c0_13, %c0_14] : memref<1x8x8x128xf32, #tpu.memory_space<vmem>>, vector<1x8x8x128xf32>
    tpu.vector_store %arg5[%c0_11, %c0_12, %c0_13, %c0_14], %13 {strides = array<i32>} : memref<1x8x8x128xf32, #tpu.memory_space<vmem>>, vector<1x8x8x128xf32>,
    return
  }
  func.func @transform_0(%arg0: i32) -> (i32, i32, i32, i32) {
    %c0_i32 = arith.constant 0 : i32
    %c0_i32_0 = arith.constant 0 : i32
    %c0_i32_1 = arith.constant 0 : i32
    %c0_i32_2 = arith.constant 0 : i32
    return %arg0, %c0_i32, %c0_i32_0, %c0_i32_1 : i32, i32, i32, i32
  }
  func.func @transform_1(%arg0: i32) -> (i32, i32) {
    %c0_i32 = arith.constant 0 : i32
    %c0_i32_0 = arith.constant 0 : i32
    %c0_i32_1 = arith.constant 0 : i32
    return %c0_i32, %c0_i32_0 : i32, i32
  }
  func.func @transform_2(%arg0: i32) -> (i32, i32) {
    %c0_i32 = arith.constant 0 : i32
    %c0_i32_0 = arith.constant 0 : i32
    %c0_i32_1 = arith.constant 0 : i32
    return %c0_i32, %c0_i32_0 : i32, i32
  }
  func.func @transform_3(%arg0: i32) -> (i32, i32, i32, i32) {
    %c0_i32 = arith.constant 0 : i32
    %c0_i32_0 = arith.constant 0 : i32
    %c0_i32_1 = arith.constant 0 : i32
    %c0_i32_2 = arith.constant 0 : i32
    return %arg0, %c0_i32, %c0_i32_0, %c0_i32_1 : i32, i32, i32, i32
  }
  func.func @transform_4(%arg0: i32) -> (i32, i32, i32, i32) {
    %c0_i32 = arith.constant 0 : i32
    %c0_i32_0 = arith.constant 0 : i32
    %c0_i32_1 = arith.constant 0 : i32
    %c0_i32_2 = arith.constant 0 : i32
    return %arg0, %c0_i32, %c0_i32_0, %c0_i32_1 : i32, i32, i32, i32
  }
}

module attributes {stable_mosaic.version = 11 : i64} {
  func.func @_conv_kernel(%arg0: i32, %arg1: memref<1x8x8x128xbf16, #tpu.memory_space<vmem>>, %arg2: memref<1x128xf32, #tpu.memory_space<vmem>>, %arg3: memref<1x128xf32, #tpu.memory_space<vmem>>, %arg4: memref<1152x128xbf16, #tpu.memory_space<vmem>>, %arg5: memref<1x8x8x128xbf16, #tpu.memory_space<vmem>>, %arg6: memref<1x2x128xf32, #tpu.memory_space<vmem>>, %arg7: memref<1x10x10x128xbf16, #tpu.memory_space<vmem>>, %arg8: memref<64x1152xbf16, #tpu.memory_space<vmem>>) attributes {dimension_semantics = [#tpu.dimension_semantics<parallel>], iteration_bounds = array<i64: 2>, scalar_prefetch = 0 : i64, scratch_operands = 2 : i64, tpu.core_type = #tpu.core_type<tc>, window_params = [{transform_indices = @transform_0, window_bounds = array<i64: 1, 8, 8, 128>}, {pipeline_mode = #tpu.pipeline_mode<synchronous>, transform_indices = @transform_1, window_bounds = array<i64: 1, 128>}, {pipeline_mode = #tpu.pipeline_mode<synchronous>, transform_indices = @transform_2, window_bounds = array<i64: 1, 128>}, {pipeline_mode = #tpu.pipeline_mode<synchronous>, transform_indices = @transform_3, window_bounds = array<i64: 1152, 128>}, {transform_indices = @transform_4, window_bounds = array<i64: 1, 8, 8, 128>}, {transform_indices = @transform_5, window_bounds = array<i64: 1, 2, 128>}]} {
    %cst = arith.constant 0.000000e+00 : bf16
    %0 = vector.broadcast %cst : bf16 to vector<1x10x10x128xbf16>
    %c0 = arith.constant 0 : index
    %c0_0 = arith.constant 0 : index
    %c0_1 = arith.constant 0 : index
    %c0_2 = arith.constant 0 : index
    %1 = vector.load %arg7[%c0, %c0_0, %c0_1, %c0_2] : memref<1x10x10x128xbf16, #tpu.memory_space<vmem>>, vector<1x10x10x128xbf16>
    tpu.vector_store %arg7[%c0, %c0_0, %c0_1, %c0_2], %0 {strides = array<i32>} : memref<1x10x10x128xbf16, #tpu.memory_space<vmem>>, vector<1x10x10x128xbf16>,
    %c0_3 = arith.constant 0 : index
    %c0_4 = arith.constant 0 : index
    %c0_5 = arith.constant 0 : index
    %c0_6 = arith.constant 0 : index
    %2 = vector.load %arg1[%c0_3, %c0_4, %c0_5, %c0_6] : memref<1x8x8x128xbf16, #tpu.memory_space<vmem>>, vector<1x8x8x128xbf16>
    %c0_7 = arith.constant 0 : index
    %c0_8 = arith.constant 0 : index
    %3 = vector.load %arg2[%c0_7, %c0_8] : memref<1x128xf32, #tpu.memory_space<vmem>>, vector<1x128xf32>
    %4 = vector.shape_cast %3 : vector<1x128xf32> to vector<1x1x1x128xf32>
    %c0_9 = arith.constant 0 : index
    %c0_10 = arith.constant 0 : index
    %5 = vector.load %arg3[%c0_9, %c0_10] : memref<1x128xf32, #tpu.memory_space<vmem>>, vector<1x128xf32>
    %6 = vector.shape_cast %5 : vector<1x128xf32> to vector<1x1x1x128xf32>
    %7 = arith.extf %2 : vector<1x8x8x128xbf16> to vector<1x8x8x128xf32>
    %8 = vector.broadcast %4 : vector<1x1x1x128xf32> to vector<1x8x8x128xf32>
    %9 = arith.mulf %7, %8 : vector<1x8x8x128xf32>
    %10 = vector.broadcast %6 : vector<1x1x1x128xf32> to vector<1x8x8x128xf32>
    %11 = arith.addf %9, %10 : vector<1x8x8x128xf32>
    %cst_11 = arith.constant 0.000000e+00 : f32
    %12 = vector.broadcast %cst_11 : f32 to vector<1x8x8x128xf32>
    %13 = arith.maximumf %11, %12 : vector<1x8x8x128xf32>
    %14 = arith.truncf %13 : vector<1x8x8x128xf32> to vector<1x8x8x128xbf16>
    %c0_12 = arith.constant 0 : index
    %c1 = arith.constant 1 : index
    %c1_13 = arith.constant 1 : index
    %c0_14 = arith.constant 0 : index
    %15 = vector.load %arg7[%c0_12, %c1, %c1_13, %c0_14] : memref<1x10x10x128xbf16, #tpu.memory_space<vmem>>, vector<1x8x8x128xbf16>
    tpu.vector_store %arg7[%c0_12, %c1, %c1_13, %c0_14], %14 {strides = array<i32>} : memref<1x10x10x128xbf16, #tpu.memory_space<vmem>>, vector<1x8x8x128xbf16>,
    %c0_15 = arith.constant 0 : index
    %c0_16 = arith.constant 0 : index
    %c0_17 = arith.constant 0 : index
    %c0_18 = arith.constant 0 : index
    %16 = vector.load %arg7[%c0_15, %c0_16, %c0_17, %c0_18] : memref<1x10x10x128xbf16, #tpu.memory_space<vmem>>, vector<1x8x8x128xbf16>
    %17 = vector.shape_cast %16 : vector<1x8x8x128xbf16> to vector<64x128xbf16>
    %c0_19 = arith.constant 0 : index
    %c0_20 = arith.constant 0 : index
    %18 = vector.load %arg8[%c0_19, %c0_20] : memref<64x1152xbf16, #tpu.memory_space<vmem>>, vector<64x128xbf16>
    tpu.vector_store %arg8[%c0_19, %c0_20], %17 {strides = array<i32>} : memref<64x1152xbf16, #tpu.memory_space<vmem>>, vector<64x128xbf16>,
    %c0_21 = arith.constant 0 : index
    %c0_22 = arith.constant 0 : index
    %c1_23 = arith.constant 1 : index
    %c0_24 = arith.constant 0 : index
    %19 = vector.load %arg7[%c0_21, %c0_22, %c1_23, %c0_24] : memref<1x10x10x128xbf16, #tpu.memory_space<vmem>>, vector<1x8x8x128xbf16>
    %20 = vector.shape_cast %19 : vector<1x8x8x128xbf16> to vector<64x128xbf16>
    %c0_25 = arith.constant 0 : index
    %c128 = arith.constant 128 : index
    %21 = vector.load %arg8[%c0_25, %c128] : memref<64x1152xbf16, #tpu.memory_space<vmem>>, vector<64x128xbf16>
    tpu.vector_store %arg8[%c0_25, %c128], %20 {strides = array<i32>} : memref<64x1152xbf16, #tpu.memory_space<vmem>>, vector<64x128xbf16>,
    %c0_26 = arith.constant 0 : index
    %c0_27 = arith.constant 0 : index
    %c2 = arith.constant 2 : index
    %c0_28 = arith.constant 0 : index
    %22 = vector.load %arg7[%c0_26, %c0_27, %c2, %c0_28] : memref<1x10x10x128xbf16, #tpu.memory_space<vmem>>, vector<1x8x8x128xbf16>
    %23 = vector.shape_cast %22 : vector<1x8x8x128xbf16> to vector<64x128xbf16>
    %c0_29 = arith.constant 0 : index
    %c256 = arith.constant 256 : index
    %24 = vector.load %arg8[%c0_29, %c256] : memref<64x1152xbf16, #tpu.memory_space<vmem>>, vector<64x128xbf16>
    tpu.vector_store %arg8[%c0_29, %c256], %23 {strides = array<i32>} : memref<64x1152xbf16, #tpu.memory_space<vmem>>, vector<64x128xbf16>,
    %c0_30 = arith.constant 0 : index
    %c1_31 = arith.constant 1 : index
    %c0_32 = arith.constant 0 : index
    %c0_33 = arith.constant 0 : index
    %25 = vector.load %arg7[%c0_30, %c1_31, %c0_32, %c0_33] : memref<1x10x10x128xbf16, #tpu.memory_space<vmem>>, vector<1x8x8x128xbf16>
    %26 = vector.shape_cast %25 : vector<1x8x8x128xbf16> to vector<64x128xbf16>
    %c0_34 = arith.constant 0 : index
    %c384 = arith.constant 384 : index
    %27 = vector.load %arg8[%c0_34, %c384] : memref<64x1152xbf16, #tpu.memory_space<vmem>>, vector<64x128xbf16>
    tpu.vector_store %arg8[%c0_34, %c384], %26 {strides = array<i32>} : memref<64x1152xbf16, #tpu.memory_space<vmem>>, vector<64x128xbf16>,
    %c0_35 = arith.constant 0 : index
    %c1_36 = arith.constant 1 : index
    %c1_37 = arith.constant 1 : index
    %c0_38 = arith.constant 0 : index
    %28 = vector.load %arg7[%c0_35, %c1_36, %c1_37, %c0_38] : memref<1x10x10x128xbf16, #tpu.memory_space<vmem>>, vector<1x8x8x128xbf16>
    %29 = vector.shape_cast %28 : vector<1x8x8x128xbf16> to vector<64x128xbf16>
    %c0_39 = arith.constant 0 : index
    %c512 = arith.constant 512 : index
    %30 = vector.load %arg8[%c0_39, %c512] : memref<64x1152xbf16, #tpu.memory_space<vmem>>, vector<64x128xbf16>
    tpu.vector_store %arg8[%c0_39, %c512], %29 {strides = array<i32>} : memref<64x1152xbf16, #tpu.memory_space<vmem>>, vector<64x128xbf16>,
    %c0_40 = arith.constant 0 : index
    %c1_41 = arith.constant 1 : index
    %c2_42 = arith.constant 2 : index
    %c0_43 = arith.constant 0 : index
    %31 = vector.load %arg7[%c0_40, %c1_41, %c2_42, %c0_43] : memref<1x10x10x128xbf16, #tpu.memory_space<vmem>>, vector<1x8x8x128xbf16>
    %32 = vector.shape_cast %31 : vector<1x8x8x128xbf16> to vector<64x128xbf16>
    %c0_44 = arith.constant 0 : index
    %c640 = arith.constant 640 : index
    %33 = vector.load %arg8[%c0_44, %c640] : memref<64x1152xbf16, #tpu.memory_space<vmem>>, vector<64x128xbf16>
    tpu.vector_store %arg8[%c0_44, %c640], %32 {strides = array<i32>} : memref<64x1152xbf16, #tpu.memory_space<vmem>>, vector<64x128xbf16>,
    %c0_45 = arith.constant 0 : index
    %c2_46 = arith.constant 2 : index
    %c0_47 = arith.constant 0 : index
    %c0_48 = arith.constant 0 : index
    %34 = vector.load %arg7[%c0_45, %c2_46, %c0_47, %c0_48] : memref<1x10x10x128xbf16, #tpu.memory_space<vmem>>, vector<1x8x8x128xbf16>
    %35 = vector.shape_cast %34 : vector<1x8x8x128xbf16> to vector<64x128xbf16>
    %c0_49 = arith.constant 0 : index
    %c768 = arith.constant 768 : index
    %36 = vector.load %arg8[%c0_49, %c768] : memref<64x1152xbf16, #tpu.memory_space<vmem>>, vector<64x128xbf16>
    tpu.vector_store %arg8[%c0_49, %c768], %35 {strides = array<i32>} : memref<64x1152xbf16, #tpu.memory_space<vmem>>, vector<64x128xbf16>,
    %c0_50 = arith.constant 0 : index
    %c2_51 = arith.constant 2 : index
    %c1_52 = arith.constant 1 : index
    %c0_53 = arith.constant 0 : index
    %37 = vector.load %arg7[%c0_50, %c2_51, %c1_52, %c0_53] : memref<1x10x10x128xbf16, #tpu.memory_space<vmem>>, vector<1x8x8x128xbf16>
    %38 = vector.shape_cast %37 : vector<1x8x8x128xbf16> to vector<64x128xbf16>
    %c0_54 = arith.constant 0 : index
    %c896 = arith.constant 896 : index
    %39 = vector.load %arg8[%c0_54, %c896] : memref<64x1152xbf16, #tpu.memory_space<vmem>>, vector<64x128xbf16>
    tpu.vector_store %arg8[%c0_54, %c896], %38 {strides = array<i32>} : memref<64x1152xbf16, #tpu.memory_space<vmem>>, vector<64x128xbf16>,
    %c0_55 = arith.constant 0 : index
    %c2_56 = arith.constant 2 : index
    %c2_57 = arith.constant 2 : index
    %c0_58 = arith.constant 0 : index
    %40 = vector.load %arg7[%c0_55, %c2_56, %c2_57, %c0_58] : memref<1x10x10x128xbf16, #tpu.memory_space<vmem>>, vector<1x8x8x128xbf16>
    %41 = vector.shape_cast %40 : vector<1x8x8x128xbf16> to vector<64x128xbf16>
    %c0_59 = arith.constant 0 : index
    %c1024 = arith.constant 1024 : index
    %42 = vector.load %arg8[%c0_59, %c1024] : memref<64x1152xbf16, #tpu.memory_space<vmem>>, vector<64x128xbf16>
    tpu.vector_store %arg8[%c0_59, %c1024], %41 {strides = array<i32>} : memref<64x1152xbf16, #tpu.memory_space<vmem>>, vector<64x128xbf16>,
    %c0_60 = arith.constant 0 : index
    %c0_61 = arith.constant 0 : index
    %43 = vector.load %arg8[%c0_60, %c0_61] : memref<64x1152xbf16, #tpu.memory_space<vmem>>, vector<64x1152xbf16>
    %c0_62 = arith.constant 0 : index
    %c0_63 = arith.constant 0 : index
    %44 = vector.load %arg4[%c0_62, %c0_63] : memref<1152x128xbf16, #tpu.memory_space<vmem>>, vector<1152x128xbf16>
    %cst_64 = arith.constant dense<0.000000e+00> : vector<64x128xf32>
    %45 = tpu.matmul %43, %44, %cst_64 {dimension_numbers = #tpu.dot_dimension_numbers<[1], [0], [0], [1], [0, 0, 1, 1], [], []>} : vector<64x1152xbf16>, vector<1152x128xbf16>, vector<64x128xf32> -> vector<64x128xf32>
    %46 = vector.shape_cast %45 : vector<64x128xf32> to vector<1x8x8x128xf32>
    %47 = arith.truncf %46 : vector<1x8x8x128xf32> to vector<1x8x8x128xbf16>
    %c0_65 = arith.constant 0 : index
    %c0_66 = arith.constant 0 : index
    %c0_67 = arith.constant 0 : index
    %c0_68 = arith.constant 0 : index
    %48 = vector.load %arg5[%c0_65, %c0_66, %c0_67, %c0_68] : memref<1x8x8x128xbf16, #tpu.memory_space<vmem>>, vector<1x8x8x128xbf16>
    tpu.vector_store %arg5[%c0_65, %c0_66, %c0_67, %c0_68], %47 {strides = array<i32>} : memref<1x8x8x128xbf16, #tpu.memory_space<vmem>>, vector<1x8x8x128xbf16>,
    %cst_69 = arith.constant dense<0.000000e+00> : vector<128xf32>
    %49 = vector.multi_reduction <add>, %45, %cst_69 [0] : vector<64x128xf32> to vector<128xf32>
    %50 = vector.shape_cast %49 : vector<128xf32> to vector<1x128xf32>
    %51 = arith.mulf %45, %45 : vector<64x128xf32>
    %cst_70 = arith.constant dense<0.000000e+00> : vector<128xf32>
    %52 = vector.multi_reduction <add>, %51, %cst_70 [0] : vector<64x128xf32> to vector<128xf32>
    %53 = vector.shape_cast %52 : vector<128xf32> to vector<1x128xf32>
    %54 = tpu.concatenate %50, %53 in 0 : vector<1x128xf32>, vector<1x128xf32> -> vector<2x128xf32>
    %55 = vector.shape_cast %54 : vector<2x128xf32> to vector<1x2x128xf32>
    %c0_71 = arith.constant 0 : index
    %c0_72 = arith.constant 0 : index
    %c0_73 = arith.constant 0 : index
    %56 = vector.load %arg6[%c0_71, %c0_72, %c0_73] : memref<1x2x128xf32, #tpu.memory_space<vmem>>, vector<1x2x128xf32>
    tpu.vector_store %arg6[%c0_71, %c0_72, %c0_73], %55 {strides = array<i32>} : memref<1x2x128xf32, #tpu.memory_space<vmem>>, vector<1x2x128xf32>,
    return
  }
  func.func @transform_0(%arg0: i32) -> (i32, i32, i32, i32) {
    %c0_i32 = arith.constant 0 : i32
    %c0_i32_0 = arith.constant 0 : i32
    %c0_i32_1 = arith.constant 0 : i32
    %c0_i32_2 = arith.constant 0 : i32
    return %arg0, %c0_i32, %c0_i32_0, %c0_i32_1 : i32, i32, i32, i32
  }
  func.func @transform_1(%arg0: i32) -> (i32, i32) {
    %c0_i32 = arith.constant 0 : i32
    %c0_i32_0 = arith.constant 0 : i32
    %c0_i32_1 = arith.constant 0 : i32
    return %c0_i32, %c0_i32_0 : i32, i32
  }
  func.func @transform_2(%arg0: i32) -> (i32, i32) {
    %c0_i32 = arith.constant 0 : i32
    %c0_i32_0 = arith.constant 0 : i32
    %c0_i32_1 = arith.constant 0 : i32
    return %c0_i32, %c0_i32_0 : i32, i32
  }
  func.func @transform_3(%arg0: i32) -> (i32, i32) {
    %c0_i32 = arith.constant 0 : i32
    %c0_i32_0 = arith.constant 0 : i32
    %c0_i32_1 = arith.constant 0 : i32
    return %c0_i32, %c0_i32_0 : i32, i32
  }
  func.func @transform_4(%arg0: i32) -> (i32, i32, i32, i32) {
    %c0_i32 = arith.constant 0 : i32
    %c0_i32_0 = arith.constant 0 : i32
    %c0_i32_1 = arith.constant 0 : i32
    %c0_i32_2 = arith.constant 0 : i32
    return %arg0, %c0_i32, %c0_i32_0, %c0_i32_1 : i32, i32, i32, i32
  }
  func.func @transform_5(%arg0: i32) -> (i32, i32, i32) {
    %c0_i32 = arith.constant 0 : i32
    %c0_i32_0 = arith.constant 0 : i32
    %c0_i32_1 = arith.constant 0 : i32
    return %arg0, %c0_i32, %c0_i32_0 : i32, i32, i32
  }
}

</mosaic_0001>

<bundles_post_ra>
// kernel: resblock_forward.5
= control target key start
LH: loop header
LB: loop body
LE: loop exit
PB: predicated region body
PF: predicated region fallthrough
CT: control target
= control target key end

     0   :  { %s441_s15 = smov 0   ;;  %s485_s0 = inlined_call_operand.vmem [shape: bf16[2,8,8,128], index: 0, kind: input, shape index: {}]   ;;  %s486_s1 = inlined_call_operand.vmem [shape: f32[1,128], index: 1, kind: input, shape index: {}]   ;;  %s487_s2 = inlined_call_operand.vmem [shape: f32[1,128], index: 2, kind: input, shape index: {}]   ;;  %s488_s3 = inlined_call_operand.vmem [shape: f32[2,8,8,128], index: 3, kind: input, shape index: {}]   ;;  %s489_s4 = inlined_call_operand.vmem [shape: f32[2,8,8,128], index: 4, kind: output, shape index: {}]  }
   0x1 LB: > { %s363_s16 = sadd.s32 4294967295, %s414_s15   ;;  %p367_p0 = scmp.ge.s32.totalorder %s414_s15, 1  ;;  %s414_s15 = sphi %s441_s15, %s14_s15  }
   0x2   : > { %p172_p1 = scmp.lt.s32.totalorder %s414_s15, 3 }
   0x4   : > { %p173_p2 = pnand %p367_p0, %p172_p1 }
   0x5   : > { %p203_p3 = scmp.lt.s32.totalorder (!%p173_p2), %s363_s16, 1  ;;  %v374_v0 = vld [vmem:[%s486_s1] ss:$0 sm:$0xff] (!%p173_p2) }
   0x6   : > { %176 = sbr.rel (%p173_p2) target bundleno = 31 (0x1f), region = 36  ;;  %v375_v5 = vld [vmem:[%s487_s2] ss:$0 sm:$0xff] (!%p173_p2) }
   0xd   : > { %s491_s16 = smov (!%p203_p3, %s363_s16), 1 }
   0xe   : > { %s378_s17 = sshll.u32 %s491_s16, 5  ;;  %s379_s18 = sshll.u32 %s491_s16, 6 }
   0xf   : > { %s207_s21 = scalar_lea.vmem %s485_s0, %s378_s17  ;;  %s464_s26 = scalar_lea.vmem %s488_s3, %s379_s18 }
  0x10   : > { %v382_v1 = vld [vmem:[%s207_s21] sm:$0xff]   ;;  %v397_v4 = vld [vmem:[%s207_s21 + $0x8] sm:$0xff]   ;;  %v398_v8 = vld [vmem:[%s207_s21 + $0x10] sm:$0xff]   ;;  %s217_s5 = scalar_lea.vmem %s489_s4, %s379_s18 }
  0x11   : > { %v383_v2 = vunpack.c.l.bf16 %v382_v1  ;;  %v384_v3 = vunpack.c.h.bf16 %v382_v1  ;;  %v387_v6 = vunpack.c.l.bf16 %v397_v4  ;;  %v388_v7 = vunpack.c.h.bf16 %v397_v4  ;;  %v399_v13 = vld [vmem:[%s207_s21 + $0x18] sm:$0xff]   ;;  %v264_v14 = vld [vmem:[%s464_s26] sm:$0xff]  ;;  %v265_v15 = vld [vmem:[%s464_s26 + $0x8] sm:$0xff] }
  0x12   : > { %v391_v11 = vunpack.c.l.bf16 %v398_v8  ;;  %v392_v12 = vunpack.c.h.bf16 %v398_v8  ;;  %v395_v18 = vunpack.c.l.bf16 %v399_v13  ;;  %v396_v19 = vunpack.c.h.bf16 %v399_v13  ;;  %v266_v22 = vld [vmem:[%s464_s26 + $0x10] sm:$0xff]  ;;  %v267_v23 = vld [vmem:[%s464_s26 + $0x18] sm:$0xff]  ;;  %v268_v28 = vld [vmem:[%s464_s26 + $0x20] sm:$0xff] }
  0x13   : > { %v242_v9 = vmul.f32 %v383_v2, %v374_v0  ;;  %v243_v10 = vmul.f32 %v384_v3, %v374_v0  ;;  %v244_v16 = vmul.f32 %v387_v6, %v374_v0  ;;  %v245_v17 = vmul.f32 %v388_v7, %v374_v0  ;;  %v269_v29 = vld [vmem:[%s464_s26 + $0x28] sm:$0xff]  ;;  %v270_v36 = vld [vmem:[%s464_s26 + $0x30] sm:$0xff]  ;;  %v271_v37 = vld [vmem:[%s464_s26 + $0x38] sm:$0xff] }
  0x14   : > { %v246_v24 = vmul.f32 %v391_v11, %v374_v0  ;;  %v247_v25 = vmul.f32 %v392_v12, %v374_v0  ;;  %v248_v30 = vmul.f32 %v395_v18, %v374_v0  ;;  %v249_v31 = vmul.f32 %v396_v19, %v374_v0 }
  0x15   : > { %v256_v20 = vadd.f32 %v375_v5, %v242_v9  ;;  %v257_v21 = vadd.f32 %v375_v5, %v243_v10  ;;  %v258_v26 = vadd.f32 %v375_v5, %v244_v16  ;;  %v259_v27 = vadd.f32 %v375_v5, %v245_v17 }
  0x16   : > { %v260_v34 = vadd.f32 %v375_v5, %v246_v24  ;;  %v261_v35 = vadd.f32 %v375_v5, %v247_v25  ;;  %v262_v40 = vadd.f32 %v375_v5, %v248_v30  ;;  %v263_v41 = vadd.f32 %v375_v5, %v249_v31 }
  0x17   : > { %v272_v32 = vadd.f32 %v264_v14, %v256_v20  ;;  %v273_v33 = vadd.f32 %v265_v15, %v257_v21  ;;  %v274_v38 = vadd.f32 %v266_v22, %v258_v26  ;;  %v275_v39 = vadd.f32 %v267_v23, %v259_v27 }
  0x18   : > { %v276_v44 = vadd.f32 %v268_v28, %v260_v34  ;;  %v277_v45 = vadd.f32 %v269_v29, %v261_v35  ;;  %v278_v48 = vadd.f32 %v270_v36, %v262_v40  ;;  %v279_v49 = vadd.f32 %v271_v37, %v263_v41 }
  0x19   : > { %v280_v42 = vmax.f32 %v272_v32, 0.0  ;;  %v281_v43 = vmax.f32 %v273_v33, 0.0  ;;  %v282_v46 = vmax.f32 %v274_v38, 0.0  ;;  %v283_v47 = vmax.f32 %v275_v39, 0.0 }
  0x1a   : > { %v284_v50 = vmax.f32 %v276_v44, 0.0  ;;  %v285_v51 = vmax.f32 %v277_v45, 0.0  ;;  %v286_v52 = vmax.f32 %v278_v48, 0.0  ;;  %v287_v53 = vmax.f32 %v279_v49, 0.0 }
  0x1b   : > { %288 = vst [vmem:[%s217_s5] sm:$0xff] %v280_v42  ;;  %289 = vst [vmem:[%s217_s5 + $0x8] sm:$0xff] %v281_v43 }
  0x1c   : > { %290 = vst [vmem:[%s217_s5 + $0x10] sm:$0xff] %v282_v46  ;;  %291 = vst [vmem:[%s217_s5 + $0x18] sm:$0xff] %v283_v47 }
  0x1d   : > { %292 = vst [vmem:[%s217_s5 + $0x20] sm:$0xff] %v284_v50  ;;  %293 = vst [vmem:[%s217_s5 + $0x28] sm:$0xff] %v285_v51 }
  0x1e   : > { %294 = vst [vmem:[%s217_s5 + $0x30] sm:$0xff] %v286_v52  ;;  %295 = vst [vmem:[%s217_s5 + $0x38] sm:$0xff] %v287_v53 }
  0x1f PF: > { %s14_s15 = sadd.s32 1, %s414_s15  }
  0x20   : > { %p11_p4 = scmp.ge.s32.totalorder %s14_s15, 4  }
  0x22   :  { %13 = sbr.rel (!%p11_p4) target bundleno = 1 (0x1), region = 69 }

// kernel: resblock_forward.3
= control target key start
LH: loop header
LB: loop body
LE: loop exit
PB: predicated region body
PF: predicated region fallthrough
CT: control target
= control target key end

     0   :  { %s2736_s12 = smov 0   ;;  %s3168_s0 = inlined_call_operand.vmem [shape: bf16[2,8,8,128], index: 0, kind: input, shape index: {}]   ;;  %s3169_s1 = inlined_call_operand.vmem [shape: bf16[1152,128], index: 1, kind: input, shape index: {}]   ;;  %s3170_s2 = inlined_call_operand.vmem [shape: bf16[2,8,8,128], index: 2, kind: output, shape index: {0}]   ;;  %s3171_s3 = inlined_call_operand.vmem [shape: f32[2,2,128], index: 3, kind: output, shape index: {1}]  }
   0x1 LB: > { %s2233_s13 = sadd.s32 4294967295, %s2713_s12   ;;  %p2237_p0 = scmp.ge.s32.totalorder %s2713_s12, 1  ;;  %s2713_s12 = sphi %s2736_s12, %s14_s12  }
   0x2   : > { %p140_p1 = scmp.lt.s32.totalorder %s2713_s12, 3 }
   0x4   : > { %p141_p2 = pnand %p2237_p0, %p140_p1 }
   0x5   : > { %v2623_v0 = vld [vmem:[%s3169_s1 + $0x40] sm:$0xff] (!%p141_p2)   ;;  %v2715_v3 = vmov (!%p141_p2), 0   ;;  %v2627_v5 = vld [vmem:[%s3169_s1 + $0x48] sm:$0xff] (!%p141_p2)   ;;  %v2631_v9 = vld [vmem:[%s3169_s1 + $0x50] sm:$0xff] (!%p141_p2)   ;;  %p168_p3 = scmp.lt.s32.totalorder (!%p141_p2), %s2233_s13, 1  ;;  %vm292_vm0 = vcmask (!%p141_p2), 1043456  }
   0x6   : > { %144 = sbr.rel (%p141_p2) target bundleno = 383 (0x17f), region = 28  ;;  %v2624_v1 = vld [vmem:[%s3169_s1 + $0xc0] sm:$0xff] (!%p141_p2)   ;;  %2402 = vmatprep.subr.bf16.mxu0 (!%p141_p2), %v2623_v0  ;;  %183 = vst [vmem:[#allocation2] sm:$0xf] (!%p141_p2), %v2715_v3  ;;  %184 = vst [vmem:[#allocation2 + $0x4] sm:$0x1] (!%p141_p2), %v2715_v3 }
   0x7   : > { %v2625_v2 = vld [vmem:[%s3169_s1] sm:$0xff] (!%p141_p2)   ;;  %185 = vst [vmem:[#allocation2 + $0x8] sm:$0xf] (!%p141_p2), %v2715_v3  ;;  %186 = vst [vmem:[#allocation2 + $0xc] sm:$0x1] (!%p141_p2), %v2715_v3  ;;  %2442 = vmatprep.subr.bf16.mxu1 (!%p141_p2), %v2624_v1  ;;  %v2628_v6 = vld [vmem:[%s3169_s1 + $0xc8] sm:$0xff] (!%p141_p2)  }
   0x8   : > { %187 = vst [vmem:[#allocation2 + $0x10] sm:$0xf] (!%p141_p2), %v2715_v3  ;;  %188 = vst [vmem:[#allocation2 + $0x14] sm:$0x1] (!%p141_p2), %v2715_v3  ;;  %v2626_v4 = vld [vmem:[%s3169_s1 + $0x80] sm:$0xff] (!%p141_p2)   ;;  %2403 = vmatpush3.bf16.msra.mxu0 (!%p141_p2), %v2625_v2  ;;  %v2629_v7 = vld [vmem:[%s3169_s1 + $0x8] sm:$0xff] (!%p141_p2)  }
   0x9   : > { %189 = vst [vmem:[#allocation2 + $0x18] sm:$0xf] (!%p141_p2), %v2715_v3  ;;  %190 = vst [vmem:[#allocation2 + $0x1c] sm:$0x1] (!%p141_p2), %v2715_v3  ;;  %2443 = vmatpush3.bf16.msra.mxu1 (!%p141_p2), %v2626_v4  ;;  %2404 = vmatprep.subr.bf16.mxu0 (!%p141_p2), %v2627_v5  ;;  %v2630_v8 = vld [vmem:[%s3169_s1 + $0x88] sm:$0xff] (!%p141_p2)   ;;  %v2632_v10 = vld [vmem:[%s3169_s1 + $0xd0] sm:$0xff] (!%p141_p2)  }
   0xa   : > { %191 = vst [vmem:[#allocation2 + $0x20] sm:$0xf] (!%p141_p2), %v2715_v3  ;;  %192 = vst [vmem:[#allocation2 + $0x24] sm:$0x1] (!%p141_p2), %v2715_v3  ;;  %2444 = vmatprep.subr.bf16.mxu1 (!%p141_p2), %v2628_v6  ;;  %v2633_v11 = vld [vmem:[%s3169_s1 + $0x10] sm:$0xff] (!%p141_p2)   ;;  %v2635_v13 = vld [vmem:[%s3169_s1 + $0x58] sm:$0xff] (!%p141_p2)  }
   0xb   : > { %193 = vst [vmem:[#allocation2 + $0x28] sm:$0xf] (!%p141_p2), %v2715_v3  ;;  %194 = vst [vmem:[#allocation2 + $0x2c] sm:$0x1] (!%p141_p2), %v2715_v3  ;;  %v2634_v12 = vld [vmem:[%s3169_s1 + $0x90] sm:$0xff] (!%p141_p2)   ;;  %v2636_v14 = vld [vmem:[%s3169_s1 + $0xd8] sm:$0xff] (!%p141_p2)  }
   0xc   : > { %195 = vst [vmem:[#allocation2 + $0x30] sm:$0xf] (!%p141_p2), %v2715_v3  ;;  %196 = vst [vmem:[#allocation2 + $0x34] sm:$0x1] (!%p141_p2), %v2715_v3  ;;  %2405 = vmatpush3.bf16.msra.mxu0 (!%p141_p2), %v2629_v7  ;;  %v2637_v15 = vld [vmem:[%s3169_s1 + $0x18] sm:$0xff] (!%p141_p2)   ;;  %v2639_v17 = vld [vmem:[%s3169_s1 + $0x60] sm:$0xff] (!%p141_p2)  }
   0xd   : > { %197 = vst [vmem:[#allocation2 + $0x38] sm:$0xf] %v2715_v3  ;;  %198 = vst [vmem:[#allocation2 + $0x3c] sm:$0x1] %v2715_v3  ;;  %2445 = vmatpush3.bf16.msra.mxu1 %v2630_v8  ;;  %2406 = vmatprep.subr.bf16.mxu0 %v2631_v9  ;;  %v2638_v16 = vld [vmem:[%s3169_s1 + $0x98] sm:$0xff]   ;;  %v2640_v18 = vld [vmem:[%s3169_s1 + $0xe0] sm:$0xff]  }
   0xe   : > { %199 = vst [vmem:[#allocation2 + $0x40] sm:$0xf] %v2715_v3  ;;  %200 = vst [vmem:[#allocation2 + $0x44] sm:$0x1] %v2715_v3  ;;  %2446 = vmatprep.subr.bf16.mxu1 %v2632_v10  ;;  %v2641_v19 = vld [vmem:[%s3169_s1 + $0x20] sm:$0xff]   ;;  %v2643_v21 = vld [vmem:[%s3169_s1 + $0x68] sm:$0xff]  }
   0xf   : > { %201 = vst [vmem:[#allocation2 + $0x48] sm:$0xf] %v2715_v3  ;;  %202 = vst [vmem:[#allocation2 + $0x4c] sm:$0x1] %v2715_v3  ;;  %v2642_v20 = vld [vmem:[%s3169_s1 + $0xa0] sm:$0xff]   ;;  %v2644_v22 = vld [vmem:[%s3169_s1 + $0xe8] sm:$0xff]  }
  0x10   : > { %2407 = vmatpush3.bf16.msra.mxu0 %v2633_v11  ;;  %v2645_v23 = vld [vmem:[%s3169_s1 + $0x28] sm:$0xff]   ;;  %s3181_s13 = smov (!%p168_p3, %s2233_s13), 1  ;;  %v2647_v25 = vld [vmem:[%s3169_s1 + $0x70] sm:$0xff]   ;;  %v2651_v29 = vld [vmem:[%s3169_s1 + $0x78] sm:$0xff]   ;;  %vm293_vm1 = vsmask.f32 7938 }
  0x11   : > { %2447 = vmatpush3.bf16.msra.mxu1 %v2634_v12  ;;  %2408 = vmatprep.subr.bf16.mxu0 %v2635_v13  ;;  %v2646_v24 = vld [vmem:[%s3169_s1 + $0xa8] sm:$0xff]   ;;  %v2648_v26 = vld [vmem:[%s3169_s1 + $0xf0] sm:$0xff]   ;;  %s2377_s18 = sshll.u32 %s3181_s13, 5  ;;  %v2652_v30 = vld [vmem:[%s3169_s1 + $0xf8] sm:$0xff]   ;;  %vm298_vm2 = vcmask 1040384   ;;  %vm565_vm6 = vcmask 1042432  }
  0x12   : > { %2448 = vmatprep.subr.bf16.mxu1 %v2636_v14  ;;  %v2649_v27 = vld [vmem:[%s3169_s1 + $0x30] sm:$0xff]   ;;  %s2846_s27 = scalar_lea.vmem %s3168_s0, %s2377_s18  ;;  %v2653_v31 = vld [vmem:[%s3169_s1 + $0x38] sm:$0xff]   ;;  %vm299_vm3 = vsmask.f32 256  ;;  %v295_v36 = vld [vmem:[#allocation2 + $0x8] sm:$0xf]  ;;  %s177_s19 = scalar_lea.vmem %s3170_s2, %s2377_s18 }
  0x13   : > { %v2650_v28 = vld [vmem:[%s3169_s1 + $0xb0] sm:$0xff]   ;;  %v2654_v32 = vld [vmem:[%s3169_s1 + $0xb8] sm:$0xff]   ;;  %v203_v33 = vld [vmem:[%s2846_s27] sm:$0xf]  ;;  %vm566_vm7 = vcmask 1046532   ;;  %s2242_s18 = sshll.u32 %s3181_s13, 1 }
  0x14   : > { %2409 = vmatpush3.bf16.msra.mxu0 %v2637_v15  ;;  %v212_v34 = vshrl.u32 %v203_v33, 16  ;;  %v215_v35 = vshll.u32 %v203_v33, 16  ;;  %v382_v37 = vld [vmem:[#allocation2] sm:$0xf]  ;;  %vm2855_vm4 = vmand %vm292_vm0, %vm293_vm1  ;;  %v301_v40 = vld [vmem:[#allocation2 + $0xc] sm:$0x1]  ;;  %s181_s22 = scalar_lea.vmem %s3171_s3, %s2242_s18 }
  0x15   : > { %2449 = vmatpush3.bf16.msra.mxu1 %v2638_v16  ;;  %2410 = vmatprep.subr.bf16.mxu0 %v2639_v17  ;;  %v402_v41 = vshrl.u32 %v382_v37, 16  ;;  %v2657_v42 = vld [vmem:[%s3169_s1 + $0x140] sm:$0xff]   ;;  %vm2863_vm5 = vmand %vm298_vm2, %vm299_vm3  ;;  %v405_v45 = vshll.u32 %v382_v37, 16  ;;  %vm398_vm8 = vsmask.f32 3328 }
  0x16   : > { %2450 = vmatprep.subr.bf16.mxu1 %v2640_v18  ;;  %v214_v38 = vrot.slane %v212_v34, 7  ;;  %v383_v44 = vld [vmem:[#allocation2 + $0x4] sm:$0x1]  ;;  %vm399_vm9 = vsmask.f32 7440  ;;  %vm2879_vm10 = vmor %vm565_vm6, %vm566_vm7 }
  0x17   : > { %v204_v46 = vld [vmem:[%s2846_s27 + $0x4] sm:$0xf]  ;;  %v404_v54 = vrot.slane %v402_v41, 4  ;;  %v411_v55 = vshll.u32 %v383_v44, 16  ;;  %v304_v56 = vld [vmem:[#allocation2 + $0x10] sm:$0xf]  ;;  %vm2888_vm11 = vmor %vm398_vm8, %vm399_vm9 }
  0x18   : > { %2411 = vmatpush3.bf16.msra.mxu0 %v2641_v19  ;;  %v217_v47 = vor.u32 %v215_v35, %v214_v38  ;;  %v218_v48 = vrot.slane %v214_v38, 4  ;;  %v2658_v49 = vld [vmem:[%s3169_s1 + $0x1c0] sm:$0xff]   ;;  %v220_v50 = vshrl.u32 %v204_v46, 16  ;;  %v223_v51 = vshll.u32 %v204_v46, 16  ;;  %v205_v4 = vld [vmem:[%s2846_s27 + $0x8] sm:$0xf] }
  0x19   : > { %2451 = vmatpush3.bf16.msra.mxu1 %v2642_v20  ;;  %2412 = vmatprep.subr.bf16.mxu0 %v2643_v21  ;;  %v407_v57 = vrot.slane %v405_v45, 5  ;;  %v533_v59 = vld [vmem:[#allocation2] sm:$0xe]  ;;  %v534_v61 = vld [vmem:[#allocation2 + $0x4] sm:$0x1]  ;;  %v228_v10 = vshrl.u32 %v205_v4, 16 }
  0x1a   : > { %2452 = vmatprep.subr.bf16.mxu1 %v2644_v22  ;;  %v296_v52 = vsel %vm2855_vm4, %v217_v47, %v295_v36  ;;  %v302_v53 = vsel %vm2863_vm5, %v218_v48, %v301_v40  ;;  %v222_v58 = vrot.slane %v220_v50, 7  ;;  %v2251_v0 = vrot.slane %v533_v59, 9  ;;  %v307_v21 = vld [vmem:[#allocation2 + $0x14] sm:$0x1]  ;;  %v206_v36 = vld [vmem:[%s2846_s27 + $0xc] sm:$0xf] }
  0x1b   : > { %297 = vst [vmem:[#allocation2 + $0x8] sm:$0xf] %v296_v52  ;;  %303 = vst [vmem:[#allocation2 + $0xc] sm:$0x1] %v302_v53  ;;  %v408_v63 = vor.u32 %v407_v57, %v404_v54  ;;  %v570_v1 = vrot.slane %v534_v61, 5  ;;  %v413_v12 = vrot.slane %v411_v55, 5 }
  0x1c   : > { %2413 = vmatpush3.bf16.msra.mxu0 %v2645_v23  ;;  %v225_v60 = vor.u32 %v223_v51, %v222_v58  ;;  %v226_v2 = vrot.slane %v222_v58, 4  ;;  %v230_v23 = vrot.slane %v228_v10, 7  ;;  %v2662_v40 = vld [vmem:[%s3169_s1 + $0x1c8] sm:$0xff]   ;;  %v2659_v45 = vld [vmem:[%s3169_s1 + $0x100] sm:$0xff]   ;;  %v239_v50 = vshll.u32 %v206_v36, 16  ;;  %v2668_v59 = vld [vmem:[%s3169_s1 + $0x1d0] sm:$0xff]  }
  0x1d   : > { %2453 = vmatpush3.bf16.msra.mxu1 %v2646_v24  ;;  %2414 = vmatprep.subr.bf16.mxu0 %v2647_v25  ;;  %v409_v11 = vrot.slane %v408_v63, 4  ;;  %v571_v15 = vsel %vm2879_vm10, %v2251_v0, %v570_v1  ;;  %v231_v24 = vshll.u32 %v205_v4, 16  ;;  %v2664_v46 = vld [vmem:[%s3169_s1 + $0x188] sm:$0xff]   ;;  %v316_v55 = vld [vmem:[#allocation2 + $0x20] sm:$0xf] }
  0x1e   : > { %2454 = vmatprep.subr.bf16.mxu1 %v2648_v26  ;;  %v305_v62 = vsel %vm2855_vm4, %v225_v60, %v304_v56  ;;  %v308_v25 = vsel %vm2863_vm5, %v226_v2, %v307_v21  ;;  %v310_v26 = vld [vmem:[#allocation2 + $0x18] sm:$0xf]  ;;  %v234_v34 = vrot.slane %v230_v23, 4  ;;  %v2661_v52 = vld [vmem:[%s3169_s1 + $0x148] sm:$0xff]  }
  0x1f   : > { %306 = vst [vmem:[#allocation2 + $0x10] sm:$0xf] %v305_v62  ;;  %309 = vst [vmem:[#allocation2 + $0x14] sm:$0x1] %v308_v25  ;;  %v233_v33 = vor.u32 %v231_v24, %v230_v23  ;;  %v2663_v60 = vld [vmem:[%s3169_s1 + $0x108] sm:$0xff]  }
  0x20   : > { %2415 = vmatpush3.bf16.msra.mxu0 %v2649_v27  ;;  %v1088_v16 = vld [vmem:[#allocation2 + $0x4c] sm:$0x1] }
  0x21   : > { %2455 = vmatpush3.bf16.msra.mxu1 %v2650_v28  ;;  %2416 = vmatprep.subr.bf16.mxu0 %v2651_v29  ;;  %v313_v29 = vld [vmem:[#allocation2 + $0x1c] sm:$0x1]  ;;  %v311_v47 = vsel %vm2855_vm4, %v233_v33, %v310_v26  ;;  %v319_v33 = vld [vmem:[#allocation2 + $0x24] sm:$0x1] }
  0x22   : > { %2456 = vmatprep.subr.bf16.mxu1 %v2652_v30  ;;  %v384_v5 = vld [vmem:[#allocation2 + $0x8] sm:$0xf]  ;;  %v385_v6 = vld [vmem:[#allocation2 + $0xc] sm:$0x1]  ;;  %v414_v30 = vsel %vm2888_vm11, %v409_v11, %v413_v12  ;;  %v314_v48 = vsel %vm2863_vm5, %v234_v34, %v313_v29  ;;  %312 = vst [vmem:[#allocation2 + $0x18] sm:$0xf] %v311_v47 }
  0x23   : > { %v416_v7 = vshrl.u32 %v384_v5, 16  ;;  %v419_v8 = vshll.u32 %v384_v5, 16  ;;  %v425_v9 = vshll.u32 %v385_v6, 16  ;;  %v535_v13 = vld [vmem:[#allocation2 + $0x8] sm:$0xe]  ;;  %v2667_v5 = vld [vmem:[%s3169_s1 + $0x150] sm:$0xff]  }
  0x24   : > { %2417 = vmatpush3.bf16.msra.mxu0 %v2653_v31  ;;  %v536_v14 = vld [vmem:[#allocation2 + $0xc] sm:$0x1]  ;;  %v2252_v20 = vrot.slane %v535_v13, 9  ;;  %v2656_v44 = vld [vmem:[#allocation2] ss:$8 sps:$4 sm:$0xff]   ;;  %v2670_v6 = vld [vmem:[%s3169_s1 + $0x190] sm:$0xff]  }
  0x25   : > { %2457 = vmatpush3.bf16.msra.mxu1 %v2654_v32  ;;  %2482 = vmatprep.subr.bf16.mxu0 %v2657_v42  ;;  %v418_v17 = vrot.slane %v416_v7, 4  ;;  %v421_v18 = vrot.slane %v419_v8, 5  ;;  %v427_v19 = vrot.slane %v425_v9, 5  ;;  %v574_v22 = vrot.slane %v536_v14, 5  ;;  %v2660_v32 = vld [vmem:[%s3169_s1 + $0x180] sm:$0xff]   ;;  %v2672_v9 = vld [vmem:[%s3169_s1 + $0x1d8] sm:$0xff]  }
  0x26   : > { %2522 = vmatprep.subr.bf16.mxu1 %v2658_v49  ;;  %v2655_v28 = vld [vmem:[#allocation2 + $0x8] ss:$8 sps:$4 sm:$0xff]   ;;  %v236_v49 = vshrl.u32 %v206_v36, 16  ;;  %315 = vst [vmem:[#allocation2 + $0x1c] sm:$0x1] %v314_v48  ;;  %v2673_v29 = vld [vmem:[%s3169_s1 + $0x118] sm:$0xff]  }
  0x27   : > { %v422_v27 = vor.u32 %v421_v18, %v418_v17  ;;  %v575_v31 = vsel %vm2879_vm10, %v2252_v20, %v574_v22  ;;  %v386_v35 = vld [vmem:[#allocation2 + $0x10] sm:$0xf]  ;;  %1866 = vmatprep.mubr.bf16.mxu1 %v2655_v28  ;;  %v387_v61 = vld [vmem:[#allocation2 + $0x14] sm:$0x1]  ;;  %v2671_v18 = vld [vmem:[%s3169_s1 + $0x158] sm:$0xff]  }
  0x28   : > { %v2259_v38 = vcombine.low %v571_v15, %v575_v31  ;;  %v430_v41 = vshrl.u32 %v386_v35, 16  ;;  %v433_v42 = vshll.u32 %v386_v35, 16  ;;  %v537_v56 = vld [vmem:[#allocation2 + $0x10] sm:$0xe]  ;;  %v238_v58 = vrot.slane %v236_v49, 7  ;;  %v2674_v22 = vld [vmem:[%s3169_s1 + $0x198] sm:$0xff]  }
  0x29   : > { %v423_v37 = vrot.slane %v422_v27, 4  ;;  %v538_v63 = vld [vmem:[#allocation2 + $0x14] sm:$0x1]  ;;  %v439_v1 = vshll.u32 %v387_v61, 16  ;;  %v2253_v4 = vrot.slane %v537_v56, 9  ;;  %v2679_v56 = vld [vmem:[%s3169_s1 + $0x120] sm:$0xff]  }
  0x2a   : > { %1867 = vmatmul.mubr.bf16.vlgmr.msra.gmra.mrb[0].mxu1 %v2259_v38  ;;  %v432_v53 = vrot.slane %v430_v41, 4  ;;  %v435_v54 = vrot.slane %v433_v42, 5  ;;  %v241_v62 = vor.u32 %v239_v50, %v238_v58  ;;  %v242_v2 = vrot.slane %v238_v58, 4  ;;  %v388_v10 = vld [vmem:[#allocation2 + $0x18] sm:$0xf]  ;;  %v2669_v12 = vld [vmem:[%s3169_s1 + $0x110] sm:$0xff]  }
  0x2b   : > { %v428_v51 = vsel %vm2888_vm11, %v423_v37, %v427_v19  ;;  %2523 = vmatpush3.bf16.msra.mxu1 %v2660_v32  ;;  %v578_v8 = vrot.slane %v538_v63, 5  ;;  %v444_v14 = vshrl.u32 %v388_v10, 16  ;;  %v447_v15 = vshll.u32 %v388_v10, 16  ;;  %v539_v20 = vld [vmem:[#allocation2 + $0x18] sm:$0xe]  ;;  %v2680_v50 = vld [vmem:[%s3169_s1 + $0x1a0] sm:$0xff]  }
  0x2c   : > { %v2247_v57 = vcombine.low %v414_v30, %v428_v51  ;;  %2524 = vmatprep.subr.bf16.mxu1 %v2662_v40  ;;  %v436_v0 = vor.u32 %v435_v54, %v432_v53  ;;  %v317_v7 = vsel %vm2855_vm4, %v241_v62, %v316_v55  ;;  %v441_v19 = vrot.slane %v439_v1, 5  ;;  %v2678_v30 = vld [vmem:[%s3169_s1 + $0x1e0] sm:$0xff]   ;;  %v207_v32 = vld [vmem:[%s2846_s27 + $0x10] sm:$0xf]  ;;  %v208_v49 = vld [vmem:[%s2846_s27 + $0x14] sm:$0xf] }
  0x2d   : > { %318 = vst [vmem:[#allocation2 + $0x20] sm:$0xf] %v317_v7  ;;  %v389_v11 = vld [vmem:[#allocation2 + $0x1c] sm:$0x1]  ;;  %v446_v23 = vrot.slane %v444_v14, 4  ;;  %v449_v24 = vrot.slane %v447_v15, 5  ;;  %v579_v27 = vsel %vm2879_vm10, %v2253_v4, %v578_v8  ;;  %v320_v38 = vsel %vm2863_vm5, %v242_v2, %v319_v33 }
  0x2e   : > { %1801 = vmatprep.mubr.bf16.mxu0 %v2247_v57  ;;  %v437_v13 = vrot.slane %v436_v0, 4  ;;  %v453_v17 = vshll.u32 %v389_v11, 16  ;;  %v540_v21 = vld [vmem:[#allocation2 + $0x1c] sm:$0x1]  ;;  %v2254_v26 = vrot.slane %v539_v20, 9  ;;  %v244_v36 = vshrl.u32 %v207_v32, 16 }
  0x2f   : > { %1802 = vmatmul.mubr.bf16.vlgmr.msra.gmra.mrb[0].mxu0 %v2656_v44  ;;  %2525 = vmatpush3.bf16.msra.mxu1 %v2664_v46  ;;  %v582_v28 = vrot.slane %v540_v21, 5  ;;  %v450_v31 = vor.u32 %v449_v24, %v446_v23  ;;  %v247_v37 = vshll.u32 %v207_v32, 16  ;;  %v2666_v42 = vld [vmem:[#allocation2 + $0x10] ss:$8 sps:$4 sm:$0xff]   ;;  %321 = vst [vmem:[#allocation2 + $0x24] sm:$0x1] %v320_v38 }
  0x30   : > { %2483 = vmatpush3.bf16.msra.mxu0 %v2659_v45  ;;  %2526 = vmatprep.subr.bf16.mxu1 %v2668_v59  ;;  %v455_v25 = vrot.slane %v453_v17, 5  ;;  %v442_v40 = vsel %vm2888_vm11, %v437_v13, %v441_v19  ;;  %v322_v45 = vld [vmem:[#allocation2 + $0x28] sm:$0xf]  ;;  %v2677_v46 = vld [vmem:[%s3169_s1 + $0x160] sm:$0xff]   ;;  %v246_v47 = vrot.slane %v244_v36, 7  ;;  %v252_v55 = vshrl.u32 %v208_v49, 16 }
  0x31   : > { %2484 = vmatprep.subr.bf16.mxu0 %v2661_v52  ;;  %v583_v35 = vsel %vm2879_vm10, %v2254_v26, %v582_v28  ;;  %v451_v41 = vrot.slane %v450_v31, 4  ;;  %v325_v52 = vld [vmem:[#allocation2 + $0x2c] sm:$0x1]  ;;  %v328_v61 = vld [vmem:[#allocation2 + $0x30] sm:$0xf] }
  0x32   : > { %v2260_v44 = vcombine.low %v579_v27, %v583_v35  ;;  %v249_v58 = vor.u32 %v247_v37, %v246_v47  ;;  %v250_v59 = vrot.slane %v246_v47, 4  ;;  %v254_v1 = vrot.slane %v252_v55, 7  ;;  %v2681_v2 = vld [vmem:[%s3169_s1 + $0x168] sm:$0xff]   ;;  %v209_v21 = vld [vmem:[%s2846_s27 + $0x18] sm:$0xf] }
  0x33   : > { %2527 = vmatpush3.bf16.msra.mxu1 %v2670_v6  ;;  %v456_v51 = vsel %vm2888_vm11, %v451_v41, %v455_v25  ;;  %v2682_v8 = vld [vmem:[%s3169_s1 + $0x1e8] sm:$0xff]   ;;  %v334_v36 = vld [vmem:[#allocation2 + $0x38] sm:$0xf]  ;;  %v337_v47 = vld [vmem:[#allocation2 + $0x3c] sm:$0x1] }
  0x34   : > { %2485 = vmatpush3.bf16.msra.mxu0 %v2663_v60  ;;  %2528 = vmatprep.subr.bf16.mxu1 %v2672_v9  ;;  %v2665_v34 = vld [vmem:[#allocation2 + $0x18] ss:$8 sps:$4 sm:$0xff]   ;;  %v2248_v57 = vcombine.low %v442_v40, %v456_v51  ;;  %v255_v60 = vshll.u32 %v208_v49, 16  ;;  %v323_v4 = vsel %vm2855_vm4, %v249_v58, %v322_v45  ;;  %v258_v10 = vrot.slane %v254_v1, 4  ;;  %v2683_v15 = vld [vmem:[%s3169_s1 + $0x128] sm:$0xff]  }
  0x35   : > { %2486 = vmatprep.subr.bf16.mxu0 %v2667_v5  ;;  %1874 = vmatprep.mubr.bf16.mxu1 %v2665_v34  ;;  %v390_v48 = vld [vmem:[#allocation2 + $0x20] sm:$0xf]  ;;  %v326_v5 = vsel %vm2863_vm5, %v250_v59, %v325_v52  ;;  %324 = vst [vmem:[#allocation2 + $0x28] sm:$0xf] %v323_v4  ;;  %v210_v49 = vld [vmem:[%s2846_s27 + $0x1c] sm:$0xf] }
  0x36   : > { %1875 = vmatmul.mubr.bf16.gmra.mrb[4].mxu1 %v2260_v44  ;;  %v458_v53 = vshrl.u32 %v390_v48, 16  ;;  %v461_v54 = vshll.u32 %v390_v48, 16  ;;  %v541_v62 = vld [vmem:[#allocation2 + $0x20] sm:$0xe]  ;;  %1809 = vmatprep.mubr.bf16.mxu0 %v2248_v57  ;;  %327 = vst [vmem:[#allocation2 + $0x2c] sm:$0x1] %v326_v5  ;;  %v257_v7 = vor.u32 %v255_v60, %v254_v1 }
  0x37   : > { %2529 = vmatpush3.bf16.msra.mxu1 %v2674_v22  ;;  %1810 = vmatmul.mubr.bf16.gmra.mrb[4].mxu0 %v2666_v42  ;;  %v391_v9 = vld [vmem:[#allocation2 + $0x24] sm:$0x1]  ;;  %v2255_v11 = vrot.slane %v541_v62, 9  ;;  %v331_v22 = vld [vmem:[#allocation2 + $0x34] sm:$0x1]  ;;  %v263_v42 = vshll.u32 %v209_v21, 16 }
  0x38   : > { %2487 = vmatpush3.bf16.msra.mxu0 %v2669_v12  ;;  %2530 = vmatprep.subr.bf16.mxu1 %v2678_v30  ;;  %v460_v63 = vrot.slane %v458_v53, 4  ;;  %v463_v0 = vrot.slane %v461_v54, 5  ;;  %v467_v12 = vshll.u32 %v391_v9, 16  ;;  %v329_v13 = vsel %vm2855_vm4, %v257_v7, %v328_v61  ;;  %v542_v14 = vld [vmem:[#allocation2 + $0x24] sm:$0x1]  ;;  %v2687_v44 = vld [vmem:[%s3169_s1 + $0x170] sm:$0xff]  }
  0x39   : > { %2488 = vmatprep.subr.bf16.mxu0 %v2671_v18  ;;  %330 = vst [vmem:[#allocation2 + $0x30] sm:$0xf] %v329_v13  ;;  %v2684_v18 = vld [vmem:[%s3169_s1 + $0x1a8] sm:$0xff]   ;;  %v586_v20 = vrot.slane %v542_v14, 5  ;;  %v332_v25 = vsel %vm2863_vm5, %v258_v10, %v331_v22  ;;  %v268_v58 = vshrl.u32 %v210_v49, 16  ;;  %v2688_v59 = vld [vmem:[%s3169_s1 + $0x1f0] sm:$0xff]  }
  0x3a   : > { %v464_v6 = vor.u32 %v463_v0, %v460_v63  ;;  %v469_v19 = vrot.slane %v467_v12, 5  ;;  %333 = vst [vmem:[#allocation2 + $0x34] sm:$0x1] %v332_v25  ;;  %v271_v63 = vshll.u32 %v210_v49, 16  ;;  %v340_v0 = vld [vmem:[#allocation2 + $0x40] sm:$0xf] }
  0x3b   : > { %2531 = vmatpush3.bf16.msra.mxu1 %v2680_v50  ;;  %v587_v38 = vsel %vm2879_vm10, %v2255_v11, %v586_v20  ;;  %v3013_v4 = vrot.slane %v268_v58, 7  ;;  %v2690_v14 = vld [vmem:[%s3169_s1 + $0x1b0] sm:$0xff]   ;;  %v2692_v20 = vld [vmem:[%s3169_s1 + $0x1f8] sm:$0xff]  }
  0x3c   : > { %2489 = vmatpush3.bf16.msra.mxu0 %v2673_v29  ;;  %2532 = vmatprep.subr.bf16.mxu1 %v2682_v8  ;;  %v465_v17 = vrot.slane %v464_v6, 4  ;;  %v392_v23 = vld [vmem:[#allocation2 + $0x28] sm:$0xf]  ;;  %v260_v29 = vshrl.u32 %v209_v21, 16  ;;  %v2689_v6 = vld [vmem:[%s3169_s1 + $0x130] sm:$0xff]   ;;  %v2693_v25 = vld [vmem:[%s3169_s1 + $0x138] sm:$0xff]  }
  0x3d   : > { %2490 = vmatprep.subr.bf16.mxu0 %v2677_v46  ;;  %v393_v24 = vld [vmem:[#allocation2 + $0x2c] sm:$0x1]  ;;  %v472_v26 = vshrl.u32 %v392_v23, 16  ;;  %v475_v27 = vshll.u32 %v392_v23, 16  ;;  %v543_v30 = vld [vmem:[#allocation2 + $0x28] sm:$0xe]  ;;  %v273_v11 = vor.u32 %v271_v63, %v3013_v4 }
  0x3e   : > { %v481_v28 = vshll.u32 %v393_v24, 16  ;;  %v544_v31 = vld [vmem:[#allocation2 + $0x2c] sm:$0x1]  ;;  %v2256_v35 = vrot.slane %v543_v30, 9  ;;  %v262_v41 = vrot.slane %v260_v29, 7  ;;  %v470_v45 = vsel %vm2888_vm11, %v465_v17, %v469_v19 }
  0x3f   : > { %2533 = vmatpush3.bf16.msra.mxu1 %v2684_v18  ;;  %v474_v32 = vrot.slane %v472_v26, 4  ;;  %v477_v33 = vrot.slane %v475_v27, 5  ;;  %v590_v40 = vrot.slane %v544_v31, 5  ;;  %v2676_v55 = vld [vmem:[#allocation2 + $0x20] ss:$8 sps:$4 sm:$0xff]   ;;  %v341_v12 = vsel %vm2855_vm4, %v273_v11, %v340_v0  ;;  %v2691_v18 = vld [vmem:[%s3169_s1 + $0x178] sm:$0xff]  }
  0x40   : > { %2491 = vmatpush3.bf16.msra.mxu0 %v2679_v56  ;;  %v483_v34 = vrot.slane %v481_v28, 5  ;;  %v2675_v37 = vld [vmem:[#allocation2 + $0x28] ss:$8 sps:$4 sm:$0xff]   ;;  %v265_v51 = vor.u32 %v263_v42, %v262_v41  ;;  %v266_v52 = vrot.slane %v262_v41, 4  ;;  %2534 = vmatprep.subr.bf16.mxu1 %v2688_v59  ;;  %342 = vst [vmem:[#allocation2 + $0x40] sm:$0xf] %v341_v12 }
  0x41   : > { %2492 = vmatprep.subr.bf16.mxu0 %v2681_v2  ;;  %v478_v46 = vor.u32 %v477_v33, %v474_v32  ;;  %v394_v48 = vld [vmem:[#allocation2 + $0x30] sm:$0xf]  ;;  %1882 = vmatprep.mubr.bf16.mxu1 %v2675_v37  ;;  %v591_v50 = vsel %vm2879_vm10, %v2256_v35, %v590_v40  ;;  %v395_v62 = vld [vmem:[#allocation2 + $0x34] sm:$0x1]  ;;  %v274_v27 = vrot.slane %v3013_v4, 4 }
  0x42   : > { %v486_v53 = vshrl.u32 %v394_v48, 16  ;;  %v2261_v56 = vcombine.low %v587_v38, %v591_v50  ;;  %v489_v57 = vshll.u32 %v394_v48, 16  ;;  %v335_v60 = vsel %vm2855_vm4, %v265_v51, %v334_v36  ;;  %v545_v1 = vld [vmem:[#allocation2 + $0x30] sm:$0xe]  ;;  %v546_v5 = vld [vmem:[#allocation2 + $0x34] sm:$0x1] }
  0x43   : > { %v479_v54 = vrot.slane %v478_v46, 4  ;;  %v338_v61 = vsel %vm2863_vm5, %v266_v52, %v337_v47  ;;  %336 = vst [vmem:[#allocation2 + $0x38] sm:$0xf] %v335_v60  ;;  %v495_v10 = vshll.u32 %v395_v62, 16  ;;  %v2257_v13 = vrot.slane %v545_v1, 9  ;;  %2535 = vmatpush3.bf16.msra.mxu1 %v2690_v14  ;;  %v2694_v36 = vld [vmem:[%s3169_s1 + $0x1b8] sm:$0xff]  }
  0x44   : > { %2493 = vmatpush3.bf16.msra.mxu0 %v2683_v15  ;;  %1883 = vmatmul.mubr.bf16.gmra.mrb[8].mxu1 %v2261_v56  ;;  %339 = vst [vmem:[#allocation2 + $0x3c] sm:$0x1] %v338_v61  ;;  %v488_v8 = vrot.slane %v486_v53, 4  ;;  %v491_v9 = vrot.slane %v489_v57, 5  ;;  %v594_v17 = vrot.slane %v546_v5, 5 }
  0x45   : > { %2494 = vmatprep.subr.bf16.mxu0 %v2687_v44  ;;  %v484_v2 = vsel %vm2888_vm11, %v479_v54, %v483_v34  ;;  %v497_v19 = vrot.slane %v495_v10, 5  ;;  %2536 = vmatprep.subr.bf16.mxu1 %v2692_v20  ;;  %v804_v37 = vld [vmem:[#allocation2 + $0x8] sm:$0xe]  ;;  %v805_v41 = vld [vmem:[#allocation2 + $0xc] sm:$0x1] }
  0x46   : > { %v2249_v7 = vcombine.low %v470_v45, %v484_v2  ;;  %v492_v15 = vor.u32 %v491_v9, %v488_v8  ;;  %v595_v34 = vsel %vm2879_vm10, %v2257_v13, %v594_v17  ;;  %v806_v45 = vld [vmem:[#allocation2 + $0x10] sm:$0xe]  ;;  %v807_v46 = vld [vmem:[#allocation2 + $0x14] sm:$0x1]  ;;  %v2271_v47 = vrot.slane %v804_v37, 9 }
  0x47   : > { %2537 = vmatpush3.bf16.msra.mxu1 %v2694_v36  ;;  %v838_v48 = vrot.slane %v805_v41, 5  ;;  %v2272_v52 = vrot.slane %v806_v45, 9  ;;  %v842_v53 = vrot.slane %v807_v46, 5  ;;  %v925_v54 = vld [vmem:[#allocation2 + $0x10] sm:$0xf] }
  0x48   : > { %2495 = vmatpush3.bf16.msra.mxu0 %v2689_v6  ;;  %1817 = vmatprep.mubr.bf16.mxu0 %v2249_v7  ;;  %v493_v26 = vrot.slane %v492_v15, 4  ;;  %v926_v57 = vld [vmem:[#allocation2 + $0x14] sm:$0x1]  ;;  %v927_v58 = vld [vmem:[#allocation2 + $0x18] sm:$0xf]  ;;  %v942_v62 = vshrl.u32 %v925_v54, 16 }
  0x49   : > { %1818 = vmatmul.mubr.bf16.gmra.mrb[8].mxu0 %v2676_v55  ;;  %2496 = vmatprep.subr.bf16.mxu0 %v2691_v18  ;;  %v3046_v55 = vld [vmem:[%s3169_s1 + $0x200] sm:$0xff]   ;;  %v839_v56 = vsel %vm2879_vm10, %v2271_v47, %v838_v48  ;;  %v928_v59 = vld [vmem:[#allocation2 + $0x1c] sm:$0x1]  ;;  %v843_v61 = vsel %vm2879_vm10, %v2272_v52, %v842_v53  ;;  %v945_v63 = vshll.u32 %v925_v54, 16  ;;  %v656_v0 = vld [vmem:[#allocation2 + $0x8] sm:$0xf] }
  0x4a   : > { %v396_v39 = vld [vmem:[#allocation2 + $0x38] sm:$0xf]  ;;  %v498_v42 = vsel %vm2888_vm11, %v493_v26, %v497_v19  ;;  %v657_v1 = vld [vmem:[#allocation2 + $0xc] sm:$0x1]  ;;  %v2279_v5 = vcombine.low %v839_v56, %v843_v61  ;;  %v951_v6 = vshll.u32 %v926_v57, 16  ;;  %v956_v7 = vshrl.u32 %v927_v58, 16  ;;  %2598 = vmatprep.subr.bf16.mxu1 %v3046_v55 }
  0x4b   : > { %v397_v21 = vld [vmem:[#allocation2 + $0x3c] sm:$0x1]  ;;  %v500_v22 = vshrl.u32 %v396_v39, 16  ;;  %v503_v23 = vshll.u32 %v396_v39, 16  ;;  %v547_v28 = vld [vmem:[#allocation2 + $0x38] sm:$0xe] }
  0x4c   : > { %v509_v24 = vshll.u32 %v397_v21, 16  ;;  %v548_v29 = vld [vmem:[#allocation2 + $0x3c] sm:$0x1]  ;;  %v2258_v33 = vrot.slane %v547_v28, 9  ;;  %2497 = vmatpush3.bf16.msra.mxu0 %v2693_v25  ;;  %v2685_v40 = vld [vmem:[#allocation2 + $0x38] ss:$8 sps:$4 sm:$0xff]  }
  0x4d   : > { %v502_v30 = vrot.slane %v500_v22, 4  ;;  %v505_v31 = vrot.slane %v503_v23, 5  ;;  %v598_v35 = vrot.slane %v548_v29, 5  ;;  %1890 = vmatprep.mubr.bf16.mxu1 %v2685_v40  ;;  %v2686_v50 = vld [vmem:[#allocation2 + $0x30] ss:$8 sps:$4 sm:$0xff]   ;;  %2574 = vmatprep.subr.bf16.mxu0 %v3046_v55  ;;  %v944_v10 = vrot.slane %v942_v62, 4 }
  0x4e   : > { %v511_v32 = vrot.slane %v509_v24, 5  ;;  %v658_v8 = vld [vmem:[#allocation2 + $0x10] sm:$0xf]  ;;  %v659_v9 = vld [vmem:[#allocation2 + $0x14] sm:$0x1]  ;;  %v947_v11 = vrot.slane %v945_v63, 5 }
  0x4f   : > { %v506_v38 = vor.u32 %v505_v31, %v502_v30  ;;  %v599_v44 = vsel %vm2879_vm10, %v2258_v33, %v598_v35  ;;  %v959_v12 = vshll.u32 %v927_v58, 16  ;;  %v965_v13 = vshll.u32 %v928_v59, 16  ;;  %v2695_v37 = vld [vmem:[#allocation2 + $0x10] ss:$8 sps:$4 sm:$0xff]   ;;  %v809_v40 = vld [vmem:[#allocation2 + $0x1c] sm:$0x1] }
  0x50   : > { %v2262_v51 = vcombine.low %v595_v34, %v599_v44  ;;  %v953_v14 = vrot.slane %v951_v6, 5  ;;  %v958_v15 = vrot.slane %v956_v7, 4  ;;  %v673_v17 = vshrl.u32 %v656_v0, 16  ;;  %v810_v44 = vld [vmem:[#allocation2 + $0x20] sm:$0xe]  ;;  %v2697_v48 = vld [vmem:[%s3169_s1 + $0x208] sm:$0xff]  }
  0x51   : > { %v507_v49 = vrot.slane %v506_v38, 4  ;;  %v676_v18 = vshll.u32 %v656_v0, 16  ;;  %v948_v19 = vor.u32 %v947_v11, %v944_v10  ;;  %v961_v20 = vrot.slane %v959_v12, 5  ;;  %v808_v38 = vld [vmem:[#allocation2 + $0x18] sm:$0xe] }
  0x52   : > { %1891 = vmatmul.mubr.bf16.gmra.mrb[12].mxu1 %v2262_v51  ;;  %v967_v39 = vrot.slane %v965_v13, 5  ;;  %v682_v21 = vshll.u32 %v657_v1, 16  ;;  %v675_v22 = vrot.slane %v673_v17, 4  ;;  %v687_v24 = vshrl.u32 %v658_v8, 16  ;;  %v811_v45 = vld [vmem:[#allocation2 + $0x24] sm:$0x1] }
  0x53   : > { %v512_v60 = vsel %vm2888_vm11, %v507_v49, %v511_v32  ;;  %v678_v23 = vrot.slane %v676_v18, 5  ;;  %v690_v25 = vshll.u32 %v658_v8, 16  ;;  %v949_v26 = vrot.slane %v948_v19, 4  ;;  %v929_v52 = vld [vmem:[#allocation2 + $0x20] sm:$0xf] }
  0x54   : > { %v2250_v2 = vcombine.low %v498_v42, %v512_v60  ;;  %v962_v28 = vor.u32 %v961_v20, %v958_v15  ;;  %v684_v29 = vrot.slane %v682_v21, 5  ;;  %v696_v30 = vshll.u32 %v659_v9, 16  ;;  %v930_v57 = vld [vmem:[#allocation2 + $0x24] sm:$0x1]  ;;  %v931_v58 = vld [vmem:[#allocation2 + $0x28] sm:$0xf] }
  0x55   : > { %v679_v31 = vor.u32 %v678_v23, %v675_v22  ;;  %v689_v32 = vrot.slane %v687_v24, 4  ;;  %v692_v33 = vrot.slane %v690_v25, 5  ;;  %v954_v34 = vsel %vm2888_vm11, %v949_v26, %v953_v14  ;;  %v932_v62 = vld [vmem:[#allocation2 + $0x2c] sm:$0x1]  ;;  %v660_v1 = vld [vmem:[#allocation2 + $0x18] sm:$0xf] }
  0x56   : > { %1825 = vmatprep.mubr.bf16.mxu0 %v2250_v2  ;;  %v963_v35 = vrot.slane %v962_v28, 4  ;;  %v698_v36 = vrot.slane %v696_v30, 5  ;;  %v2273_v46 = vrot.slane %v808_v38, 9  ;;  %v846_v49 = vrot.slane %v809_v40, 5  ;;  %v661_v8 = vld [vmem:[#allocation2 + $0x1c] sm:$0x1] }
  0x57   : > { %1826 = vmatmul.mubr.bf16.gmra.mrb[12].mxu0 %v2686_v50  ;;  %v680_v41 = vrot.slane %v679_v31, 4  ;;  %v693_v42 = vor.u32 %v692_v33, %v689_v32  ;;  %v2274_v50 = vrot.slane %v810_v44, 9  ;;  %v850_v51 = vrot.slane %v811_v45, 5  ;;  %v662_v9 = vld [vmem:[#allocation2 + $0x20] sm:$0xf]  ;;  %v2699_v23 = vld [vmem:[%s3169_s1 + $0x210] sm:$0xff]  }
  0x58   : > { %1931 = vmatprep.mubr.bf16.mxu0 %v2279_v5  ;;  %v968_v47 = vsel %vm2888_vm11, %v963_v35, %v967_v39  ;;  %v970_v59 = vshrl.u32 %v929_v52, 16  ;;  %v847_v60 = vsel %vm2879_vm10, %v2273_v46, %v846_v49  ;;  %v973_v63 = vshll.u32 %v929_v52, 16  ;;  %v663_v14 = vld [vmem:[#allocation2 + $0x24] sm:$0x1]  ;;  %v2698_v38 = vld [vmem:[#allocation2 + $0x20] ss:$8 sps:$4 sm:$0xff]  }
  0x59   : > { %v2287_v53 = vcombine.low %v954_v34, %v968_v47  ;;  %v685_v54 = vsel %vm2888_vm11, %v680_v41, %v684_v29  ;;  %v694_v56 = vrot.slane %v693_v42, 4  ;;  %v851_v61 = vsel %vm2879_vm10, %v2274_v50, %v850_v51  ;;  %v812_v40 = vld [vmem:[#allocation2 + $0x28] sm:$0xe]  ;;  %v813_v45 = vld [vmem:[#allocation2 + $0x2c] sm:$0x1] }
  0x5a   : > { %v979_v0 = vshll.u32 %v930_v57, 16  ;;  %v2280_v5 = vcombine.low %v847_v60, %v851_v61  ;;  %v972_v6 = vrot.slane %v970_v59, 4  ;;  %v984_v7 = vshrl.u32 %v931_v58, 16  ;;  %v814_v46 = vld [vmem:[#allocation2 + $0x30] sm:$0xe] }
  0x5b   : > { %1996 = vmatprep.mubr.bf16.mxu1 %v2287_v53  ;;  %v699_v2 = vsel %vm2888_vm11, %v694_v56, %v698_v36  ;;  %v975_v11 = vrot.slane %v973_v63, 5  ;;  %v987_v13 = vshll.u32 %v931_v58, 16  ;;  %v993_v17 = vshll.u32 %v932_v62, 16  ;;  %v815_v49 = vld [vmem:[#allocation2 + $0x34] sm:$0x1]  ;;  %v3086_v53 = vld [vmem:[%s3169_s1 + $0x220] sm:$0xff]  }
  0x5c   : > { %v2267_v10 = vcombine.low %v685_v54, %v699_v2  ;;  %1997 = vmatmul.mubr.bf16.vlgmr.msra.gmra.mrb[16].mxu1 %v2695_v37  ;;  %v981_v12 = vrot.slane %v979_v0, 5  ;;  %v986_v15 = vrot.slane %v984_v7, 4  ;;  %v701_v18 = vshrl.u32 %v660_v1, 16  ;;  %v933_v58 = vld [vmem:[#allocation2 + $0x30] sm:$0xf] }
  0x5d   : > { %2606 = vmatpush3.bf16.msra.mxu1 %v3046_v55  ;;  %v704_v19 = vshll.u32 %v660_v1, 16  ;;  %v976_v20 = vor.u32 %v975_v11, %v972_v6  ;;  %v989_v39 = vrot.slane %v987_v13, 5  ;;  %v710_v21 = vshll.u32 %v661_v8, 16  ;;  %v934_v59 = vld [vmem:[#allocation2 + $0x34] sm:$0x1] }
  0x5e   : > { %2599 = vmatprep.subr.bf16.mxu1 %v2697_v48  ;;  %v715_v22 = vshrl.u32 %v662_v9, 16  ;;  %v995_v24 = vrot.slane %v993_v17, 5  ;;  %v703_v25 = vrot.slane %v701_v18, 4  ;;  %v718_v28 = vshll.u32 %v662_v9, 16  ;;  %v935_v61 = vld [vmem:[#allocation2 + $0x38] sm:$0xf] }
  0x5f   : > { %1932 = vmatmul.mubr.bf16.vlgmr.msra.gmra.mrb[16].mxu0 %v2267_v10  ;;  %v706_v26 = vrot.slane %v704_v19, 5  ;;  %v977_v29 = vrot.slane %v976_v20, 4  ;;  %v990_v30 = vor.u32 %v989_v39, %v986_v15  ;;  %v712_v31 = vrot.slane %v710_v21, 5  ;;  %v936_v62 = vld [vmem:[#allocation2 + $0x3c] sm:$0x1] }
  0x60   : > { %2575 = vmatpush3.bf16.msra.mxu0 %v3046_v55  ;;  %1939 = vmatprep.mubr.bf16.mxu0 %v2280_v5  ;;  %v717_v32 = vrot.slane %v715_v22, 4  ;;  %v720_v34 = vrot.slane %v718_v28, 5  ;;  %v724_v35 = vshll.u32 %v663_v14, 16  ;;  %v2700_v55 = vld [vmem:[%s3169_s1 + $0x218] sm:$0xff]   ;;  %v2275_v50 = vrot.slane %v812_v40, 9 }
  0x61   : > { %2576 = vmatprep.subr.bf16.mxu0 %v2697_v48  ;;  %2607 = vmatpush3.bf16.msra.mxu1 %v2697_v48  ;;  %v707_v33 = vor.u32 %v706_v26, %v703_v25  ;;  %v982_v36 = vsel %vm2888_vm11, %v977_v29, %v981_v12  ;;  %v991_v37 = vrot.slane %v990_v30, 4  ;;  %v854_v51 = vrot.slane %v813_v45, 5  ;;  %v664_v7 = vld [vmem:[#allocation2 + $0x28] sm:$0xf]  ;;  %v665_v8 = vld [vmem:[#allocation2 + $0x2c] sm:$0x1] }
  0x62   : > { %2600 = vmatprep.subr.bf16.mxu1 %v2699_v23  ;;  %v721_v42 = vor.u32 %v720_v34, %v717_v32  ;;  %v726_v44 = vrot.slane %v724_v35, 5  ;;  %v2276_v52 = vrot.slane %v814_v46, 9  ;;  %v858_v57 = vrot.slane %v815_v49, 5  ;;  %v666_v13 = vld [vmem:[#allocation2 + $0x30] sm:$0xf] }
  0x63   : > { %v708_v41 = vrot.slane %v707_v33, 4  ;;  %v996_v47 = vsel %vm2888_vm11, %v991_v37, %v995_v24  ;;  %v855_v60 = vsel %vm2879_vm10, %v2275_v50, %v854_v51  ;;  %v998_v63 = vshrl.u32 %v933_v58, 16  ;;  %v667_v14 = vld [vmem:[#allocation2 + $0x34] sm:$0x1]  ;;  %v343_v40 = vld [vmem:[#allocation2 + $0x44] sm:$0x1] }
  0x64   : > { %2577 = vmatpush3.bf16.msra.mxu0 %v2697_v48  ;;  %v2288_v54 = vcombine.low %v982_v36, %v996_v47  ;;  %v722_v56 = vrot.slane %v721_v42, 4  ;;  %v1001_v0 = vshll.u32 %v933_v58, 16  ;;  %v859_v2 = vsel %vm2879_vm10, %v2276_v52, %v858_v57  ;;  %v2705_v37 = vld [vmem:[%s3169_s1 + $0x230] sm:$0xff]   ;;  %v816_v46 = vld [vmem:[#allocation2 + $0x38] sm:$0xe] }
  0x65   : > { %2578 = vmatprep.subr.bf16.mxu0 %v2699_v23  ;;  %v713_v48 = vsel %vm2888_vm11, %v708_v41, %v712_v31  ;;  %2608 = vmatpush3.bf16.msra.mxu1 %v2699_v23  ;;  %v1007_v5 = vshll.u32 %v934_v59, 16  ;;  %v1012_v6 = vshrl.u32 %v935_v61, 16  ;;  %v2281_v10 = vcombine.low %v855_v60, %v859_v2  ;;  %v817_v47 = vld [vmem:[#allocation2 + $0x3c] sm:$0x1]  ;;  %v2701_v50 = vld [vmem:[#allocation2 + $0x30] ss:$8 sps:$4 sm:$0xff]  }
  0x66   : > { %2601 = vmatprep.subr.bf16.mxu1 %v2700_v55  ;;  %2004 = vmatprep.mubr.bf16.mxu1 %v2288_v54  ;;  %v727_v1 = vsel %vm2888_vm11, %v722_v56, %v726_v44  ;;  %v1000_v11 = vrot.slane %v998_v63, 4  ;;  %v1003_v12 = vrot.slane %v1001_v0, 5  ;;  %v1015_v18 = vshll.u32 %v935_v61, 16  ;;  %v818_v51 = vld [vmem:[#allocation2 + $0x40] sm:$0xe]  ;;  %v2706_v2 = vld [vmem:[%s3169_s1 + $0x238] sm:$0xff]  }
  0x67   : > { %v2268_v9 = vcombine.low %v713_v48, %v727_v1  ;;  %2005 = vmatmul.mubr.bf16.gmra.mrb[20].mxu1 %v2698_v38  ;;  %v1009_v15 = vrot.slane %v1007_v5, 5  ;;  %v1014_v17 = vrot.slane %v1012_v6, 4  ;;  %v1021_v19 = vshll.u32 %v936_v62, 16  ;;  %v939_v57 = vld [vmem:[#allocation2 + $0x48] sm:$0xf] }
  0x68   : > { %2579 = vmatpush3.bf16.msra.mxu0 %v2699_v23  ;;  %v1004_v20 = vor.u32 %v1003_v12, %v1000_v11  ;;  %v729_v39 = vshrl.u32 %v664_v7, 16  ;;  %v732_v21 = vshll.u32 %v664_v7, 16  ;;  %v738_v22 = vshll.u32 %v665_v8, 16  ;;  %v2703_v23 = vld [vmem:[%s3169_s1 + $0x228] sm:$0xff]   ;;  %v668_v60 = vld [vmem:[#allocation2 + $0x38] sm:$0xf] }
  0x69   : > { %2580 = vmatprep.subr.bf16.mxu0 %v2700_v55  ;;  %2609 = vmatpush3.bf16.msra.mxu1 %v2700_v55  ;;  %v1017_v24 = vrot.slane %v1015_v18, 5  ;;  %v1023_v25 = vrot.slane %v1021_v19, 5  ;;  %v743_v26 = vshrl.u32 %v666_v13, 16  ;;  %v746_v28 = vshll.u32 %v666_v13, 16  ;;  %v940_v58 = vld [vmem:[#allocation2 + $0x4c] sm:$0x1] }
  0x6a   : > { %1940 = vmatmul.mubr.bf16.gmra.mrb[20].mxu0 %v2268_v9  ;;  %2602 = vmatprep.subr.bf16.mxu1 %v3086_v53  ;;  %v1005_v29 = vrot.slane %v1004_v20, 4  ;;  %v731_v30 = vrot.slane %v729_v39, 4  ;;  %v734_v31 = vrot.slane %v732_v21, 5  ;;  %v740_v32 = vrot.slane %v738_v22, 5  ;;  %v669_v1 = vld [vmem:[#allocation2 + $0x3c] sm:$0x1] }
  0x6b   : > { %1947 = vmatprep.mubr.bf16.mxu0 %v2281_v10  ;;  %v1018_v33 = vor.u32 %v1017_v24, %v1014_v17  ;;  %v745_v34 = vrot.slane %v743_v26, 4  ;;  %v748_v35 = vrot.slane %v746_v28, 5  ;;  %v752_v36 = vshll.u32 %v667_v14, 16  ;;  %v670_v8 = vld [vmem:[#allocation2 + $0x40] sm:$0xf] }
  0x6c   : > { %2581 = vmatpush3.bf16.msra.mxu0 %v2700_v55  ;;  %v1010_v38 = vsel %vm2888_vm11, %v1005_v29, %v1009_v15  ;;  %v735_v55 = vor.u32 %v734_v31, %v731_v30  ;;  %v344_v45 = vsel %vm2863_vm5, %v274_v27, %v343_v40  ;;  %v2277_v52 = vrot.slane %v816_v46, 9  ;;  %v1074_v46 = vld [vmem:[#allocation2 + $0x14] sm:$0x1] }
  0x6d   : > { %2582 = vmatprep.subr.bf16.mxu0 %v3086_v53  ;;  %2610 = vmatpush3.bf16.msra.mxu1 %v3086_v53  ;;  %v1019_v41 = vrot.slane %v1018_v33, 4  ;;  %v749_v42 = vor.u32 %v748_v35, %v745_v34  ;;  %v754_v44 = vrot.slane %v752_v36, 5  ;;  %345 = vst [vmem:[#allocation2 + $0x44] sm:$0x1] %v344_v45  ;;  %v862_v56 = vrot.slane %v817_v47, 5 }
  0x6e   : > { %2603 = vmatprep.subr.bf16.mxu1 %v2703_v23  ;;  %v736_v49 = vrot.slane %v735_v55, 4  ;;  %v2278_v27 = vrot.slane %v818_v51, 9  ;;  %v1040_v63 = vshrl.u32 %v939_v57, 16  ;;  %v1043_v0 = vshll.u32 %v939_v57, 16  ;;  %v1075_v47 = vld [vmem:[#allocation2 + $0x18] sm:$0xe] }
  0x6f   : > { %v1024_v54 = vsel %vm2888_vm11, %v1019_v41, %v1023_v25  ;;  %v750_v48 = vrot.slane %v749_v42, 4  ;;  %v1049_v7 = vshll.u32 %v940_v58, 16  ;;  %v757_v9 = vshrl.u32 %v668_v60, 16  ;;  %v1073_v41 = vld [vmem:[#allocation2 + $0x10] sm:$0xe] }
  0x70   : > { %2583 = vmatpush3.bf16.msra.mxu0 %v3086_v53  ;;  %v937_v53 = vld [vmem:[#allocation2 + $0x40] sm:$0xf]  ;;  %v2289_v4 = vcombine.low %v1010_v38, %v1024_v54  ;;  %v741_v43 = vsel %vm2888_vm11, %v736_v49, %v740_v32  ;;  %v1042_v11 = vrot.slane %v1040_v63, 4  ;;  %v1045_v12 = vrot.slane %v1043_v0, 5  ;;  %v1076_v51 = vld [vmem:[#allocation2 + $0x1c] sm:$0x1] }
  0x71   : > { %2584 = vmatprep.subr.bf16.mxu0 %v2703_v23  ;;  %2611 = vmatpush3.bf16.msra.mxu1 %v2703_v23  ;;  %v1026_v59 = vshrl.u32 %v937_v53, 16  ;;  %v755_v61 = vsel %vm2888_vm11, %v750_v48, %v754_v44  ;;  %v1029_v62 = vshll.u32 %v937_v53, 16  ;;  %v760_v13 = vshll.u32 %v668_v60, 16  ;;  %v2704_v38 = vld [vmem:[#allocation2 + $0x40] ss:$8 sps:$4 sm:$0xff]  }
  0x72   : > { %2604 = vmatprep.subr.bf16.mxu1 %v2705_v37  ;;  %2012 = vmatprep.mubr.bf16.mxu1 %v2289_v4  ;;  %v2269_v5 = vcombine.low %v741_v43, %v755_v61  ;;  %v1051_v14 = vrot.slane %v1049_v7, 5  ;;  %v759_v15 = vrot.slane %v757_v9, 4  ;;  %v766_v17 = vshll.u32 %v669_v1, 16  ;;  %v1081_v48 = vld [vmem:[#allocation2 + $0x30] sm:$0xe] }
  0x73   : > { %v1028_v6 = vrot.slane %v1026_v59, 4  ;;  %2013 = vmatmul.mubr.bf16.gmra.mrb[24].mxu1 %v2701_v50  ;;  %v1031_v10 = vrot.slane %v1029_v62, 5  ;;  %v771_v18 = vshrl.u32 %v670_v8, 16  ;;  %v863_v20 = vsel %vm2879_vm10, %v2277_v52, %v862_v56  ;;  %v1082_v4 = vld [vmem:[#allocation2 + $0x34] sm:$0x1] }
  0x74   : > { %2585 = vmatpush3.bf16.msra.mxu0 %v2703_v23  ;;  %v819_v19 = vld [vmem:[#allocation2 + $0x44] sm:$0x1]  ;;  %v1046_v22 = vor.u32 %v1045_v12, %v1042_v11  ;;  %v762_v26 = vrot.slane %v760_v13, 5  ;;  %v768_v28 = vrot.slane %v766_v17, 5  ;;  %v774_v32 = vshll.u32 %v670_v8, 16 }
  0x75   : > { %2586 = vmatprep.subr.bf16.mxu0 %v2705_v37  ;;  %1948 = vmatmul.mubr.bf16.gmra.mrb[24].mxu0 %v2269_v5  ;;  %v938_v39 = vld [vmem:[#allocation2 + $0x44] sm:$0x1]  ;;  %v1032_v21 = vor.u32 %v1031_v10, %v1028_v6  ;;  %v866_v24 = vrot.slane %v819_v19, 5  ;;  %v773_v31 = vrot.slane %v771_v18, 4  ;;  %v2291_v52 = vrot.slane %v1073_v41, 9 }
  0x76   : > { %2612 = vmatpush3.bf16.msra.mxu1 %v2705_v37  ;;  %v671_v23 = vld [vmem:[#allocation2 + $0x44] sm:$0x1]  ;;  %v1035_v25 = vshll.u32 %v938_v39, 16  ;;  %v1047_v30 = vrot.slane %v1046_v22, 4  ;;  %v763_v35 = vor.u32 %v762_v26, %v759_v15  ;;  %v776_v40 = vrot.slane %v774_v32, 5 }
  0x77   : > { %2605 = vmatprep.subr.bf16.mxu1 %v2706_v2  ;;  %v1033_v29 = vrot.slane %v1032_v21, 4  ;;  %v867_v33 = vsel %vm2879_vm10, %v2278_v27, %v866_v24  ;;  %v780_v36 = vshll.u32 %v671_v23, 16  ;;  %v1107_v54 = vrot.slane %v1074_v46, 5  ;;  %v1083_v43 = vld [vmem:[#allocation2 + $0x38] sm:$0xe] }
  0x78   : > { %2587 = vmatpush3.bf16.msra.mxu0 %v2705_v37  ;;  %v1037_v34 = vrot.slane %v1035_v25, 5  ;;  %v2282_v55 = vcombine.low %v863_v20, %v867_v33  ;;  %v1052_v37 = vsel %vm2888_vm11, %v1047_v30, %v1051_v14  ;;  %v764_v44 = vrot.slane %v763_v35, 4  ;;  %v1084_v59 = vld [vmem:[#allocation2 + $0x3c] sm:$0x1]  ;;  %v1077_v1 = vld [vmem:[#allocation2 + $0x20] sm:$0xe] }
  0x79   : > { %2588 = vmatprep.subr.bf16.mxu0 %v2706_v2  ;;  %v782_v45 = vrot.slane %v780_v36, 5  ;;  %v777_v50 = vor.u32 %v776_v40, %v773_v31  ;;  %v2292_v53 = vrot.slane %v1075_v47, 9  ;;  %v1111_v57 = vrot.slane %v1076_v51, 5  ;;  %v1079_v8 = vld [vmem:[#allocation2 + $0x28] sm:$0xe] }
  0x7a   : > { %2613 = vmatpush3.bf16.msra.mxu1 %v2706_v2  ;;  %v1038_v42 = vsel %vm2888_vm11, %v1033_v29, %v1037_v34  ;;  %1955 = vmatprep.mubr.bf16.mxu0 %v2282_v55  ;;  %v769_v56 = vsel %vm2888_vm11, %v764_v44, %v768_v28  ;;  %v1108_v58 = vsel %vm2879_vm10, %v2291_v52, %v1107_v54  ;;  %v2295_v60 = vrot.slane %v1081_v48, 9  ;;  %v1080_v9 = vld [vmem:[#allocation2 + $0x2c] sm:$0x1]  ;;  %v1085_v15 = vld [vmem:[#allocation2 + $0x40] sm:$0xe] }
  0x7b   : > { %v2290_v49 = vcombine.low %v1038_v42, %v1052_v37  ;;  %v778_v27 = vrot.slane %v777_v50, 4  ;;  %v1123_v61 = vrot.slane %v1082_v4, 5  ;;  %v1112_v62 = vsel %vm2879_vm10, %v2292_v53, %v1111_v57  ;;  %v1086_v17 = vld [vmem:[#allocation2 + $0x44] sm:$0x1]  ;;  %v1087_v20 = vld [vmem:[#allocation2 + $0x48] sm:$0xe] }
  0x7c   : > { %2589 = vmatpush3.bf16.msra.mxu0 %v2706_v2  ;;  %v2296_v63 = vrot.slane %v1083_v43, 9  ;;  %v1127_v0 = vrot.slane %v1084_v59, 5  ;;  %v1078_v2 = vld [vmem:[#allocation2 + $0x24] sm:$0x1]  ;;  %v2299_v6 = vcombine.low %v1108_v58, %v1112_v62  ;;  %v2293_v10 = vrot.slane %v1077_v1, 9 }
  0x7d   : > { %2020 = vmatprep.mubr.bf16.mxu1 %v2290_v49  ;;  %v783_v5 = vsel %vm2888_vm11, %v778_v27, %v782_v45  ;;  %v1124_v7 = vsel %vm2879_vm10, %v2295_v60, %v1123_v61  ;;  %v1115_v13 = vrot.slane %v1078_v2, 5  ;;  %v2294_v14 = vrot.slane %v1079_v8, 9 }
  0x7e   : > { %2021 = vmatmul.mubr.bf16.gmra.mrb[28].mxu1 %v2704_v38  ;;  %v2270_v11 = vcombine.low %v769_v56, %v783_v5  ;;  %v1128_v12 = vsel %vm2879_vm10, %v2296_v63, %v1127_v0  ;;  %v1119_v19 = vrot.slane %v1080_v9, 5  ;;  %v2297_v39 = vrot.slane %v1085_v15, 9 }
  0x7f   : > { %v2301_v18 = vcombine.low %v1124_v7, %v1128_v12  ;;  %v1131_v21 = vrot.slane %v1086_v17, 5  ;;  %v2298_v22 = vrot.slane %v1087_v20, 9  ;;  %v1135_v23 = vrot.slane %v1088_v16, 5 }
  0x80   : > { %1956 = vmatmul.mubr.bf16.gmra.mrb[28].mxu0 %v2270_v11  ;;  %v1116_v24 = vsel %vm2879_vm10, %v2293_v10, %v1115_v13  ;;  %v1120_v25 = vsel %vm2879_vm10, %v2294_v14, %v1119_v19 }
  0x81   : > { %2590 = vmatprep.mubr.bf16.mxu0 %v2299_v6  ;;  %2594 = vmatprep.mubr.bf16.mxu1 %v2301_v18  ;;  %v1132_v26 = vsel %vm2879_vm10, %v2297_v39, %v1131_v21  ;;  %v1136_v28 = vsel %vm2879_vm10, %v2298_v22, %v1135_v23  ;;  %v2300_v30 = vcombine.low %v1116_v24, %v1120_v25 }
  0x82   : > { %v2302_v29 = vcombine.low %v1132_v26, %v1136_v28 }
  0x86   : > { %2595 = vmatmul.mubr.bf16.vlgmr.msra.gmra.mrb[32].mxu1 %v2302_v29 }
  0x88   : > { %2591 = vmatmul.mubr.bf16.vlgmr.msra.gmra.mrb[32].mxu0 %v2300_v30 }
  0xfd   : > { %v2458_v31 = vpop.f32.mrb[0].mxu1 }
  0xfe   : > { %v2459_v32 = vpop.f32.mrb[1].mxu1 }
  0xff   : > { %v2460_v33 = vadd.f32 %v2459_v32, %v2458_v31  ;;  %v2461_v34 = vpop.f32.mrb[2].mxu1 }
 0x100   : > { %v2462_v35 = vpop.f32.mrb[3].mxu1 }
 0x101   : > { %v2463_v38 = vadd.f32 %v2462_v35, %v2461_v34 }
 0x102   : > { %v2418_v36 = vpop.f32.mrb[0].mxu0 }
 0x103   : > { %v2419_v55 = vpop.f32.mrb[1].mxu0 }
 0x104   : > { %v2420_v37 = vadd.f32 %v2419_v55, %v2418_v36  ;;  %v2421_v40 = vpop.f32.mrb[2].mxu0 }
 0x105   : > { %v2422_v41 = vpop.f32.mrb[3].mxu0 }
 0x106   : > { %v1869_v42 = vadd.f32 %v2460_v33, %v2420_v37  ;;  %v2423_v44 = vadd.f32 %v2422_v41, %v2421_v40 }
 0x108   : > { %v1872_v45 = vadd.f32 %v2463_v38, %v2423_v44 }
 0x109   : > { %v2464_v3 = vpop.f32.mrb[4].mxu1 }
 0x10a   : > { %v2465_v46 = vpop.f32.mrb[5].mxu1  ;;  %v2424_v51 = vpop.f32.mrb[4].mxu0 }
 0x10b   : > { %v2466_v47 = vadd.f32 %v2465_v46, %v2464_v3  ;;  %v2467_v49 = vpop.f32.mrb[6].mxu1  ;;  %v2425_v54 = vpop.f32.mrb[5].mxu0 }
 0x10c   : > { %v2468_v50 = vpop.f32.mrb[7].mxu1  ;;  %v2426_v48 = vadd.f32 %v2425_v54, %v2424_v51  ;;  %v2427_v56 = vpop.f32.mrb[6].mxu0 }
 0x10d   : > { %v2469_v52 = vadd.f32 %v2468_v50, %v2467_v49  ;;  %v2428_v53 = vpop.f32.mrb[7].mxu0 }
 0x10e   : > { %v1877_v57 = vadd.f32 %v2466_v47, %v2426_v48  ;;  %v2429_v4 = vadd.f32 %v2428_v53, %v2427_v56 }
 0x110   : > { %v1880_v43 = vadd.f32 %v2469_v52, %v2429_v4 }
 0x117   : > { %v2470_v27 = vpop.f32.mrb[8].mxu1 }
 0x118   : > { %v2471_v58 = vpop.f32.mrb[9].mxu1 }
 0x119   : > { %v2472_v59 = vadd.f32 %v2471_v58, %v2470_v27  ;;  %v2473_v60 = vpop.f32.mrb[10].mxu1 }
 0x11a   : > { %v2474_v61 = vpop.f32.mrb[11].mxu1 }
 0x11b   : > { %v2475_v63 = vadd.f32 %v2474_v61, %v2473_v60 }
 0x11c   : > { %v2430_v62 = vpop.f32.mrb[8].mxu0 }
 0x11d   : > { %v2431_v0 = vpop.f32.mrb[9].mxu0 }
 0x11e   : > { %v2432_v1 = vadd.f32 %v2431_v0, %v2430_v62  ;;  %v2433_v2 = vpop.f32.mrb[10].mxu0 }
 0x11f   : > { %v2434_v5 = vpop.f32.mrb[11].mxu0 }
 0x120   : > { %v1885_v6 = vadd.f32 %v2472_v59, %v2432_v1  ;;  %v2435_v7 = vadd.f32 %v2434_v5, %v2433_v2 }
 0x122   : > { %v1888_v8 = vadd.f32 %v2475_v63, %v2435_v7 }
 0x125   : > { %v2476_v9 = vpop.f32.mrb[12].mxu1 }
 0x126   : > { %v2477_v10 = vpop.f32.mrb[13].mxu1 }
 0x127   : > { %v2478_v11 = vadd.f32 %v2477_v10, %v2476_v9  ;;  %v2479_v12 = vpop.f32.mrb[14].mxu1 }
 0x128   : > { %v2480_v13 = vpop.f32.mrb[15].mxu1 }
 0x129   : > { %v2481_v15 = vadd.f32 %v2480_v13, %v2479_v12 }
 0x12a   : > { %v2436_v14 = vpop.f32.mrb[12].mxu0 }
 0x12b   : > { %v2437_v17 = vpop.f32.mrb[13].mxu0 }
 0x12c   : > { %v2438_v18 = vadd.f32 %v2437_v17, %v2436_v14  ;;  %v2439_v19 = vpop.f32.mrb[14].mxu0 }
 0x12d   : > { %v2440_v20 = vpop.f32.mrb[15].mxu0 }
 0x12e   : > { %v1893_v16 = vadd.f32 %v2478_v11, %v2438_v18  ;;  %v2441_v39 = vadd.f32 %v2440_v20, %v2439_v19 }
 0x12f   : > { %v2538_v22 = vpop.f32.mrb[16].mxu1 }
 0x130   : > { %v3149_v21 = vadd.f32 %v2481_v15, %v2441_v39  ;;  %v2539_v23 = vpop.f32.mrb[17].mxu1 }
 0x131   : > { %v2540_v25 = vadd.f32 %v2539_v23, %v2538_v22  ;;  %v2541_v26 = vpop.f32.mrb[18].mxu1 }
 0x132   : > { %v2498_v24 = vpop.f32.mrb[16].mxu0  ;;  %v2542_v29 = vpop.f32.mrb[19].mxu1 }
 0x133   : > { %v2499_v28 = vpop.f32.mrb[17].mxu0  ;;  %v2543_v32 = vadd.f32 %v2542_v29, %v2541_v26 }
 0x134   : > { %v2500_v30 = vadd.f32 %v2499_v28, %v2498_v24  ;;  %v2501_v31 = vpop.f32.mrb[18].mxu0 }
 0x135   : > { %v2502_v33 = vpop.f32.mrb[19].mxu0 }
 0x136   : > { %v1934_v34 = vadd.f32 %v2500_v30, %v1869_v42  ;;  %v2503_v35 = vadd.f32 %v2502_v33, %v2501_v31 }
 0x138   : > { %v1937_v36 = vadd.f32 %v2503_v35, %v1872_v45  ;;  %v1999_v38 = vadd.f32 %v2540_v25, %v1934_v34 }
 0x13a   : > { %v3151_v55 = vadd.f32 %v2543_v32, %v1937_v36  ;;  %v2544_v37 = vpop.f32.mrb[20].mxu1 }
 0x13b   : > { %v2545_v40 = vpop.f32.mrb[21].mxu1 }
 0x13c   : > { %v2546_v44 = vadd.f32 %v2545_v40, %v2544_v37  ;;  %v2547_v3 = vpop.f32.mrb[22].mxu1 }
 0x13d   : > { %v2504_v41 = vpop.f32.mrb[20].mxu0  ;;  %v2548_v47 = vpop.f32.mrb[23].mxu1 }
 0x13e   : > { %v2505_v46 = vpop.f32.mrb[21].mxu0  ;;  %v2549_v51 = vadd.f32 %v2548_v47, %v2547_v3 }
 0x13f   : > { %v2506_v49 = vadd.f32 %v2505_v46, %v2504_v41  ;;  %v2507_v50 = vpop.f32.mrb[22].mxu0 }
 0x140   : > { %v2508_v52 = vpop.f32.mrb[23].mxu0 }
 0x141   : > { %v1942_v54 = vadd.f32 %v2506_v49, %v1877_v57  ;;  %v2509_v48 = vadd.f32 %v2508_v52, %v2507_v50 }
 0x143   : > { %v1945_v56 = vadd.f32 %v2509_v48, %v1880_v43  ;;  %v2007_v42 = vadd.f32 %v2546_v44, %v1942_v54 }
 0x145   : > { %v2010_v53 = vadd.f32 %v2549_v51, %v1945_v56 }
 0x146   : > { %v2550_v45 = vpop.f32.mrb[24].mxu1 }
 0x147   : > { %v2551_v27 = vpop.f32.mrb[25].mxu1 }
 0x148   : > { %v2510_v4 = vpop.f32.mrb[24].mxu0  ;;  %v2552_v59 = vadd.f32 %v2551_v27, %v2550_v45  ;;  %v2553_v60 = vpop.f32.mrb[26].mxu1 }
 0x149   : > { %v2511_v58 = vpop.f32.mrb[25].mxu0  ;;  %v2554_v63 = vpop.f32.mrb[27].mxu1 }
 0x14a   : > { %v2512_v61 = vadd.f32 %v2511_v58, %v2510_v4  ;;  %v2513_v62 = vpop.f32.mrb[26].mxu0  ;;  %v2555_v1 = vadd.f32 %v2554_v63, %v2553_v60 }
 0x14b   : > { %v2514_v0 = vpop.f32.mrb[27].mxu0 }
 0x14c   : > { %v1950_v2 = vadd.f32 %v2512_v61, %v1885_v6  ;;  %v2515_v5 = vadd.f32 %v2514_v0, %v2513_v62 }
 0x14e   : > { %v1953_v7 = vadd.f32 %v2515_v5, %v1888_v8  ;;  %v2015_v9 = vadd.f32 %v2552_v59, %v1950_v2 }
 0x150   : > { %v2018_v57 = vadd.f32 %v2555_v1, %v1953_v7 }
 0x151   : > { %v2556_v10 = vpop.f32.mrb[28].mxu1 }
 0x152   : > { %v2557_v43 = vpop.f32.mrb[29].mxu1 }
 0x153   : > { %v2558_v11 = vadd.f32 %v2557_v43, %v2556_v10  ;;  %v2559_v12 = vpop.f32.mrb[30].mxu1  ;;  %v2516_v14 = vpop.f32.mrb[28].mxu0 }
 0x154   : > { %v2560_v13 = vpop.f32.mrb[31].mxu1  ;;  %v2517_v17 = vpop.f32.mrb[29].mxu0 }
 0x155   : > { %v2561_v15 = vadd.f32 %v2560_v13, %v2559_v12  ;;  %v2518_v18 = vadd.f32 %v2517_v17, %v2516_v14  ;;  %v2519_v19 = vpop.f32.mrb[30].mxu0 }
 0x156   : > { %v2520_v20 = vpop.f32.mrb[31].mxu0 }
 0x157   : > { %v1958_v39 = vadd.f32 %v2518_v18, %v1893_v16  ;;  %v2521_v22 = vadd.f32 %v2520_v20, %v2519_v19 }
 0x159   : > { %v2596_v23 = vpop.f32.mrb[32].mxu1  ;;  %v1961_v6 = vadd.f32 %v2521_v22, %v3149_v21  ;;  %v2023_v8 = vadd.f32 %v2558_v11, %v1958_v39 }
 0x15a   : > { %v2079_v24 = vpop.f32.mrb[33].mxu1 }
 0x15b   : > { %v2080_v25 = vadd.f32 %v2079_v24, %v2015_v9  ;;  %v2597_v26 = vpop.f32.mrb[34].mxu1  ;;  %v2592_v28 = vpop.f32.mrb[32].mxu0  ;;  %v2088_v29 = vadd.f32 %v2596_v23, %v2023_v8  ;;  %v2026_v30 = vadd.f32 %v2561_v15, %v1961_v6 }
 0x15c   : > { %v2082_v31 = vpop.f32.mrb[35].mxu1  ;;  %v2072_v32 = vadd.f32 %v2592_v28, %v2007_v42  ;;  %v2063_v33 = vpop.f32.mrb[33].mxu0 }
 0x15d   : > { %v2083_v34 = vadd.f32 %v2082_v31, %v2018_v57  ;;  %v2064_v35 = vadd.f32 %v2063_v33, %v1999_v38  ;;  %v2593_v16 = vpop.f32.mrb[34].mxu0  ;;  %v2091_v36 = vadd.f32 %v2597_v26, %v2026_v30  ;;  %v2127_v42 = vmul.f32 %v2080_v25, %v2080_v25 }
 0x15e   : > { %v2075_v21 = vadd.f32 %v2593_v16, %v2010_v53  ;;  %v2066_v37 = vpop.f32.mrb[35].mxu0  ;;  %v2125_v50 = vmul.f32 %v2072_v32, %v2072_v32  ;;  %v2129_v58 = vmul.f32 %v2088_v29, %v2088_v29 }
 0x15f   : > { %v2392_v40 = vpack.c.bf16 %v2083_v34, %v2080_v25  ;;  %v2397_v41 = vpack.c.bf16 %v2091_v36, %v2088_v29  ;;  %v2067_v44 = vadd.f32 %v2066_v37, %v3151_v55  ;;  %v2123_v46 = vmul.f32 %v2064_v35, %v2064_v35 }
 0x160   : > { %v2387_v3 = vpack.c.bf16 %v2075_v21, %v2072_v32  ;;  %v2126_v54 = vmul.f32 %v2075_v21, %v2075_v21  ;;  %v2128_v55 = vmul.f32 %v2083_v34, %v2083_v34  ;;  %v2130_v61 = vmul.f32 %v2091_v36, %v2091_v36 }
 0x161   : > { %2400 = vst [vmem:[%s177_s19 + $0x10] sm:$0xff] %v2392_v40   ;;  %2401 = vst [vmem:[%s177_s19 + $0x18] sm:$0xff] %v2397_v41   ;;  %v2382_v47 = vpack.c.bf16 %v2067_v44, %v2064_v35  ;;  %v2110_v49 = vadd.f32 %v2067_v44, %v2064_v35  ;;  %v2124_v38 = vmul.f32 %v2067_v44, %v2067_v44 }
 0x162   : > { %2399 = vst [vmem:[%s177_s19 + $0x8] sm:$0xff] %v2387_v3  }
 0x163   : > { %2383 = vst [vmem:[%s177_s19] sm:$0xff] %v2382_v47   ;;  %v2111_v51 = vadd.f32 %v2110_v49, %v2072_v32  ;;  %v2131_v52 = vadd.f32 %v2124_v38, %v2123_v46 }
 0x165   : > { %v2132_v48 = vadd.f32 %v2131_v52, %v2125_v50  ;;  %v2112_v56 = vadd.f32 %v2111_v51, %v2075_v21 }
 0x167   : > { %v2113_v53 = vadd.f32 %v2112_v56, %v2080_v25  ;;  %v2133_v45 = vadd.f32 %v2132_v48, %v2126_v54 }
 0x169   : > { %v2114_v4 = vadd.f32 %v2113_v53, %v2083_v34  ;;  %v2134_v27 = vadd.f32 %v2133_v45, %v2127_v42 }
 0x16b   : > { %v2115_v59 = vadd.f32 %v2114_v4, %v2088_v29  ;;  %v2135_v60 = vadd.f32 %v2134_v27, %v2128_v55 }
 0x16d   : > { %v2116_v62 = vadd.f32 %v2115_v59, %v2091_v36  ;;  %v2136_v63 = vadd.f32 %v2135_v60, %v2129_v58 }
 0x16f   : > { %v2117_v0 = vrot.slane %v2116_v62, 4  ;;  %v2137_v1 = vadd.f32 %v2136_v63, %v2130_v61 }
 0x171   : > { %v2118_v2 = vadd.f32 %v2117_v0, %v2116_v62  ;;  %v2138_v5 = vrot.slane %v2137_v1, 4 }
 0x173   : > { %v2119_v7 = vrot.slane %v2118_v2, 2  ;;  %v2139_v9 = vadd.f32 %v2138_v5, %v2137_v1 }
 0x175   : > { %v2120_v57 = vadd.f32 %v2119_v7, %v2118_v2  ;;  %v2140_v10 = vrot.slane %v2139_v9, 2 }
 0x177   : > { %v2121_v43 = vrot.slane %v2120_v57, 1  ;;  %v2141_v11 = vadd.f32 %v2140_v10, %v2139_v9 }
 0x179   : > { %v2142_v12 = vrot.slane %v2141_v11, 1  ;;  %v2122_v13 = vadd.f32 %v2121_v43, %v2120_v57 }
 0x17b   : > { %v2143_v14 = vadd.f32 %v2142_v12, %v2141_v11 }
 0x17d   : > { %v2145_v15 = vsel %vm298_vm2, %v2122_v13, %v2143_v14 }
 0x17e   : > { %2146 = vst [vmem:[%s181_s22] sm:$0x3] %v2145_v15 }
 0x17f PF: > { %s14_s12 = sadd.s32 1, %s2713_s12  }
 0x180   : > { %p11_p4 = scmp.ge.s32.totalorder %s14_s12, 4  }
 0x182   :  { %13 = sbr.rel (!%p11_p4) target bundleno = 1 (0x1), region = 72 }

// kernel: resblock_forward.4
= control target key start
LH: loop header
LB: loop body
LE: loop exit
PB: predicated region body
PF: predicated region fallthrough
CT: control target
= control target key end

     0   :  { %s2915_s18 = smov 0   ;;  %s3409_s0 = inlined_call_operand.vmem [shape: bf16[2,8,8,128], index: 0, kind: input, shape index: {}]   ;;  %s3410_s1 = inlined_call_operand.vmem [shape: f32[1,128], index: 1, kind: input, shape index: {}]   ;;  %s3411_s2 = inlined_call_operand.vmem [shape: f32[1,128], index: 2, kind: input, shape index: {}]   ;;  %s3412_s3 = inlined_call_operand.vmem [shape: bf16[1152,128], index: 3, kind: input, shape index: {}]   ;;  %s3413_s4 = inlined_call_operand.vmem [shape: bf16[2,8,8,128], index: 4, kind: output, shape index: {0}]   ;;  %s3414_s5 = inlined_call_operand.vmem [shape: f32[2,2,128], index: 5, kind: output, shape index: {1}]  }
   0x1 LB: > { %s2365_s19 = sadd.s32 4294967295, %s2882_s18   ;;  %p2369_p0 = scmp.ge.s32.totalorder %s2882_s18, 1  ;;  %s2882_s18 = sphi %s2915_s18, %s16_s18  }
   0x2   : > { %p190_p1 = scmp.lt.s32.totalorder %s2882_s18, 3 }
   0x4   : > { %p191_p2 = pnand %p2369_p0, %p190_p1 }
   0x5   : > { %v2792_v0 = vld [vmem:[%s3412_s3 + $0xc0] sm:$0xff] (!%p191_p2)   ;;  %v2794_v2 = vld [vmem:[%s3412_s3 + $0xc8] sm:$0xff] (!%p191_p2)   ;;  %v2884_v3 = vmov (!%p191_p2), 0   ;;  %v2798_v7 = vld [vmem:[%s3412_s3 + $0xd0] sm:$0xff] (!%p191_p2)   ;;  %p222_p3 = scmp.lt.s32.totalorder (!%p191_p2), %s2365_s19, 1  ;;  %vm424_vm0 = vcmask (!%p191_p2), 1043456  }
   0x6   : > { %194 = sbr.rel (%p191_p2) target bundleno = 396 (0x18c), region = 36  ;;  %v2793_v1 = vld [vmem:[%s3412_s3 + $0x80] sm:$0xff] (!%p191_p2)   ;;  %2611 = vmatprep.subr.bf16.mxu1 (!%p191_p2), %v2792_v0  ;;  %239 = vst [vmem:[#allocation2 + $0x8] sm:$0xf] (!%p191_p2), %v2884_v3  ;;  %241 = vst [vmem:[#allocation2 + $0x10] sm:$0xf] (!%p191_p2), %v2884_v3 }
   0x7   : > { %237 = vst [vmem:[#allocation2] sm:$0xf] (!%p191_p2), %v2884_v3  ;;  %238 = vst [vmem:[#allocation2 + $0x4] sm:$0x1] (!%p191_p2), %v2884_v3  ;;  %2612 = vmatpush3.bf16.msra.mxu1 (!%p191_p2), %v2793_v1  ;;  %v2795_v4 = vld [vmem:[%s3412_s3 + $0x88] sm:$0xff] (!%p191_p2)   ;;  %v2796_v5 = vld [vmem:[%s3412_s3 + $0x40] sm:$0xff] (!%p191_p2)  }
   0x8   : > { %240 = vst [vmem:[#allocation2 + $0xc] sm:$0x1] (!%p191_p2), %v2884_v3  ;;  %242 = vst [vmem:[#allocation2 + $0x14] sm:$0x1] (!%p191_p2), %v2884_v3  ;;  %2613 = vmatprep.subr.bf16.mxu1 (!%p191_p2), %v2794_v2  ;;  %v2797_v6 = vld [vmem:[%s3412_s3] sm:$0xff] (!%p191_p2)   ;;  %2571 = vmatprep.subr.bf16.mxu0 (!%p191_p2), %v2796_v5  ;;  %v2799_v8 = vld [vmem:[%s3412_s3 + $0x90] sm:$0xff] (!%p191_p2)  }
   0x9   : > { %243 = vst [vmem:[#allocation2 + $0x18] sm:$0xf] (!%p191_p2), %v2884_v3  ;;  %244 = vst [vmem:[#allocation2 + $0x1c] sm:$0x1] (!%p191_p2), %v2884_v3  ;;  %2572 = vmatpush3.bf16.msra.mxu0 (!%p191_p2), %v2797_v6  ;;  %v2800_v9 = vld [vmem:[%s3412_s3 + $0x48] sm:$0xff] (!%p191_p2)   ;;  %v2802_v11 = vld [vmem:[%s3412_s3 + $0xd8] sm:$0xff] (!%p191_p2)  }
   0xa   : > { %245 = vst [vmem:[#allocation2 + $0x20] sm:$0xf] (!%p191_p2), %v2884_v3  ;;  %246 = vst [vmem:[#allocation2 + $0x24] sm:$0x1] (!%p191_p2), %v2884_v3  ;;  %v2801_v10 = vld [vmem:[%s3412_s3 + $0x8] sm:$0xff] (!%p191_p2)   ;;  %2573 = vmatprep.subr.bf16.mxu0 (!%p191_p2), %v2800_v9  ;;  %v2803_v12 = vld [vmem:[%s3412_s3 + $0x98] sm:$0xff] (!%p191_p2)  }
   0xb   : > { %247 = vst [vmem:[#allocation2 + $0x28] sm:$0xf] (!%p191_p2), %v2884_v3  ;;  %248 = vst [vmem:[#allocation2 + $0x2c] sm:$0x1] (!%p191_p2), %v2884_v3  ;;  %2614 = vmatpush3.bf16.msra.mxu1 (!%p191_p2), %v2795_v4  ;;  %v2804_v13 = vld [vmem:[%s3412_s3 + $0x50] sm:$0xff] (!%p191_p2)   ;;  %v2806_v15 = vld [vmem:[%s3412_s3 + $0xe0] sm:$0xff] (!%p191_p2)  }
   0xc   : > { %249 = vst [vmem:[#allocation2 + $0x30] sm:$0xf] (!%p191_p2), %v2884_v3  ;;  %250 = vst [vmem:[#allocation2 + $0x34] sm:$0x1] (!%p191_p2), %v2884_v3  ;;  %2615 = vmatprep.subr.bf16.mxu1 (!%p191_p2), %v2798_v7  ;;  %v2805_v14 = vld [vmem:[%s3412_s3 + $0x10] sm:$0xff] (!%p191_p2)   ;;  %v2807_v16 = vld [vmem:[%s3412_s3 + $0xa0] sm:$0xff] (!%p191_p2)  }
   0xd   : > { %251 = vst [vmem:[#allocation2 + $0x38] sm:$0xf] %v2884_v3  ;;  %252 = vst [vmem:[#allocation2 + $0x3c] sm:$0x1] %v2884_v3  ;;  %2574 = vmatpush3.bf16.msra.mxu0 %v2801_v10  ;;  %v2808_v17 = vld [vmem:[%s3412_s3 + $0x58] sm:$0xff]   ;;  %v2810_v19 = vld [vmem:[%s3412_s3 + $0xe8] sm:$0xff]  }
   0xe   : > { %253 = vst [vmem:[#allocation2 + $0x40] sm:$0xf] %v2884_v3  ;;  %254 = vst [vmem:[#allocation2 + $0x44] sm:$0x1] %v2884_v3  ;;  %2575 = vmatprep.subr.bf16.mxu0 %v2804_v13  ;;  %v2809_v18 = vld [vmem:[%s3412_s3 + $0x18] sm:$0xff]   ;;  %v2811_v20 = vld [vmem:[%s3412_s3 + $0xa8] sm:$0xff]  }
   0xf   : > { %255 = vst [vmem:[#allocation2 + $0x48] sm:$0xf] %v2884_v3  ;;  %256 = vst [vmem:[#allocation2 + $0x4c] sm:$0x1] %v2884_v3  ;;  %2616 = vmatpush3.bf16.msra.mxu1 %v2799_v8  ;;  %v2812_v21 = vld [vmem:[%s3412_s3 + $0x60] sm:$0xff]   ;;  %s3424_s19 = smov (!%p222_p3, %s2365_s19), 1 }
  0x10   : > { %2617 = vmatprep.subr.bf16.mxu1 %v2802_v11  ;;  %v2813_v22 = vld [vmem:[%s3412_s3 + $0x20] sm:$0xff]   ;;  %v2814_v23 = vld [vmem:[%s3412_s3 + $0xf0] sm:$0xff]   ;;  %v2816_v25 = vld [vmem:[%s3412_s3 + $0x68] sm:$0xff]   ;;  %s2519_s24 = sshll.u32 %s3424_s19, 5  ;;  %vm430_vm1 = vcmask 1040384   ;;  %vm697_vm6 = vcmask 1042432  }
  0x11   : > { %2576 = vmatpush3.bf16.msra.mxu0 %v2805_v14  ;;  %v2815_v24 = vld [vmem:[%s3412_s3 + $0xb0] sm:$0xff]   ;;  %v2817_v26 = vld [vmem:[%s3412_s3 + $0x28] sm:$0xff]   ;;  %v2818_v27 = vld [vmem:[%s3412_s3 + $0xf8] sm:$0xff]   ;;  %s3019_s8 = scalar_lea.vmem %s3409_s0, %s2519_s24  ;;  %vm425_vm2 = vsmask.f32 7938  ;;  %vm698_vm7 = vcmask 1046532  }
  0x12   : > { %2577 = vmatprep.subr.bf16.mxu0 %v2808_v17  ;;  %v2819_v28 = vld [vmem:[%s3412_s3 + $0xb8] sm:$0xff]   ;;  %v2820_v29 = vld [vmem:[%s3412_s3 + $0x70] sm:$0xff]   ;;  %v2530_v31 = vld [vmem:[%s3019_s8] sm:$0xff]   ;;  %vm431_vm3 = vsmask.f32 256 }
  0x13   : > { %2618 = vmatpush3.bf16.msra.mxu1 %v2803_v12  ;;  %v2821_v30 = vld [vmem:[%s3412_s3 + $0x30] sm:$0xff]   ;;  %v3031_v32 = vld [vmem:[%s3410_s1] ss:$0 sm:$0xff]  ;;  %v2531_v33 = vunpack.c.l.bf16 %v2530_v31  ;;  %v2532_v34 = vunpack.c.h.bf16 %v2530_v31  ;;  %v2825_v41 = vld [vmem:[%s3412_s3 + $0x78] sm:$0xff]   ;;  %vm530_vm8 = vsmask.f32 3328 }
  0x14   : > { %2619 = vmatprep.subr.bf16.mxu1 %v2806_v15  ;;  %v3036_v35 = vld [vmem:[%s3411_s2] ss:$0 sm:$0xff]  ;;  %v2826_v44 = vld [vmem:[%s3412_s3 + $0x38] sm:$0xff]   ;;  %v427_v52 = vld [vmem:[#allocation2 + $0x8] sm:$0xf] }
  0x15   : > { %2578 = vmatpush3.bf16.msra.mxu0 %v2809_v18  ;;  %v281_v36 = vmul.f32 %v2531_v33, %v3031_v32  ;;  %v282_v37 = vmul.f32 %v2532_v34, %v3031_v32  ;;  %v2823_v38 = vld [vmem:[%s3412_s3 + $0x1c0] sm:$0xff]   ;;  %v436_v53 = vld [vmem:[#allocation2 + $0x10] sm:$0xf]  ;;  %vm3055_vm4 = vmand %vm424_vm0, %vm425_vm2  ;;  %vm531_vm10 = vsmask.f32 7440 }
  0x16   : > { %2579 = vmatprep.subr.bf16.mxu0 %v2812_v21  ;;  %v514_v47 = vld [vmem:[#allocation2] sm:$0xf]  ;;  %v2565_v58 = vld [vmem:[%s3019_s8 + $0x8] sm:$0xff]   ;;  %vm3061_vm5 = vmand %vm430_vm1, %vm431_vm3 }
  0x17   : > { %2620 = vmatpush3.bf16.msra.mxu1 %v2807_v16  ;;  %v295_v39 = vadd.f32 %v3036_v35, %v281_v36  ;;  %v296_v40 = vadd.f32 %v3036_v35, %v282_v37  ;;  %v2829_v54 = vld [vmem:[%s3412_s3 + $0x140] sm:$0xff]   ;;  %v433_v60 = vld [vmem:[#allocation2 + $0xc] sm:$0x1]  ;;  %v534_v62 = vshrl.u32 %v514_v47, 16  ;;  %v2535_v63 = vunpack.c.l.bf16 %v2565_v58  ;;  %v439_v8 = vld [vmem:[#allocation2 + $0x14] sm:$0x1] }
  0x18   : > { %2621 = vmatprep.subr.bf16.mxu1 %v2810_v19  ;;  %v665_v61 = vld [vmem:[#allocation2] sm:$0xe]  ;;  %v515_v4 = vld [vmem:[#allocation2 + $0x4] sm:$0x1]  ;;  %v537_v5 = vshll.u32 %v514_v47, 16  ;;  %v2536_v6 = vunpack.c.h.bf16 %v2565_v58  ;;  %vm3078_vm9 = vmor %vm697_vm6, %vm698_vm7 }
  0x19   : > { %2580 = vmatpush3.bf16.msra.mxu0 %v2813_v22  ;;  %v303_v42 = vmax.f32 %v295_v39, 0.0  ;;  %v304_v43 = vmax.f32 %v296_v40, 0.0  ;;  %v283_v7 = vmul.f32 %v2535_v63, %v3031_v32  ;;  %v666_v12 = vld [vmem:[#allocation2 + $0x4] sm:$0x1]  ;;  %v2393_v14 = vrot.slane %v665_v61, 9  ;;  %vm3096_vm11 = vmor %vm530_vm8, %vm531_vm10 }
  0x1a   : > { %2581 = vmatprep.subr.bf16.mxu0 %v2816_v25  ;;  %v284_v15 = vmul.f32 %v2536_v6, %v3031_v32  ;;  %v536_v17 = vrot.slane %v534_v62, 4  ;;  %v543_v18 = vshll.u32 %v515_v4, 16  ;;  %v539_v19 = vrot.slane %v537_v5, 5  ;;  %v442_v47 = vld [vmem:[#allocation2 + $0x18] sm:$0xf]  ;;  %v2827_v62 = vld [vmem:[%s3412_s3 + $0x1c8] sm:$0xff]  }
  0x1b   : > { %2622 = vmatpush3.bf16.msra.mxu1 %v2811_v20  ;;  %v2521_v45 = vpack.c.bf16 %v303_v42, %v303_v42  ;;  %v2522_v46 = vpack.c.bf16 %v304_v43, %v304_v43  ;;  %v297_v16 = vadd.f32 %v3036_v35, %v283_v7  ;;  %v702_v22 = vrot.slane %v666_v12, 5 }
  0x1c   : > { %2623 = vmatprep.subr.bf16.mxu1 %v2814_v23  ;;  %v298_v20 = vadd.f32 %v3036_v35, %v284_v15 }
  0x1d   : > { %2582 = vmatpush3.bf16.msra.mxu0 %v2817_v26  ;;  %v344_v48 = vshrl.u32 %v2521_v45, 16  ;;  %v347_v49 = vshll.u32 %v2521_v45, 16  ;;  %v352_v50 = vshrl.u32 %v2522_v46, 16  ;;  %v355_v51 = vshll.u32 %v2522_v46, 16 }
  0x1e   : > { %2583 = vmatprep.subr.bf16.mxu0 %v2820_v29  ;;  %v305_v21 = vmax.f32 %v297_v16, 0.0  ;;  %v306_v23 = vmax.f32 %v298_v20, 0.0  ;;  %v3082_v26 = vrot.slane %v543_v18, 5  ;;  %v703_v39 = vsel %vm3078_vm9, %v2393_v14, %v702_v22  ;;  %v2833_v18 = vld [vmem:[%s3412_s3 + $0x1d0] sm:$0xff]   ;;  %v2832_v20 = vld [vmem:[%s3412_s3 + $0x100] sm:$0xff]  }
  0x1f   : > { %2624 = vmatpush3.bf16.msra.mxu1 %v2815_v24  ;;  %v346_v55 = vrot.slane %v344_v48, 7  ;;  %v354_v56 = vrot.slane %v352_v50, 7 }
  0x20   : > { %2625 = vmatprep.subr.bf16.mxu1 %v2818_v27  ;;  %v2523_v24 = vpack.c.bf16 %v305_v21, %v305_v21  ;;  %v2566_v27 = vld [vmem:[%s3019_s8 + $0x10] sm:$0xff]   ;;  %v2524_v34 = vpack.c.bf16 %v306_v23, %v306_v23 }
  0x21   : > { %2584 = vmatpush3.bf16.msra.mxu0 %v2821_v30  ;;  %v349_v0 = vor.u32 %v347_v49, %v346_v55  ;;  %v350_v1 = vrot.slane %v346_v55, 4  ;;  %v357_v2 = vor.u32 %v355_v51, %v354_v56  ;;  %v358_v3 = vrot.slane %v354_v56, 4 }
  0x22   : > { %2585 = vmatprep.subr.bf16.mxu0 %v2825_v41  ;;  %v360_v29 = vshrl.u32 %v2523_v24, 16  ;;  %v363_v30 = vshll.u32 %v2523_v24, 16  ;;  %v2539_v31 = vunpack.c.l.bf16 %v2566_v27  ;;  %v2540_v36 = vunpack.c.h.bf16 %v2566_v27 }
  0x23   : > { %2626 = vmatpush3.bf16.msra.mxu1 %v2819_v28  ;;  %v428_v9 = vsel %vm3055_vm4, %v349_v0, %v427_v52  ;;  %v437_v10 = vsel %vm3055_vm4, %v357_v2, %v436_v53  ;;  %v434_v11 = vsel %vm3061_vm5, %v350_v1, %v433_v60  ;;  %v440_v13 = vsel %vm3061_vm5, %v358_v3, %v439_v8  ;;  %v2824_v53 = vld [vmem:[%s3412_s3 + $0x180] sm:$0xff]   ;;  %v445_v60 = vld [vmem:[#allocation2 + $0x1c] sm:$0x1] }
  0x24   : > { %2691 = vmatprep.subr.bf16.mxu1 %v2823_v38  ;;  %429 = vst [vmem:[#allocation2 + $0x8] sm:$0xf] %v428_v9  ;;  %438 = vst [vmem:[#allocation2 + $0x10] sm:$0xf] %v437_v10  ;;  %v540_v28 = vor.u32 %v539_v19, %v536_v17  ;;  %v285_v41 = vmul.f32 %v2539_v31, %v3031_v32  ;;  %v362_v50 = vrot.slane %v360_v29, 7  ;;  %v368_v58 = vshrl.u32 %v2524_v34, 16 }
  0x25   : > { %2586 = vmatpush3.bf16.msra.mxu0 %v2826_v44  ;;  %435 = vst [vmem:[#allocation2 + $0xc] sm:$0x1] %v434_v11  ;;  %441 = vst [vmem:[#allocation2 + $0x14] sm:$0x1] %v440_v13  ;;  %v286_v51 = vmul.f32 %v2540_v36, %v3031_v32  ;;  %v448_v1 = vld [vmem:[#allocation2 + $0x20] sm:$0xf] }
  0x26   : > { %2651 = vmatprep.subr.bf16.mxu0 %v2829_v54  ;;  %v541_v48 = vrot.slane %v540_v28, 4  ;;  %v365_v63 = vor.u32 %v363_v30, %v362_v50  ;;  %v366_v0 = vrot.slane %v362_v50, 4  ;;  %v299_v3 = vadd.f32 %v3036_v35, %v285_v41  ;;  %v2828_v9 = vld [vmem:[%s3412_s3 + $0x188] sm:$0xff]   ;;  %v2834_v29 = vld [vmem:[%s3412_s3 + $0x190] sm:$0xff]  }
  0x27   : > { %v370_v6 = vrot.slane %v368_v58, 7  ;;  %v371_v7 = vshll.u32 %v2524_v34, 16  ;;  %v300_v24 = vadd.f32 %v3036_v35, %v286_v51  ;;  %v2835_v30 = vld [vmem:[%s3412_s3 + $0x148] sm:$0xff]   ;;  %v2839_v50 = vld [vmem:[%s3412_s3 + $0x150] sm:$0xff]  }
  0x28   : > { %v546_v10 = vsel %vm3096_vm11, %v541_v48, %v3082_v26  ;;  %v443_v11 = vsel %vm3055_vm4, %v365_v63, %v442_v47  ;;  %v446_v12 = vsel %vm3061_vm5, %v366_v0, %v445_v60  ;;  %v451_v26 = vld [vmem:[#allocation2 + $0x24] sm:$0x1]  ;;  %v2836_v41 = vld [vmem:[%s3412_s3 + $0x108] sm:$0xff]  }
  0x29   : > { %v373_v16 = vor.u32 %v371_v7, %v370_v6  ;;  %v374_v17 = vrot.slane %v370_v6, 4  ;;  %444 = vst [vmem:[#allocation2 + $0x18] sm:$0xf] %v443_v11  ;;  %447 = vst [vmem:[#allocation2 + $0x1c] sm:$0x1] %v446_v12  ;;  %v2843_v60 = vld [vmem:[%s3412_s3 + $0x1e0] sm:$0xff]  }
  0x2a   : > { %v457_v11 = vld [vmem:[#allocation2 + $0x2c] sm:$0x1] }
  0x2b   : > { %v2822_v33 = vld [vmem:[#allocation2 + $0x8] ss:$8 sps:$4 sm:$0xff]   ;;  %v449_v28 = vsel %vm3055_vm4, %v373_v16, %v448_v1  ;;  %v2844_v16 = vld [vmem:[%s3412_s3 + $0x1a0] sm:$0xff]  }
  0x2c   : > { %v667_v37 = vld [vmem:[#allocation2 + $0x8] sm:$0xe]  ;;  %v668_v38 = vld [vmem:[#allocation2 + $0xc] sm:$0x1]  ;;  %1998 = vmatprep.mubr.bf16.mxu1 %v2822_v33  ;;  %v518_v2 = vld [vmem:[#allocation2 + $0x10] sm:$0xf] }
  0x2d   : > { %v516_v40 = vld [vmem:[#allocation2 + $0x8] sm:$0xf]  ;;  %v2394_v42 = vrot.slane %v667_v37, 9  ;;  %v706_v43 = vrot.slane %v668_v38, 5  ;;  %v517_v44 = vld [vmem:[#allocation2 + $0xc] sm:$0x1]  ;;  %v452_v37 = vsel %vm3061_vm5, %v374_v17, %v451_v26 }
  0x2e   : > { %v548_v45 = vshrl.u32 %v516_v40, 16  ;;  %v551_v46 = vshll.u32 %v516_v40, 16  ;;  %v557_v49 = vshll.u32 %v517_v44, 16  ;;  %v669_v8 = vld [vmem:[#allocation2 + $0x10] sm:$0xe]  ;;  %v562_v13 = vshrl.u32 %v518_v2, 16 }
  0x2f   : > { %v707_v52 = vsel %vm3078_vm9, %v2394_v42, %v706_v43  ;;  %v2830_v15 = vld [vmem:[#allocation2] ss:$8 sps:$4 sm:$0xff]   ;;  %v565_v19 = vshll.u32 %v518_v2, 16  ;;  %v670_v21 = vld [vmem:[#allocation2 + $0x14] sm:$0x1]  ;;  %v2395_v22 = vrot.slane %v669_v8, 9 }
  0x30   : > { %v550_v55 = vrot.slane %v548_v45, 4  ;;  %v553_v56 = vrot.slane %v551_v46, 5  ;;  %v2401_v61 = vcombine.low %v703_v39, %v707_v52  ;;  %v559_v5 = vrot.slane %v557_v49, 5  ;;  %450 = vst [vmem:[#allocation2 + $0x20] sm:$0xf] %v449_v28  ;;  %v2837_v42 = vld [vmem:[%s3412_s3 + $0x1d8] sm:$0xff]  }
  0x31   : > { %v564_v23 = vrot.slane %v562_v13, 4  ;;  %v567_v31 = vrot.slane %v565_v19, 5  ;;  %v307_v33 = vmax.f32 %v299_v3, 0.0  ;;  %v519_v36 = vld [vmem:[#allocation2 + $0x14] sm:$0x1]  ;;  %v710_v38 = vrot.slane %v670_v21, 5 }
  0x32   : > { %v554_v4 = vor.u32 %v553_v56, %v550_v55  ;;  %1999 = vmatmul.mubr.bf16.vlgmr.msra.gmra.mrb[0].mxu1 %v2401_v61  ;;  %v308_v39 = vmax.f32 %v300_v24, 0.0  ;;  %453 = vst [vmem:[#allocation2 + $0x24] sm:$0x1] %v452_v37  ;;  %v2838_v43 = vld [vmem:[%s3412_s3 + $0x198] sm:$0xff]   ;;  %v571_v45 = vshll.u32 %v519_v36, 16 }
  0x33   : > { %2692 = vmatpush3.bf16.msra.mxu1 %v2824_v53  ;;  %v2525_v40 = vpack.c.bf16 %v307_v33, %v307_v33  ;;  %v568_v44 = vor.u32 %v567_v31, %v564_v23  ;;  %v671_v48 = vld [vmem:[#allocation2 + $0x18] sm:$0xe]  ;;  %v672_v49 = vld [vmem:[#allocation2 + $0x1c] sm:$0x1]  ;;  %v711_v51 = vsel %vm3078_vm9, %v2395_v22, %v710_v38  ;;  %v454_v1 = vld [vmem:[#allocation2 + $0x28] sm:$0xf] }
  0x34   : > { %v555_v14 = vrot.slane %v554_v4, 4  ;;  %2693 = vmatprep.subr.bf16.mxu1 %v2827_v62  ;;  %v2396_v52 = vrot.slane %v671_v48, 9  ;;  %v714_v53 = vrot.slane %v672_v49, 5  ;;  %v520_v55 = vld [vmem:[#allocation2 + $0x18] sm:$0xf]  ;;  %v2526_v58 = vpack.c.bf16 %v308_v39, %v308_v39  ;;  %v2848_v39 = vld [vmem:[%s3412_s3 + $0x1a8] sm:$0xff]  }
  0x35   : > { %v376_v46 = vshrl.u32 %v2525_v40, 16  ;;  %v379_v47 = vshll.u32 %v2525_v40, 16  ;;  %v521_v56 = vld [vmem:[#allocation2 + $0x1c] sm:$0x1]  ;;  %v576_v61 = vshrl.u32 %v520_v55, 16  ;;  %v579_v62 = vshll.u32 %v520_v55, 16 }
  0x36   : > { %v560_v27 = vsel %vm3096_vm11, %v555_v14, %v559_v5  ;;  %v585_v63 = vshll.u32 %v521_v56, 16  ;;  %v715_v3 = vsel %vm3078_vm9, %v2396_v52, %v714_v53  ;;  %v569_v4 = vrot.slane %v568_v44, 4  ;;  %v2845_v17 = vld [vmem:[%s3412_s3 + $0x158] sm:$0xff]   ;;  %v2849_v44 = vld [vmem:[%s3412_s3 + $0x160] sm:$0xff]   ;;  %v463_v56 = vld [vmem:[#allocation2 + $0x34] sm:$0x1] }
  0x37   : > { %v2389_v34 = vcombine.low %v546_v10, %v560_v27  ;;  %2694 = vmatpush3.bf16.msra.mxu1 %v2828_v9  ;;  %v378_v0 = vrot.slane %v376_v46, 7  ;;  %v2831_v2 = vld [vmem:[#allocation2 + $0x18] ss:$8 sps:$4 sm:$0xff]   ;;  %v573_v5 = vrot.slane %v571_v45, 5  ;;  %v2402_v6 = vcombine.low %v711_v51, %v715_v3  ;;  %v2842_v10 = vld [vmem:[%s3412_s3 + $0x110] sm:$0xff]  }
  0x38   : > { %2695 = vmatprep.subr.bf16.mxu1 %v2833_v18  ;;  %v578_v7 = vrot.slane %v576_v61, 4  ;;  %v581_v8 = vrot.slane %v579_v62, 5  ;;  %v587_v9 = vrot.slane %v585_v63, 5  ;;  %2006 = vmatprep.mubr.bf16.mxu1 %v2831_v2  ;;  %v384_v14 = vshrl.u32 %v2526_v58, 16  ;;  %v2847_v18 = vld [vmem:[%s3412_s3 + $0x1e8] sm:$0xff]   ;;  %v2567_v27 = vld [vmem:[%s3019_s8 + $0x18] sm:$0xff]   ;;  %s231_s8 = scalar_lea.vmem %s3413_s4, %s2519_s24 }
  0x39   : > { %1933 = vmatprep.mubr.bf16.mxu0 %v2389_v34  ;;  %v381_v12 = vor.u32 %v379_v47, %v378_v0  ;;  %v382_v13 = vrot.slane %v378_v0, 4  ;;  %v673_v21 = vld [vmem:[#allocation2 + $0x20] sm:$0xe]  ;;  %v574_v28 = vsel %vm3096_vm11, %v569_v4, %v573_v5  ;;  %v674_v31 = vld [vmem:[#allocation2 + $0x24] sm:$0x1]  ;;  %v2846_v33 = vld [vmem:[%s3412_s3 + $0x118] sm:$0xff]   ;;  %v2543_v40 = vunpack.c.l.bf16 %v2567_v27 }
  0x3a   : > { %1934 = vmatmul.mubr.bf16.vlgmr.msra.gmra.mrb[0].mxu0 %v2830_v15  ;;  %v387_v15 = vshll.u32 %v2526_v58, 16  ;;  %2007 = vmatmul.mubr.bf16.gmra.mrb[4].mxu1 %v2402_v6  ;;  %v582_v19 = vor.u32 %v581_v8, %v578_v7  ;;  %v386_v22 = vrot.slane %v384_v14, 7  ;;  %v522_v26 = vld [vmem:[#allocation2 + $0x20] sm:$0xf]  ;;  %v2544_v45 = vunpack.c.h.bf16 %v2567_v27  ;;  %v523_v49 = vld [vmem:[#allocation2 + $0x24] sm:$0x1] }
  0x3b   : > { %2652 = vmatpush3.bf16.msra.mxu0 %v2832_v20  ;;  %2696 = vmatpush3.bf16.msra.mxu1 %v2834_v29  ;;  %v460_v20 = vld [vmem:[#allocation2 + $0x30] sm:$0xf]  ;;  %v455_v23 = vsel %vm3055_vm4, %v381_v12, %v454_v1  ;;  %v458_v24 = vsel %vm3061_vm5, %v382_v13, %v457_v11  ;;  %v590_v34 = vshrl.u32 %v522_v26, 16  ;;  %v593_v36 = vshll.u32 %v522_v26, 16  ;;  %v2852_v55 = vld [vmem:[%s3412_s3 + $0x120] sm:$0xff]   ;;  %v2855_v14 = vld [vmem:[%s3412_s3 + $0x168] sm:$0xff]  }
  0x3c   : > { %2653 = vmatprep.subr.bf16.mxu0 %v2835_v30  ;;  %2697 = vmatprep.subr.bf16.mxu1 %v2837_v42  ;;  %v583_v29 = vrot.slane %v582_v19, 4  ;;  %v2840_v30 = vld [vmem:[#allocation2 + $0x10] ss:$8 sps:$4 sm:$0xff]   ;;  %456 = vst [vmem:[#allocation2 + $0x28] sm:$0xf] %v455_v23  ;;  %v389_v37 = vor.u32 %v387_v15, %v386_v22  ;;  %v390_v38 = vrot.slane %v386_v22, 4  ;;  %v288_v53 = vmul.f32 %v2544_v45, %v3031_v32 }
  0x3d   : > { %459 = vst [vmem:[#allocation2 + $0x2c] sm:$0x1] %v458_v24  ;;  %v592_v42 = vrot.slane %v590_v34, 4  ;;  %v2397_v48 = vrot.slane %v673_v21, 9  ;;  %v2853_v51 = vld [vmem:[%s3412_s3 + $0x1f0] sm:$0xff]   ;;  %v718_v52 = vrot.slane %v674_v31, 5 }
  0x3e   : > { %v461_v47 = vsel %vm3055_vm4, %v389_v37, %v460_v20  ;;  %v599_v62 = vshll.u32 %v523_v49, 16  ;;  %v302_v63 = vadd.f32 %v3036_v35, %v288_v53  ;;  %v2856_v21 = vld [vmem:[%s3412_s3 + $0x128] sm:$0xff]   ;;  %v466_v31 = vld [vmem:[#allocation2 + $0x38] sm:$0xf]  ;;  %v2861_v49 = vld [vmem:[%s3412_s3 + $0x130] sm:$0xff]   ;;  %s2374_s24 = sshll.u32 %s3424_s19, 1 }
  0x3f   : > { %2654 = vmatpush3.bf16.msra.mxu0 %v2836_v41  ;;  %2698 = vmatpush3.bf16.msra.mxu1 %v2838_v43  ;;  %v588_v41 = vsel %vm3096_vm11, %v583_v29, %v587_v9  ;;  %v595_v43 = vrot.slane %v593_v36, 5  ;;  %462 = vst [vmem:[#allocation2 + $0x30] sm:$0xf] %v461_v47  ;;  %v719_v2 = vsel %vm3078_vm9, %v2397_v48, %v718_v52  ;;  %v2858_v36 = vld [vmem:[%s3412_s3 + $0x1b8] sm:$0xff]   ;;  %s235_s21 = scalar_lea.vmem %s3414_s5, %s2374_s24 }
  0x40   : > { %2655 = vmatprep.subr.bf16.mxu0 %v2839_v50  ;;  %2699 = vmatprep.subr.bf16.mxu1 %v2843_v60  ;;  %v2390_v46 = vcombine.low %v574_v28, %v588_v41  ;;  %v287_v50 = vmul.f32 %v2543_v40, %v3031_v32  ;;  %v464_v60 = vsel %vm3061_vm5, %v390_v38, %v463_v56  ;;  %v2854_v32 = vld [vmem:[%s3412_s3 + $0x1b0] sm:$0xff]   ;;  %v601_v12 = vrot.slane %v599_v62, 5  ;;  %v2857_v28 = vld [vmem:[%s3412_s3 + $0x1f8] sm:$0xff]   ;;  %v472_v41 = vld [vmem:[#allocation2 + $0x40] sm:$0xf] }
  0x41   : > { %v596_v61 = vor.u32 %v595_v43, %v592_v42  ;;  %465 = vst [vmem:[#allocation2 + $0x34] sm:$0x1] %v464_v60  ;;  %v310_v13 = vmax.f32 %v302_v63, 0.0  ;;  %v2859_v43 = vld [vmem:[%s3412_s3 + $0x170] sm:$0xff]  }
  0x42   : > { %1941 = vmatprep.mubr.bf16.mxu0 %v2390_v46  ;;  %v301_v58 = vadd.f32 %v3036_v35, %v287_v50  ;;  %v1057_v63 = vld [vmem:[#allocation2 + $0x10] sm:$0xf] }
  0x43   : > { %2656 = vmatpush3.bf16.msra.mxu0 %v2842_v10  ;;  %2700 = vmatpush3.bf16.msra.mxu1 %v2844_v16  ;;  %v675_v0 = vld [vmem:[#allocation2 + $0x28] sm:$0xe]  ;;  %v597_v11 = vrot.slane %v596_v61, 4  ;;  %v2528_v20 = vpack.c.bf16 %v310_v13, %v310_v13 }
  0x44   : > { %2657 = vmatprep.subr.bf16.mxu0 %v2845_v17  ;;  %2701 = vmatprep.subr.bf16.mxu1 %v2847_v18  ;;  %v676_v1 = vld [vmem:[#allocation2 + $0x2c] sm:$0x1]  ;;  %v2398_v3 = vrot.slane %v675_v0, 9  ;;  %v524_v5 = vld [vmem:[#allocation2 + $0x28] sm:$0xf]  ;;  %v309_v35 = vmax.f32 %v301_v58, 0.0 }
  0x45   : > { %1942 = vmatmul.mubr.bf16.gmra.mrb[4].mxu0 %v2840_v30  ;;  %v722_v4 = vrot.slane %v676_v1, 5  ;;  %v525_v6 = vld [vmem:[#allocation2 + $0x2c] sm:$0x1]  ;;  %v604_v7 = vshrl.u32 %v524_v5, 16  ;;  %v607_v8 = vshll.u32 %v524_v5, 16  ;;  %v400_v29 = vshrl.u32 %v2528_v20, 16 }
  0x46   : > { %v613_v9 = vshll.u32 %v525_v6, 16  ;;  %v2841_v15 = vld [vmem:[#allocation2 + $0x28] ss:$8 sps:$4 sm:$0xff]   ;;  %v2527_v19 = vpack.c.bf16 %v309_v35, %v309_v35  ;;  %v403_v30 = vshll.u32 %v2528_v20, 16  ;;  %v602_v37 = vsel %vm3096_vm11, %v597_v11, %v601_v12 }
  0x47   : > { %2658 = vmatpush3.bf16.msra.mxu0 %v2846_v33  ;;  %2702 = vmatpush3.bf16.msra.mxu1 %v2848_v39  ;;  %v723_v10 = vsel %vm3078_vm9, %v2398_v3, %v722_v4  ;;  %v606_v17 = vrot.slane %v604_v7, 4  ;;  %v609_v18 = vrot.slane %v607_v8, 5  ;;  %v3209_v27 = vld [vmem:[#allocation2 + $0x30] sm:$0xe]  ;;  %v469_v33 = vld [vmem:[#allocation2 + $0x3c] sm:$0x1] }
  0x48   : > { %2659 = vmatprep.subr.bf16.mxu0 %v2849_v44  ;;  %2703 = vmatprep.subr.bf16.mxu1 %v2853_v51  ;;  %v2403_v16 = vcombine.low %v719_v2, %v723_v10  ;;  %v615_v23 = vrot.slane %v613_v9, 5  ;;  %v392_v24 = vshrl.u32 %v2527_v19, 16  ;;  %v395_v26 = vshll.u32 %v2527_v19, 16  ;;  %v3214_v34 = vld [vmem:[#allocation2 + $0x34] sm:$0x1] }
  0x49   : > { %2014 = vmatprep.mubr.bf16.mxu1 %v2841_v15  ;;  %v610_v22 = vor.u32 %v609_v18, %v606_v17  ;;  %v2850_v39 = vld [vmem:[#allocation2 + $0x20] ss:$8 sps:$4 sm:$0xff]   ;;  %v3221_v42 = vrot.slane %v400_v29, 7  ;;  %v526_v47 = vld [vmem:[#allocation2 + $0x30] sm:$0xf]  ;;  %v2399_v52 = vrot.slane %v3209_v27, 9 }
  0x4a   : > { %2015 = vmatmul.mubr.bf16.gmra.mrb[8].mxu1 %v2403_v16  ;;  %v394_v40 = vrot.slane %v392_v24, 7  ;;  %v527_v48 = vld [vmem:[#allocation2 + $0x34] sm:$0x1]  ;;  %v618_v53 = vshrl.u32 %v526_v47, 16  ;;  %v726_v58 = vrot.slane %v3214_v34, 5  ;;  %v621_v60 = vshll.u32 %v526_v47, 16 }
  0x4b   : > { %2660 = vmatpush3.bf16.msra.mxu0 %v2852_v55  ;;  %2704 = vmatpush3.bf16.msra.mxu1 %v2854_v32  ;;  %v611_v38 = vrot.slane %v610_v22, 4  ;;  %v405_v51 = vor.u32 %v403_v30, %v3221_v42  ;;  %v627_v62 = vshll.u32 %v527_v48, 16  ;;  %v3243_v32 = vld [vmem:[%s3412_s3 + $0x200] sm:$0xff]   ;;  %v1058_v2 = vld [vmem:[#allocation2 + $0x14] sm:$0x1]  ;;  %v1074_v5 = vshrl.u32 %v1057_v63, 16 }
  0x4c   : > { %2661 = vmatprep.subr.bf16.mxu0 %v2855_v14  ;;  %2705 = vmatprep.subr.bf16.mxu1 %v2857_v28  ;;  %v397_v45 = vor.u32 %v395_v26, %v394_v40  ;;  %v398_v46 = vrot.slane %v394_v40, 4  ;;  %v620_v0 = vrot.slane %v618_v53, 4  ;;  %v623_v1 = vrot.slane %v621_v60, 5  ;;  %v1059_v3 = vld [vmem:[#allocation2 + $0x18] sm:$0xf] }
  0x4d   : > { %v616_v44 = vsel %vm3096_vm11, %v611_v38, %v615_v23  ;;  %v473_v61 = vsel %vm3055_vm4, %v405_v51, %v472_v41  ;;  %v1060_v4 = vld [vmem:[#allocation2 + $0x1c] sm:$0x1]  ;;  %v1077_v6 = vshll.u32 %v1057_v63, 16  ;;  %v1083_v7 = vshll.u32 %v1058_v2, 16  ;;  %v937_v47 = vld [vmem:[#allocation2 + $0xc] sm:$0x1] }
  0x4e   : > { %v2391_v50 = vcombine.low %v602_v37, %v616_v44  ;;  %v467_v55 = vsel %vm3055_vm4, %v397_v45, %v466_v31  ;;  %v470_v56 = vsel %vm3061_vm5, %v398_v46, %v469_v33  ;;  %474 = vst [vmem:[#allocation2 + $0x40] sm:$0xf] %v473_v61  ;;  %v1088_v57 = vshrl.u32 %v1059_v3, 16  ;;  %v2864_v16 = vld [vmem:[%s3412_s3 + $0x178] sm:$0xff]   ;;  %v936_v46 = vld [vmem:[#allocation2 + $0x8] sm:$0xe] }
  0x4f   : > { %2662 = vmatpush3.bf16.msra.mxu0 %v2856_v21  ;;  %2706 = vmatpush3.bf16.msra.mxu1 %v2858_v36  ;;  %468 = vst [vmem:[#allocation2 + $0x38] sm:$0xf] %v467_v55  ;;  %471 = vst [vmem:[#allocation2 + $0x3c] sm:$0x1] %v470_v56  ;;  %v1091_v8 = vshll.u32 %v1059_v3, 16  ;;  %v1097_v9 = vshll.u32 %v1060_v4, 16  ;;  %v727_v22 = vsel %vm3078_vm9, %v2399_v52, %v726_v58 }
  0x50   : > { %2663 = vmatprep.subr.bf16.mxu0 %v2859_v43  ;;  %1949 = vmatprep.mubr.bf16.mxu0 %v2391_v50  ;;  %v3246_v35 = vrot.slane %v627_v62, 5  ;;  %v1076_v10 = vrot.slane %v1074_v5, 4  ;;  %v1079_v11 = vrot.slane %v1077_v6, 5  ;;  %v1090_v12 = vrot.slane %v1088_v57, 4  ;;  %v2865_v34 = vld [vmem:[%s3412_s3 + $0x138] sm:$0xff]  }
  0x51   : > { %1950 = vmatmul.mubr.bf16.gmra.mrb[8].mxu0 %v2850_v39  ;;  %2767 = vmatprep.subr.bf16.mxu1 %v3243_v32  ;;  %v1085_v13 = vrot.slane %v1083_v7, 5  ;;  %v1093_v14 = vrot.slane %v1091_v8, 5  ;;  %v1099_v15 = vrot.slane %v1097_v9, 5  ;;  %v624_v26 = vor.u32 %v623_v1, %v620_v0  ;;  %v938_v50 = vld [vmem:[#allocation2 + $0x10] sm:$0xe] }
  0x52   : > { %v1080_v19 = vor.u32 %v1079_v11, %v1076_v10  ;;  %v939_v51 = vld [vmem:[#allocation2 + $0x14] sm:$0x1]  ;;  %v2413_v52 = vrot.slane %v936_v46, 9  ;;  %v970_v53 = vrot.slane %v937_v47, 5  ;;  %v2862_v55 = vld [vmem:[#allocation2 + $0x10] ss:$8 sps:$4 sm:$0xff]  }
  0x53   : > { %2664 = vmatpush3.bf16.msra.mxu0 %v2861_v49  ;;  %v1094_v20 = vor.u32 %v1093_v14, %v1090_v12  ;;  %v625_v39 = vrot.slane %v624_v26, 4  ;;  %v2414_v56 = vrot.slane %v938_v50, 9  ;;  %v974_v58 = vrot.slane %v939_v51, 5  ;;  %v788_v60 = vld [vmem:[#allocation2 + $0x8] sm:$0xf] }
  0x54   : > { %2665 = vmatprep.subr.bf16.mxu0 %v2864_v16  ;;  %v1081_v37 = vrot.slane %v1080_v19, 4  ;;  %v789_v61 = vld [vmem:[#allocation2 + $0xc] sm:$0x1]  ;;  %v971_v1 = vsel %vm3078_vm9, %v2413_v52, %v970_v53  ;;  %v790_v2 = vld [vmem:[#allocation2 + $0x10] sm:$0xf]  ;;  %v805_v4 = vshrl.u32 %v788_v60, 16 }
  0x55   : > { %v1095_v38 = vrot.slane %v1094_v20, 4  ;;  %v630_v62 = vsel %vm3096_vm11, %v625_v39, %v3246_v35  ;;  %v791_v3 = vld [vmem:[#allocation2 + $0x14] sm:$0x1]  ;;  %v975_v5 = vsel %vm3078_vm9, %v2414_v56, %v974_v58  ;;  %v808_v6 = vshll.u32 %v788_v60, 16  ;;  %v1061_v8 = vld [vmem:[#allocation2 + $0x20] sm:$0xf] }
  0x56   : > { %v679_v17 = vld [vmem:[#allocation2 + $0x38] sm:$0xe]  ;;  %v680_v18 = vld [vmem:[#allocation2 + $0x3c] sm:$0x1]  ;;  %v1086_v44 = vsel %vm3096_vm11, %v1081_v37, %v1085_v13  ;;  %v814_v7 = vshll.u32 %v789_v61, 16  ;;  %v819_v57 = vshrl.u32 %v790_v2, 16  ;;  %v2421_v35 = vcombine.low %v971_v1, %v975_v5 }
  0x57   : > { %v2851_v21 = vld [vmem:[#allocation2 + $0x38] ss:$8 sps:$4 sm:$0xff]   ;;  %v2400_v23 = vrot.slane %v679_v17, 9  ;;  %v730_v24 = vrot.slane %v680_v18, 5  ;;  %v529_v28 = vld [vmem:[#allocation2 + $0x3c] sm:$0x1]  ;;  %2666 = vmatpush3.bf16.msra.mxu0 %v2865_v34  ;;  %v1100_v45 = vsel %vm3096_vm11, %v1095_v38, %v1099_v15 }
  0x58   : > { %v528_v27 = vld [vmem:[#allocation2 + $0x38] sm:$0xf]  ;;  %2022 = vmatprep.mubr.bf16.mxu1 %v2851_v21  ;;  %v641_v33 = vshll.u32 %v529_v28, 16  ;;  %2743 = vmatprep.subr.bf16.mxu0 %v3243_v32  ;;  %v2429_v49 = vcombine.low %v1086_v44, %v1100_v45  ;;  %v807_v10 = vrot.slane %v805_v4, 4  ;;  %v822_v11 = vshll.u32 %v790_v2, 16  ;;  %v3275_v15 = vld [vmem:[%s3412_s3 + $0x208] sm:$0xff]  }
  0x59   : > { %v731_v29 = vsel %vm3078_vm9, %v2400_v23, %v730_v24  ;;  %v632_v30 = vshrl.u32 %v528_v27, 16  ;;  %v635_v31 = vshll.u32 %v528_v27, 16  ;;  %v2860_v0 = vld [vmem:[#allocation2 + $0x30] ss:$8 sps:$4 sm:$0xff]   ;;  %v1062_v12 = vld [vmem:[#allocation2 + $0x24] sm:$0x1] }
  0x5a   : > { %v2404_v36 = vcombine.low %v727_v22, %v731_v29  ;;  %v643_v43 = vrot.slane %v641_v33, 5  ;;  %v1063_v13 = vld [vmem:[#allocation2 + $0x28] sm:$0xf]  ;;  %v810_v16 = vrot.slane %v808_v6, 5  ;;  %v816_v17 = vrot.slane %v814_v7, 5  ;;  %v3281_v34 = vld [vmem:[%s3412_s3 + $0x210] sm:$0xff]  }
  0x5b   : > { %v634_v40 = vrot.slane %v632_v30, 4  ;;  %v637_v41 = vrot.slane %v635_v31, 5  ;;  %v821_v18 = vrot.slane %v819_v57, 4  ;;  %v1064_v19 = vld [vmem:[#allocation2 + $0x2c] sm:$0x1]  ;;  %v824_v20 = vrot.slane %v822_v11, 5 }
  0x5c   : > { %2023 = vmatmul.mubr.bf16.gmra.mrb[12].mxu1 %v2404_v36  ;;  %v828_v21 = vshll.u32 %v791_v3, 16  ;;  %v1102_v22 = vshrl.u32 %v1061_v8, 16  ;;  %v1105_v23 = vshll.u32 %v1061_v8, 16  ;;  %v811_v24 = vor.u32 %v810_v16, %v807_v10  ;;  %v940_v46 = vld [vmem:[#allocation2 + $0x18] sm:$0xe] }
  0x5d   : > { %v638_v48 = vor.u32 %v637_v41, %v634_v40  ;;  %2128 = vmatprep.mubr.bf16.mxu1 %v2429_v49  ;;  %v1111_v26 = vshll.u32 %v1062_v12, 16  ;;  %v1116_v27 = vshrl.u32 %v1063_v13, 16  ;;  %v1119_v28 = vshll.u32 %v1063_v13, 16  ;;  %v941_v47 = vld [vmem:[#allocation2 + $0x1c] sm:$0x1] }
  0x5e   : > { %v825_v29 = vor.u32 %v824_v20, %v821_v18  ;;  %v830_v30 = vrot.slane %v828_v21, 5  ;;  %v1104_v31 = vrot.slane %v1102_v22, 4  ;;  %v1107_v33 = vrot.slane %v1105_v23, 5  ;;  %v942_v51 = vld [vmem:[#allocation2 + $0x20] sm:$0xe]  ;;  %v3293_v58 = vld [vmem:[%s3412_s3 + $0x218] sm:$0xff]  }
  0x5f   : > { %v639_v63 = vrot.slane %v638_v48, 4  ;;  %v812_v36 = vrot.slane %v811_v24, 4  ;;  %v1113_v37 = vrot.slane %v1111_v26, 5  ;;  %v1118_v38 = vrot.slane %v1116_v27, 4  ;;  %v943_v52 = vld [vmem:[#allocation2 + $0x24] sm:$0x1] }
  0x60   : > { %v1121_v39 = vrot.slane %v1119_v28, 5  ;;  %v826_v40 = vrot.slane %v825_v29, 4  ;;  %v1108_v41 = vor.u32 %v1107_v33, %v1104_v31  ;;  %v2867_v56 = vld [vmem:[#allocation2 + $0x20] ss:$8 sps:$4 sm:$0xff]   ;;  %v2415_v60 = vrot.slane %v940_v46, 9 }
  0x61   : > { %v644_v9 = vsel %vm3096_vm11, %v639_v63, %v643_v43  ;;  %v1125_v43 = vshll.u32 %v1064_v19, 16  ;;  %v817_v44 = vsel %vm3096_vm11, %v812_v36, %v816_v17  ;;  %v978_v61 = vrot.slane %v941_v47, 5  ;;  %v793_v2 = vld [vmem:[#allocation2 + $0x1c] sm:$0x1]  ;;  %v794_v3 = vld [vmem:[#allocation2 + $0x20] sm:$0xf] }
  0x62   : > { %v2392_v14 = vcombine.low %v630_v62, %v644_v9  ;;  %v1122_v45 = vor.u32 %v1121_v39, %v1118_v38  ;;  %v831_v48 = vsel %vm3096_vm11, %v826_v40, %v830_v30  ;;  %v1109_v49 = vrot.slane %v1108_v41, 4  ;;  %v792_v62 = vld [vmem:[#allocation2 + $0x18] sm:$0xf]  ;;  %v795_v6 = vld [vmem:[#allocation2 + $0x24] sm:$0x1]  ;;  %v3318_v39 = vld [vmem:[%s3412_s3 + $0x228] sm:$0xff]  }
  0x63   : > { %v1127_v50 = vrot.slane %v1125_v43, 5  ;;  %v2409_v53 = vcombine.low %v817_v44, %v831_v48  ;;  %v982_v1 = vrot.slane %v943_v52, 5  ;;  %v979_v5 = vsel %vm3078_vm9, %v2415_v60, %v978_v61  ;;  %v1065_v8 = vld [vmem:[#allocation2 + $0x30] sm:$0xf]  ;;  %v1066_v12 = vld [vmem:[#allocation2 + $0x34] sm:$0x1] }
  0x64   : > { %1957 = vmatprep.mubr.bf16.mxu0 %v2392_v14  ;;  %2129 = vmatmul.mubr.bf16.vlgmr.msra.gmra.mrb[16].mxu1 %v2862_v55  ;;  %v1123_v55 = vrot.slane %v1122_v45, 4  ;;  %v1114_v63 = vsel %vm3096_vm11, %v1109_v49, %v1113_v37  ;;  %v833_v7 = vshrl.u32 %v792_v62, 16  ;;  %v836_v57 = vshll.u32 %v792_v62, 16  ;;  %v1067_v13 = vld [vmem:[#allocation2 + $0x38] sm:$0xf]  ;;  %v3309_v20 = vld [vmem:[%s3412_s3 + $0x220] sm:$0xff]  }
  0x65   : > { %1958 = vmatmul.mubr.bf16.gmra.mrb[12].mxu0 %v2860_v0  ;;  %2775 = vmatpush3.bf16.msra.mxu1 %v3243_v32  ;;  %v2416_v0 = vrot.slane %v942_v51, 9  ;;  %v842_v10 = vshll.u32 %v793_v2, 16  ;;  %v847_v11 = vshrl.u32 %v794_v3, 16  ;;  %v850_v18 = vshll.u32 %v794_v3, 16  ;;  %v1068_v19 = vld [vmem:[#allocation2 + $0x3c] sm:$0x1] }
  0x66   : > { %2768 = vmatprep.subr.bf16.mxu1 %v3275_v15  ;;  %2063 = vmatprep.mubr.bf16.mxu0 %v2421_v35  ;;  %v1128_v4 = vsel %vm3096_vm11, %v1123_v55, %v1127_v50  ;;  %v835_v16 = vrot.slane %v833_v7, 4  ;;  %v838_v17 = vrot.slane %v836_v57, 5  ;;  %v856_v23 = vshll.u32 %v795_v6, 16  ;;  %v944_v50 = vld [vmem:[#allocation2 + $0x28] sm:$0xe] }
  0x67   : > { %v2430_v9 = vcombine.low %v1114_v63, %v1128_v4  ;;  %v983_v35 = vsel %vm3078_vm9, %v2416_v0, %v982_v1  ;;  %v844_v21 = vrot.slane %v842_v10, 5  ;;  %v849_v22 = vrot.slane %v847_v11, 4  ;;  %v945_v51 = vld [vmem:[#allocation2 + $0x2c] sm:$0x1]  ;;  %v946_v55 = vld [vmem:[#allocation2 + $0x30] sm:$0xe] }
  0x68   : > { %v2422_v14 = vcombine.low %v979_v5, %v983_v35  ;;  %v1130_v24 = vshrl.u32 %v1065_v8, 16  ;;  %v852_v26 = vrot.slane %v850_v18, 5  ;;  %v1133_v27 = vshll.u32 %v1065_v8, 16  ;;  %v2870_v63 = vld [vmem:[#allocation2 + $0x30] ss:$8 sps:$4 sm:$0xff]  }
  0x69   : > { %2776 = vmatpush3.bf16.msra.mxu1 %v3275_v15  ;;  %2136 = vmatprep.mubr.bf16.mxu1 %v2430_v9  ;;  %v1139_v28 = vshll.u32 %v1066_v12, 16  ;;  %v1144_v30 = vshrl.u32 %v1067_v13, 16  ;;  %v1147_v31 = vshll.u32 %v1067_v13, 16  ;;  %v858_v37 = vrot.slane %v856_v23, 5  ;;  %v796_v2 = vld [vmem:[#allocation2 + $0x28] sm:$0xf] }
  0x6a   : > { %2769 = vmatprep.subr.bf16.mxu1 %v3281_v34  ;;  %v1132_v29 = vrot.slane %v1130_v24, 4  ;;  %v853_v36 = vor.u32 %v852_v26, %v849_v22  ;;  %v1135_v38 = vrot.slane %v1133_v27, 5  ;;  %v406_v40 = vrot.slane %v3221_v42, 4  ;;  %v3328_v42 = vld [vmem:[%s3412_s3 + $0x230] sm:$0xff]   ;;  %v797_v5 = vld [vmem:[#allocation2 + $0x2c] sm:$0x1] }
  0x6b   : > { %v1146_v41 = vrot.slane %v1144_v30, 4  ;;  %v1149_v43 = vrot.slane %v1147_v31, 5  ;;  %v1153_v44 = vshll.u32 %v1068_v19, 16  ;;  %v1141_v47 = vrot.slane %v1139_v28, 5  ;;  %v798_v6 = vld [vmem:[#allocation2 + $0x30] sm:$0xf] }
  0x6c   : > { %2137 = vmatmul.mubr.bf16.gmra.mrb[20].mxu1 %v2867_v56  ;;  %v854_v45 = vrot.slane %v853_v36, 4  ;;  %v1136_v46 = vor.u32 %v1135_v38, %v1132_v29  ;;  %v947_v56 = vld [vmem:[#allocation2 + $0x34] sm:$0x1]  ;;  %v2417_v60 = vrot.slane %v944_v50, 9  ;;  %v986_v0 = vrot.slane %v945_v51, 5 }
  0x6d   : > { %2064 = vmatmul.mubr.bf16.vlgmr.msra.gmra.mrb[16].mxu0 %v2409_v53  ;;  %2777 = vmatpush3.bf16.msra.mxu1 %v3281_v34  ;;  %v1150_v48 = vor.u32 %v1149_v43, %v1146_v41  ;;  %v1155_v49 = vrot.slane %v1153_v44, 5  ;;  %v2418_v1 = vrot.slane %v946_v55, 9  ;;  %v990_v4 = vrot.slane %v947_v56, 5  ;;  %v799_v8 = vld [vmem:[#allocation2 + $0x34] sm:$0x1] }
  0x6e   : > { %2744 = vmatpush3.bf16.msra.mxu0 %v3243_v32  ;;  %2770 = vmatprep.subr.bf16.mxu1 %v3293_v58  ;;  %v839_v32 = vor.u32 %v838_v17, %v835_v16  ;;  %v859_v52 = vsel %vm3096_vm11, %v854_v45, %v858_v37  ;;  %v1137_v53 = vrot.slane %v1136_v46, 4  ;;  %v987_v57 = vsel %vm3078_vm9, %v2417_v60, %v986_v0  ;;  %v475_v10 = vld [vmem:[#allocation2 + $0x44] sm:$0x1]  ;;  %v1069_v16 = vld [vmem:[#allocation2 + $0x40] sm:$0xf] }
  0x6f   : > { %2745 = vmatprep.subr.bf16.mxu0 %v3275_v15  ;;  %2071 = vmatprep.mubr.bf16.mxu0 %v2422_v14  ;;  %v1151_v62 = vrot.slane %v1150_v48, 4  ;;  %v864_v9 = vshll.u32 %v796_v2, 16  ;;  %v870_v35 = vshll.u32 %v797_v5, 16  ;;  %v991_v12 = vsel %vm3078_vm9, %v2418_v1, %v990_v4  ;;  %v1071_v17 = vld [vmem:[#allocation2 + $0x48] sm:$0xf] }
  0x70   : > { %v840_v33 = vrot.slane %v839_v32, 4  ;;  %v1142_v3 = vsel %vm3096_vm11, %v1137_v53, %v1141_v47  ;;  %v875_v14 = vshrl.u32 %v798_v6, 16  ;;  %v2423_v18 = vcombine.low %v987_v57, %v991_v12  ;;  %v1072_v23 = vld [vmem:[#allocation2 + $0x4c] sm:$0x1]  ;;  %v948_v47 = vld [vmem:[#allocation2 + $0x38] sm:$0xe] }
  0x71   : > { %2778 = vmatpush3.bf16.msra.mxu1 %v3293_v58  ;;  %v1156_v7 = vsel %vm3096_vm11, %v1151_v62, %v1155_v49  ;;  %v866_v19 = vrot.slane %v864_v9, 5  ;;  %v878_v22 = vshll.u32 %v798_v6, 16  ;;  %v884_v32 = vshll.u32 %v799_v8, 16  ;;  %v950_v50 = vld [vmem:[#allocation2 + $0x40] sm:$0xe] }
  0x72   : > { %2746 = vmatpush3.bf16.msra.mxu0 %v3275_v15  ;;  %2771 = vmatprep.subr.bf16.mxu1 %v3309_v20  ;;  %v845_v15 = vsel %vm3096_vm11, %v840_v33, %v844_v21  ;;  %v2431_v11 = vcombine.low %v1142_v3, %v1156_v7  ;;  %v872_v21 = vrot.slane %v870_v35, 5  ;;  %v877_v24 = vrot.slane %v875_v14, 4  ;;  %v800_v60 = vld [vmem:[#allocation2 + $0x38] sm:$0xf]  ;;  %v801_v4 = vld [vmem:[#allocation2 + $0x3c] sm:$0x1] }
  0x73   : > { %2747 = vmatprep.subr.bf16.mxu0 %v3281_v34  ;;  %v2410_v61 = vcombine.low %v845_v15, %v859_v52  ;;  %v476_v26 = vsel %vm3061_vm5, %v406_v40, %v475_v10  ;;  %v1158_v27 = vshrl.u32 %v1069_v16, 16  ;;  %v880_v29 = vrot.slane %v878_v22, 5  ;;  %v802_v5 = vld [vmem:[#allocation2 + $0x40] sm:$0xf] }
  0x74   : > { %2144 = vmatprep.mubr.bf16.mxu1 %v2431_v11  ;;  %477 = vst [vmem:[#allocation2 + $0x44] sm:$0x1] %v476_v26  ;;  %v1161_v30 = vshll.u32 %v1069_v16, 16  ;;  %v1172_v31 = vshrl.u32 %v1071_v17, 16  ;;  %v886_v33 = vrot.slane %v884_v32, 5  ;;  %v1175_v37 = vshll.u32 %v1071_v17, 16 }
  0x75   : > { %2779 = vmatpush3.bf16.msra.mxu1 %v3309_v20  ;;  %2072 = vmatmul.mubr.bf16.gmra.mrb[20].mxu0 %v2410_v61  ;;  %v1160_v36 = vrot.slane %v1158_v27, 4  ;;  %v1181_v38 = vshll.u32 %v1072_v23, 16  ;;  %v881_v43 = vor.u32 %v880_v29, %v877_v24  ;;  %v2419_v51 = vrot.slane %v948_v47, 9  ;;  %v2873_v35 = vld [vmem:[#allocation2 + $0x40] ss:$8 sps:$4 sm:$0xff]  }
  0x76   : > { %2748 = vmatpush3.bf16.msra.mxu0 %v3281_v34  ;;  %2772 = vmatprep.subr.bf16.mxu1 %v3318_v39  ;;  %v861_v34 = vshrl.u32 %v796_v2, 16  ;;  %v1163_v59 = vrot.slane %v1161_v30, 5  ;;  %v1174_v40 = vrot.slane %v1172_v31, 4  ;;  %v1177_v44 = vrot.slane %v1175_v37, 5  ;;  %v1215_v24 = vld [vmem:[#allocation2 + $0x38] sm:$0xe] }
  0x77   : > { %2749 = vmatprep.subr.bf16.mxu0 %v3293_v58  ;;  %2145 = vmatmul.mubr.bf16.gmra.mrb[24].mxu1 %v2870_v63  ;;  %v882_v45 = vrot.slane %v881_v43, 4  ;;  %v1183_v49 = vrot.slane %v1181_v38, 5  ;;  %v2420_v56 = vrot.slane %v950_v50, 9  ;;  %v889_v1 = vshrl.u32 %v800_v60, 16  ;;  %v1216_v32 = vld [vmem:[#allocation2 + $0x3c] sm:$0x1] }
  0x78   : > { %v863_v13 = vrot.slane %v861_v34, 4  ;;  %2079 = vmatprep.mubr.bf16.mxu0 %v2423_v18  ;;  %v1164_v46 = vor.u32 %v1163_v59, %v1160_v36  ;;  %v1178_v48 = vor.u32 %v1177_v44, %v1174_v40  ;;  %v892_v57 = vshll.u32 %v800_v60, 16  ;;  %v1217_v29 = vld [vmem:[#allocation2 + $0x40] sm:$0xe]  ;;  %v1219_v38 = vld [vmem:[#allocation2 + $0x48] sm:$0xe] }
  0x79   : > { %2780 = vmatpush3.bf16.msra.mxu1 %v3318_v39  ;;  %v887_v52 = vsel %vm3096_vm11, %v882_v45, %v886_v33  ;;  %v891_v7 = vrot.slane %v889_v1, 4  ;;  %v898_v8 = vshll.u32 %v801_v4, 16  ;;  %v903_v11 = vshrl.u32 %v802_v5, 16  ;;  %v1220_v43 = vld [vmem:[#allocation2 + $0x4c] sm:$0x1] }
  0x7a   : > { %2750 = vmatpush3.bf16.msra.mxu0 %v3293_v58  ;;  %2773 = vmatprep.subr.bf16.mxu1 %v3328_v42  ;;  %v3350_v58 = vld [vmem:[%s3412_s3 + $0x238] sm:$0xff]   ;;  %v867_v28 = vor.u32 %v866_v19, %v863_v13  ;;  %v1165_v53 = vrot.slane %v1164_v46, 4  ;;  %v1179_v63 = vrot.slane %v1178_v48, 4  ;;  %v906_v12 = vshll.u32 %v802_v5, 16  ;;  %v1213_v13 = vld [vmem:[#allocation2 + $0x30] sm:$0xe] }
  0x7b   : > { %2751 = vmatprep.subr.bf16.mxu0 %v3309_v20  ;;  %v1070_v62 = vld [vmem:[#allocation2 + $0x44] sm:$0x1]  ;;  %v894_v16 = vrot.slane %v892_v57, 5  ;;  %v900_v17 = vrot.slane %v898_v8, 5  ;;  %v1214_v19 = vld [vmem:[#allocation2 + $0x34] sm:$0x1] }
  0x7c   : > { %v868_v41 = vrot.slane %v867_v28, 4  ;;  %v951_v0 = vld [vmem:[#allocation2 + $0x44] sm:$0x1]  ;;  %v1184_v6 = vsel %vm3096_vm11, %v1179_v63, %v1183_v49  ;;  %v905_v22 = vrot.slane %v903_v11, 4  ;;  %v908_v23 = vrot.slane %v906_v12, 5 }
  0x7d   : > { %2781 = vmatpush3.bf16.msra.mxu1 %v3328_v42  ;;  %v998_v3 = vrot.slane %v951_v0, 5  ;;  %v803_v34 = vld [vmem:[#allocation2 + $0x44] sm:$0x1]  ;;  %v895_v27 = vor.u32 %v894_v16, %v891_v7  ;;  %v1255_v33 = vrot.slane %v1214_v19, 5  ;;  %v2438_v36 = vrot.slane %v1215_v24, 9 }
  0x7e   : > { %2752 = vmatpush3.bf16.msra.mxu0 %v3309_v20  ;;  %2774 = vmatprep.subr.bf16.mxu1 %v3350_v58  ;;  %v873_v15 = vsel %vm3096_vm11, %v868_v41, %v872_v21  ;;  %v949_v20 = vld [vmem:[#allocation2 + $0x3c] sm:$0x1]  ;;  %v912_v18 = vshll.u32 %v803_v34, 16  ;;  %v1218_v30 = vld [vmem:[#allocation2 + $0x44] sm:$0x1]  ;;  %v909_v31 = vor.u32 %v908_v23, %v905_v22  ;;  %v1259_v37 = vrot.slane %v1216_v32, 5 }
  0x7f   : > { %2753 = vmatprep.subr.bf16.mxu0 %v3318_v39  ;;  %v994_v55 = vrot.slane %v949_v20, 5  ;;  %v2411_v61 = vcombine.low %v873_v15, %v887_v52  ;;  %v999_v10 = vsel %vm3078_vm9, %v2420_v56, %v998_v3  ;;  %v896_v41 = vrot.slane %v895_v27, 4  ;;  %v1205_v48 = vld [vmem:[#allocation2 + $0x10] sm:$0xe]  ;;  %v1206_v49 = vld [vmem:[#allocation2 + $0x14] sm:$0x1] }
  0x80   : > { %v914_v28 = vrot.slane %v912_v18, 5  ;;  %v2439_v59 = vrot.slane %v1217_v29, 9  ;;  %v1263_v40 = vrot.slane %v1218_v30, 5  ;;  %v2440_v44 = vrot.slane %v1219_v38, 9  ;;  %v1208_v52 = vld [vmem:[#allocation2 + $0x1c] sm:$0x1] }
  0x81   : > { %2782 = vmatpush3.bf16.msra.mxu1 %v3350_v58  ;;  %v995_v2 = vsel %vm3078_vm9, %v2419_v51, %v994_v55  ;;  %2080 = vmatmul.mubr.bf16.gmra.mrb[24].mxu0 %v2411_v61  ;;  %v910_v15 = vrot.slane %v909_v31, 4  ;;  %v1260_v46 = vsel %vm3078_vm9, %v2438_v36, %v1259_v37  ;;  %v1267_v47 = vrot.slane %v1220_v43, 5  ;;  %v1207_v51 = vld [vmem:[#allocation2 + $0x18] sm:$0xe]  ;;  %v1210_v63 = vld [vmem:[#allocation2 + $0x24] sm:$0x1] }
  0x82   : > { %2754 = vmatpush3.bf16.msra.mxu0 %v3318_v39  ;;  %v1167_v39 = vshll.u32 %v1070_v62, 16  ;;  %v2424_v14 = vcombine.low %v995_v2, %v999_v10  ;;  %v1264_v50 = vsel %vm3078_vm9, %v2439_v59, %v1263_v40  ;;  %v1239_v60 = vrot.slane %v1206_v49, 5  ;;  %v1209_v62 = vld [vmem:[#allocation2 + $0x20] sm:$0xe]  ;;  %v1211_v2 = vld [vmem:[#allocation2 + $0x28] sm:$0xe] }
  0x83   : > { %2755 = vmatprep.subr.bf16.mxu0 %v3328_v42  ;;  %v915_v55 = vsel %vm3096_vm11, %v910_v15, %v914_v28  ;;  %v1268_v56 = vsel %vm3078_vm9, %v2440_v44, %v1267_v47  ;;  %v2434_v61 = vrot.slane %v1207_v51, 9  ;;  %v1212_v3 = vld [vmem:[#allocation2 + $0x2c] sm:$0x1]  ;;  %v2435_v4 = vrot.slane %v1209_v62, 9 }
  0x84   : > { %v1169_v9 = vrot.slane %v1167_v39, 5  ;;  %2087 = vmatprep.mubr.bf16.mxu0 %v2424_v14  ;;  %v2444_v1 = vcombine.low %v1264_v50, %v1268_v56  ;;  %v1243_v39 = vrot.slane %v1208_v52, 5  ;;  %v2436_v54 = vrot.slane %v1211_v2, 9 }
  0x85   : > { %v1251_v34 = vrot.slane %v1212_v3, 5 }
  0x86   : > { %2756 = vmatpush3.bf16.msra.mxu0 %v3328_v42  ;;  %v1170_v21 = vsel %vm3096_vm11, %v1165_v53, %v1169_v9  ;;  %v2437_v42 = vrot.slane %v1213_v13, 9  ;;  %v2433_v53 = vrot.slane %v1205_v48, 9  ;;  %v1244_v7 = vsel %vm3078_vm9, %v2434_v61, %v1243_v39 }
  0x87   : > { %2757 = vmatprep.subr.bf16.mxu0 %v3350_v58  ;;  %v2432_v26 = vcombine.low %v1170_v21, %v1184_v6  ;;  %v1247_v6 = vrot.slane %v1210_v63, 5  ;;  %v1252_v9 = vsel %vm3078_vm9, %v2436_v54, %v1251_v34 }
  0x88   : > { %v1256_v45 = vsel %vm3078_vm9, %v2437_v42, %v1255_v33  ;;  %v1240_v5 = vsel %vm3078_vm9, %v2433_v53, %v1239_v60 }
  0x89   : > { %2152 = vmatprep.mubr.bf16.mxu1 %v2432_v26  ;;  %v2443_v20 = vcombine.low %v1256_v45, %v1260_v46  ;;  %v2441_v57 = vcombine.low %v1240_v5, %v1244_v7  ;;  %v1248_v8 = vsel %vm3078_vm9, %v2435_v4, %v1247_v6 }
  0x8a   : > { %2758 = vmatpush3.bf16.msra.mxu0 %v3350_v58  ;;  %2153 = vmatmul.mubr.bf16.gmra.mrb[28].mxu1 %v2873_v35  ;;  %v901_v58 = vsel %vm3096_vm11, %v896_v41, %v900_v17  ;;  %v2442_v35 = vcombine.low %v1248_v8, %v1252_v9 }
  0x8b   : > { %v2412_v0 = vcombine.low %v901_v58, %v915_v55  ;;  %2763 = vmatprep.mubr.bf16.mxu1 %v2443_v20 }
  0x8d   : > { %2088 = vmatmul.mubr.bf16.gmra.mrb[28].mxu0 %v2412_v0 }
  0x8e   : > { %2759 = vmatprep.mubr.bf16.mxu0 %v2441_v57 }
  0x92   : > { %2764 = vmatmul.mubr.bf16.vlgmr.msra.gmra.mrb[32].mxu1 %v2444_v1 }
  0x95   : > { %2760 = vmatmul.mubr.bf16.vlgmr.msra.gmra.mrb[32].mxu0 %v2442_v35 }
 0x105   : > { %v2627_v10 = vpop.f32.mrb[0].mxu1 }
 0x106   : > { %v2628_v11 = vpop.f32.mrb[1].mxu1 }
 0x107   : > { %v2629_v12 = vadd.f32 %v2628_v11, %v2627_v10  ;;  %v2630_v13 = vpop.f32.mrb[2].mxu1 }
 0x108   : > { %v2631_v14 = vpop.f32.mrb[3].mxu1 }
 0x109   : > { %v2632_v16 = vadd.f32 %v2631_v14, %v2630_v13 }
 0x10d   : > { %v2587_v17 = vpop.f32.mrb[0].mxu0  ;;  %v2633_v25 = vpop.f32.mrb[4].mxu1 }
 0x10e   : > { %v2588_v18 = vpop.f32.mrb[1].mxu0  ;;  %v2634_v26 = vpop.f32.mrb[5].mxu1 }
 0x10f   : > { %v2589_v19 = vadd.f32 %v2588_v18, %v2587_v17  ;;  %v2590_v21 = vpop.f32.mrb[2].mxu0  ;;  %v2635_v27 = vadd.f32 %v2634_v26, %v2633_v25  ;;  %v2636_v28 = vpop.f32.mrb[6].mxu1 }
 0x110   : > { %v2591_v22 = vpop.f32.mrb[3].mxu0  ;;  %v2637_v42 = vpop.f32.mrb[7].mxu1 }
 0x111   : > { %v2001_v23 = vadd.f32 %v2629_v12, %v2589_v19  ;;  %v2592_v24 = vadd.f32 %v2591_v22, %v2590_v21  ;;  %v2638_v29 = vadd.f32 %v2637_v42, %v2636_v28 }
 0x113   : > { %v2004_v32 = vadd.f32 %v2632_v16, %v2592_v24 }
 0x118   : > { %v2593_v30 = vpop.f32.mrb[4].mxu0 }
 0x119   : > { %v2594_v31 = vpop.f32.mrb[5].mxu0 }
 0x11a   : > { %v2595_v33 = vadd.f32 %v2594_v31, %v2593_v30  ;;  %v2596_v36 = vpop.f32.mrb[6].mxu0 }
 0x11b   : > { %v2597_v37 = vpop.f32.mrb[7].mxu0 }
 0x11c   : > { %v2009_v38 = vadd.f32 %v2635_v27, %v2595_v33  ;;  %v2598_v41 = vadd.f32 %v2597_v37, %v2596_v36 }
 0x11d   : > { %v2639_v59 = vpop.f32.mrb[8].mxu1 }
 0x11e   : > { %v2012_v43 = vadd.f32 %v2638_v29, %v2598_v41  ;;  %v2640_v40 = vpop.f32.mrb[9].mxu1 }
 0x11f   : > { %v2641_v44 = vadd.f32 %v2640_v40, %v2639_v59  ;;  %v2642_v15 = vpop.f32.mrb[10].mxu1 }
 0x120   : > { %v2643_v45 = vpop.f32.mrb[11].mxu1 }
 0x121   : > { %v2644_v46 = vadd.f32 %v2643_v45, %v2642_v15 }
 0x124   : > { %v2599_v47 = vpop.f32.mrb[8].mxu0 }
 0x125   : > { %v2600_v48 = vpop.f32.mrb[9].mxu0 }
 0x126   : > { %v2601_v49 = vadd.f32 %v2600_v48, %v2599_v47  ;;  %v2602_v58 = vpop.f32.mrb[10].mxu0 }
 0x127   : > { %v2603_v20 = vpop.f32.mrb[11].mxu0 }
 0x128   : > { %v2017_v50 = vadd.f32 %v2641_v44, %v2601_v49  ;;  %v2604_v51 = vadd.f32 %v2603_v20, %v2602_v58 }
 0x12a   : > { %v2020_v52 = vadd.f32 %v2644_v46, %v2604_v51 }
 0x12f   : > { %v2645_v53 = vpop.f32.mrb[12].mxu1 }
 0x130   : > { %v2646_v55 = vpop.f32.mrb[13].mxu1 }
 0x131   : > { %v2647_v56 = vadd.f32 %v2646_v55, %v2645_v53  ;;  %v2648_v60 = vpop.f32.mrb[14].mxu1 }
 0x132   : > { %v2649_v61 = vpop.f32.mrb[15].mxu1 }
 0x133   : > { %v2650_v62 = vadd.f32 %v2649_v61, %v2648_v60 }
 0x137   : > { %v2707_v63 = vpop.f32.mrb[16].mxu1 }
 0x138   : > { %v2605_v0 = vpop.f32.mrb[12].mxu0  ;;  %v2708_v1 = vpop.f32.mrb[17].mxu1 }
 0x139   : > { %v2606_v39 = vpop.f32.mrb[13].mxu0  ;;  %v2709_v2 = vadd.f32 %v2708_v1, %v2707_v63  ;;  %v2710_v3 = vpop.f32.mrb[18].mxu1 }
 0x13a   : > { %v2607_v4 = vadd.f32 %v2606_v39, %v2605_v0  ;;  %v2608_v5 = vpop.f32.mrb[14].mxu0  ;;  %v2711_v6 = vpop.f32.mrb[19].mxu1 }
 0x13b   : > { %v2609_v54 = vpop.f32.mrb[15].mxu0  ;;  %v2712_v34 = vadd.f32 %v2711_v6, %v2710_v3 }
 0x13c   : > { %v2025_v7 = vadd.f32 %v2647_v56, %v2607_v4  ;;  %v2610_v57 = vadd.f32 %v2609_v54, %v2608_v5 }
 0x13e   : > { %v2028_v8 = vadd.f32 %v2650_v62, %v2610_v57 }
 0x13f   : > { %v2713_v13 = vpop.f32.mrb[20].mxu1 }
 0x140   : > { %v2667_v9 = vpop.f32.mrb[16].mxu0  ;;  %v2714_v17 = vpop.f32.mrb[21].mxu1 }
 0x141   : > { %v2668_v35 = vpop.f32.mrb[17].mxu0  ;;  %v2715_v18 = vadd.f32 %v2714_v17, %v2713_v13  ;;  %v2716_v19 = vpop.f32.mrb[22].mxu1 }
 0x142   : > { %v2669_v10 = vadd.f32 %v2668_v35, %v2667_v9  ;;  %v2670_v11 = vpop.f32.mrb[18].mxu0  ;;  %v2717_v22 = vpop.f32.mrb[23].mxu1 }
 0x143   : > { %v2671_v12 = vpop.f32.mrb[19].mxu0  ;;  %v2718_v25 = vadd.f32 %v2717_v22, %v2716_v19 }
 0x144   : > { %v2066_v14 = vadd.f32 %v2669_v10, %v2001_v23  ;;  %v2672_v16 = vadd.f32 %v2671_v12, %v2670_v11 }
 0x146   : > { %v2069_v21 = vadd.f32 %v2672_v16, %v2004_v32  ;;  %v2131_v24 = vadd.f32 %v2709_v2, %v2066_v14 }
 0x148   : > { %v2134_v26 = vadd.f32 %v2712_v34, %v2069_v21  ;;  %v2673_v27 = vpop.f32.mrb[20].mxu0 }
 0x149   : > { %v2674_v28 = vpop.f32.mrb[21].mxu0 }
 0x14a   : > { %v2675_v42 = vadd.f32 %v2674_v28, %v2673_v27  ;;  %v2676_v29 = vpop.f32.mrb[22].mxu0  ;;  %v2719_v36 = vpop.f32.mrb[24].mxu1 }
 0x14b   : > { %v2677_v30 = vpop.f32.mrb[23].mxu0  ;;  %v2720_v37 = vpop.f32.mrb[25].mxu1 }
 0x14c   : > { %v2074_v31 = vadd.f32 %v2675_v42, %v2009_v38  ;;  %v2678_v33 = vadd.f32 %v2677_v30, %v2676_v29  ;;  %v2721_v23 = vadd.f32 %v2720_v37, %v2719_v36  ;;  %v2722_v59 = vpop.f32.mrb[26].mxu1 }
 0x14d   : > { %v2723_v44 = vpop.f32.mrb[27].mxu1 }
 0x14e   : > { %v2077_v41 = vadd.f32 %v2678_v33, %v2012_v43  ;;  %v2139_v40 = vadd.f32 %v2715_v18, %v2074_v31  ;;  %v2724_v15 = vadd.f32 %v2723_v44, %v2722_v59 }
 0x150   : > { %v2142_v32 = vadd.f32 %v2718_v25, %v2077_v41 }
 0x154   : > { %v2679_v45 = vpop.f32.mrb[24].mxu0 }
 0x155   : > { %v2680_v46 = vpop.f32.mrb[25].mxu0 }
 0x156   : > { %v2681_v47 = vadd.f32 %v2680_v46, %v2679_v45  ;;  %v2682_v48 = vpop.f32.mrb[26].mxu0 }
 0x157   : > { %v2683_v49 = vpop.f32.mrb[27].mxu0 }
 0x158   : > { %v2082_v58 = vadd.f32 %v2681_v47, %v2017_v50  ;;  %v2684_v20 = vadd.f32 %v2683_v49, %v2682_v48 }
 0x15a   : > { %v2085_v51 = vadd.f32 %v2684_v20, %v2020_v52  ;;  %v2147_v53 = vadd.f32 %v2721_v23, %v2082_v58 }
 0x15c   : > { %v2150_v56 = vadd.f32 %v2724_v15, %v2085_v51 }
 0x15d   : > { %v2725_v38 = vpop.f32.mrb[28].mxu1 }
 0x15e   : > { %v2726_v55 = vpop.f32.mrb[29].mxu1 }
 0x15f   : > { %v2727_v60 = vadd.f32 %v2726_v55, %v2725_v38  ;;  %v2728_v43 = vpop.f32.mrb[30].mxu1 }
 0x160   : > { %v2729_v61 = vpop.f32.mrb[31].mxu1  ;;  %v2685_v63 = vpop.f32.mrb[28].mxu0 }
 0x161   : > { %v2730_v62 = vadd.f32 %v2729_v61, %v2728_v43  ;;  %v2686_v0 = vpop.f32.mrb[29].mxu0 }
 0x162   : > { %v2687_v1 = vadd.f32 %v2686_v0, %v2685_v63  ;;  %v2688_v39 = vpop.f32.mrb[30].mxu0 }
 0x163   : > { %v2689_v3 = vpop.f32.mrb[31].mxu0 }
 0x164   : > { %v2090_v4 = vadd.f32 %v2687_v1, %v2025_v7  ;;  %v2690_v50 = vadd.f32 %v2689_v3, %v2688_v39 }
 0x165   : > { %v2765_v2 = vpop.f32.mrb[32].mxu1 }
 0x166   : > { %v2211_v5 = vpop.f32.mrb[33].mxu1  ;;  %v2155_v54 = vadd.f32 %v2727_v60, %v2090_v4  ;;  %v2093_v34 = vadd.f32 %v2690_v50, %v2028_v8 }
 0x167   : > { %v2212_v6 = vadd.f32 %v2211_v5, %v2147_v53  ;;  %v2766_v52 = vpop.f32.mrb[34].mxu1 }
 0x168   : > { %v2214_v57 = vpop.f32.mrb[35].mxu1  ;;  %v2220_v35 = vadd.f32 %v2765_v2, %v2155_v54  ;;  %v2158_v10 = vadd.f32 %v2730_v62, %v2093_v34  ;;  %v2761_v11 = vpop.f32.mrb[32].mxu0 }
 0x169   : > { %v2215_v9 = vadd.f32 %v2214_v57, %v2150_v56  ;;  %v2204_v13 = vadd.f32 %v2761_v11, %v2139_v40  ;;  %v2195_v14 = vpop.f32.mrb[33].mxu0  ;;  %v2259_v37 = vmul.f32 %v2212_v6, %v2212_v6 }
 0x16a   : > { %v2223_v7 = vadd.f32 %v2766_v52, %v2158_v10  ;;  %v2196_v16 = vadd.f32 %v2195_v14, %v2131_v24  ;;  %v2762_v17 = vpop.f32.mrb[34].mxu0  ;;  %v2261_v44 = vmul.f32 %v2220_v35, %v2220_v35 }
 0x16b   : > { %v2558_v12 = vpack.c.bf16 %v2215_v9, %v2212_v6  ;;  %v2207_v18 = vadd.f32 %v2762_v17, %v2142_v32  ;;  %v2198_v19 = vpop.f32.mrb[35].mxu0  ;;  %v2257_v29 = vmul.f32 %v2204_v13, %v2204_v13  ;;  %v2260_v59 = vmul.f32 %v2215_v9, %v2215_v9 }
 0x16c   : > { %v2563_v8 = vpack.c.bf16 %v2223_v7, %v2220_v35  ;;  %v2199_v21 = vadd.f32 %v2198_v19, %v2134_v26  ;;  %v2255_v25 = vmul.f32 %v2196_v16, %v2196_v16  ;;  %v2262_v45 = vmul.f32 %v2223_v7, %v2223_v7 }
 0x16d   : > { %2569 = vst [vmem:[%s231_s8 + $0x10] sm:$0xff] %v2558_v12   ;;  %v2553_v22 = vpack.c.bf16 %v2207_v18, %v2204_v13  ;;  %v2258_v33 = vmul.f32 %v2207_v18, %v2207_v18 }
 0x16e   : > { %2570 = vst [vmem:[%s231_s8 + $0x18] sm:$0xff] %v2563_v8   ;;  %v2548_v27 = vpack.c.bf16 %v2199_v21, %v2196_v16  ;;  %v2242_v28 = vadd.f32 %v2199_v21, %v2196_v16  ;;  %v2256_v42 = vmul.f32 %v2199_v21, %v2199_v21 }
 0x16f   : > { %2568 = vst [vmem:[%s231_s8 + $0x8] sm:$0xff] %v2553_v22  }
 0x170   : > { %2549 = vst [vmem:[%s231_s8] sm:$0xff] %v2548_v27   ;;  %v2243_v30 = vadd.f32 %v2242_v28, %v2204_v13  ;;  %v2263_v31 = vadd.f32 %v2256_v42, %v2255_v25 }
 0x172   : > { %v2244_v36 = vadd.f32 %v2243_v30, %v2207_v18  ;;  %v2264_v24 = vadd.f32 %v2263_v31, %v2257_v29 }
 0x174   : > { %v2245_v41 = vadd.f32 %v2244_v36, %v2212_v6  ;;  %v2265_v23 = vadd.f32 %v2264_v24, %v2258_v33 }
 0x176   : > { %v2246_v40 = vadd.f32 %v2245_v41, %v2215_v9  ;;  %v2266_v26 = vadd.f32 %v2265_v23, %v2259_v37 }
 0x178   : > { %v2247_v15 = vadd.f32 %v2246_v40, %v2220_v35  ;;  %v2267_v32 = vadd.f32 %v2266_v26, %v2260_v59 }
 0x17a   : > { %v2248_v46 = vadd.f32 %v2247_v15, %v2223_v7  ;;  %v2268_v47 = vadd.f32 %v2267_v32, %v2261_v44 }
 0x17c   : > { %v2249_v48 = vrot.slane %v2248_v46, 4  ;;  %v2269_v49 = vadd.f32 %v2268_v47, %v2262_v45 }
 0x17e   : > { %v2250_v58 = vadd.f32 %v2249_v48, %v2248_v46  ;;  %v2270_v20 = vrot.slane %v2269_v49, 4 }
 0x180   : > { %v2251_v51 = vrot.slane %v2250_v58, 2  ;;  %v2271_v53 = vadd.f32 %v2270_v20, %v2269_v49 }
 0x182   : > { %v2252_v38 = vadd.f32 %v2251_v51, %v2250_v58  ;;  %v2272_v55 = vrot.slane %v2271_v53, 2 }
 0x184   : > { %v2253_v56 = vrot.slane %v2252_v38, 1  ;;  %v2273_v60 = vadd.f32 %v2272_v55, %v2271_v53 }
 0x186   : > { %v2274_v43 = vrot.slane %v2273_v60, 1  ;;  %v2254_v61 = vadd.f32 %v2253_v56, %v2252_v38 }
 0x188   : > { %v2275_v62 = vadd.f32 %v2274_v43, %v2273_v60 }
 0x18a   : > { %v2277_v63 = vsel %vm430_vm1, %v2254_v61, %v2275_v62 }
 0x18b   : > { %2278 = vst [vmem:[%s235_s21] sm:$0x3] %v2277_v63 }
 0x18c PF: > { %s16_s18 = sadd.s32 1, %s2882_s18  }
 0x18d   : > { %p13_p4 = scmp.ge.s32.totalorder %s16_s18, 4  }
 0x18f   :  { %15 = sbr.rel (!%p13_p4) target bundleno = 1 (0x1), region = 80 }

</bundles_post_ra>
